<compile_context>
chip_gen: v5e
topology: v5e:2x2
jax: 0.10.0
libtpu: 0.0.40
codegen_flags: <defaults>
</compile_context>

<pallas_src>
import functools

import jax
import jax.numpy as jnp
from jax.experimental import pallas as pl
from jax.experimental.pallas import tpu as pltpu

LEAKY_SLOPE = 0.1
BN_EPS = 1e-5


# --------------------------------------------------------------------------
# Pallas kernel: fused ResidualBlock forward for `bn` batch elements
# --------------------------------------------------------------------------
def _residual_block_kernel(x_ref, w1_ref, b1_ref, w2_ref, b2_ref, o_ref,
                           ypad_ref, acc_ref, *, h, w, bn):
    """x_ref/o_ref: (bn, h*(w+2), C) bf16, width-padded-by-2 layout.
    w1: (C, C/2) bf16; w2: (9, C/2, C) bf16 (BN scale folded in);
    b1/b2: (1, C/2)/(1, C) f32 BN shifts.
    ypad_ref: flattened bf16 halo scratch ((h+2)*(w+2)+slack, C/2).
    acc_ref: (h*(w+2), C) f32 conv2 accumulator."""
    wp = w + 2
    L = h * wp
    c2 = w1_ref.shape[-1]
    R = ypad_ref.shape[0]

    # Zero ONLY the halo border: top pad row (+ left pad of data row 0) and
    # bottom pad row (+ slack rows read by the last taps).  The interior,
    # including all inter-row pad columns, is fully overwritten by the masked
    # y1 store below on every sub-iteration.
    ypad_ref[0:w + 3, :] = jnp.zeros((w + 3, c2), ypad_ref.dtype)
    bot = (h + 1) * wp
    ypad_ref[bot:R, :] = jnp.zeros((R - bot, c2), ypad_ref.dtype)

    # Rows of the padded-width grid whose column index >= w are the conv
    # padding positions; conv1 output there must be forced to zero.
    ridx = jax.lax.broadcasted_iota(jnp.int32, (L, 1), 0)
    keep = jax.lax.rem(ridx, wp) < w                        # (L, 1) bool

    w1 = w1_ref[...]
    b1 = b1_ref[...]
    b2 = b2_ref[...]

    for e in range(bn):
        x = x_ref[e]                                        # (L, C) bf16

        # conv1: 1x1, BN scale folded into w1; shift + LeakyReLU here.
        y1 = jnp.dot(x, w1, preferred_element_type=jnp.float32) + b1
        y1 = jnp.where(y1 > 0, y1, LEAKY_SLOPE * y1)
        y1 = jnp.where(keep, y1, 0.0).astype(jnp.bfloat16)  # zero the pad cols

        # ONE contiguous store of the whole interior of the flattened halo.
        ypad_ref[w + 3:w + 3 + L, :] = y1

        # conv2: 3x3 (pad=1) as 9 shifted contiguous-slab MXU matmuls,
        # accumulated in a VMEM f32 scratch (in-place MXU accumulation path).
        for k in range(9):
            di, dj = k // 3, k % 3
            off = di * wp + dj
            tap = ypad_ref[off:off + L, :]                   # zero-cost view
            contrib = jnp.dot(tap, w2_ref[k],
                              preferred_element_type=jnp.float32)
            if k == 0:
                acc_ref[...] = contrib
            else:
                acc_ref[...] += contrib

        y2 = acc_ref[...] + b2
        y2 = jnp.where(y2 > 0, y2, LEAKY_SLOPE * y2)

        # Residual add of the identity; emit bf16 (lane-dense, full-lane store).
        o_ref[e] = (y2 + x.astype(jnp.float32)).astype(o_ref.dtype)


# --------------------------------------------------------------------------
# Host-side helpers
# --------------------------------------------------------------------------
def fold_bn(wgt, gamma, beta, mean, var):
    """Fold inference BatchNorm into conv weights: returns (w*scale, shift)."""
    scale = gamma / jnp.sqrt(var + BN_EPS)
    shift = beta - mean * scale
    return wgt * scale, shift                               # scale on Cout (last dim)


def _pick_batch_block(n):
    """Batch elements per grid step.

    Single-TC chips (v5e / v6e): fold the (small) batch into one grid step to
    amortize per-step overhead.  v7x / others: keep per-element steps so the
    'parallel' grid axis can shard across TensorCores.
    """
    try:
        kind = jax.devices()[0].device_kind.lower()
    except Exception:
        return 1
    if "v5 lite" in kind or "v5e" in kind or "v6" in kind:
        return max(1, min(n, 8))
    return 1


def residual_block_forward(params, x_nchw, *, batch_block=None):
    """ResidualBlock forward. x: (N, C, H, W) f32 -> (N, C, H, W) f32."""
    n, c, h, w = x_nchw.shape
    assert c % 2 == 0
    c2 = c // 2
    wp = w + 2
    L = h * wp

    # Fold BN scale into the weights, cast MXU operands to bf16.
    w1f, b1 = fold_bn(params["w1"], *params["bn1"])          # (C, C2), (C2,)
    w2f, b2 = fold_bn(params["w2"], *params["bn2"])          # (3,3,C2,C), (C,)
    w1f = w1f.astype(jnp.bfloat16)
    w2f = w2f.reshape(9, c2, c).astype(jnp.bfloat16)
    b1 = b1.reshape(1, c2).astype(jnp.float32)
    b2 = b2.reshape(1, c).astype(jnp.float32)

    # NCHW -> lane-dense NHWC with the width padded by 2 (zeros) so the kernel
    # can fill the 3x3 halo scratch interior with a single contiguous store.
    x_og = jnp.transpose(x_nchw, (0, 2, 3, 1))
    x_og = jnp.pad(x_og, ((0, 0), (0, 0), (0, 2), (0, 0)))
    x_og = x_og.reshape(n, L, c).astype(jnp.bfloat16)

    bn = batch_block if batch_block is not None else _pick_batch_block(n)
    bn = max(1, min(bn, n))
    while n % bn:
        bn -= 1

    # Flattened halo rows: (h+2)*(w+2) plus 2 slack rows read by the last tap,
    # rounded up to a sublane multiple.  All slack rows are zeroed each step.
    R = ((h + 2) * wp + 2 + 7) // 8 * 8

    out = pl.pallas_call(
        functools.partial(_residual_block_kernel, h=h, w=w, bn=bn),
        out_shape=jax.ShapeDtypeStruct((n, L, c), jnp.bfloat16),
        grid=(n // bn,),
        in_specs=[
            pl.BlockSpec((bn, L, c), lambda i: (i, 0, 0)),    # x (padded width)
            pl.BlockSpec((c, c2), lambda i: (0, 0)),          # w1 (BN folded)
            pl.BlockSpec((1, c2), lambda i: (0, 0)),          # bn1 shift
            pl.BlockSpec((9, c2, c), lambda i: (0, 0, 0)),    # w2 (BN folded)
            pl.BlockSpec((1, c), lambda i: (0, 0)),           # bn2 shift
        ],
        out_specs=pl.BlockSpec((bn, L, c), lambda i: (i, 0, 0)),
        scratch_shapes=[
            pltpu.VMEM((R, c2), jnp.bfloat16),                # flattened halo
            pltpu.VMEM((L, c), jnp.float32),                  # conv2 accumulator
        ],
        compiler_params=pltpu.CompilerParams(
            dimension_semantics=("parallel",)),
    )(x_og, w1f, b1, w2f, b2)

    # Strip the width padding, back to NCHW f32 (spec-compatible interface).
    out = out.reshape(n, h, wp, c)[:, :, :w, :]
    return jnp.transpose(out, (0, 3, 1, 2)).astype(jnp.float32)


def residual_block_reference(params, x_nchw):
    """Pure-JAX reference mirroring the kernel's bf16/f32 cast points."""
    n, c, h, w = x_nchw.shape
    c2 = c // 2
    w1f, b1 = fold_bn(params["w1"], *params["bn1"])
    w2f, b2 = fold_bn(params["w2"], *params["bn2"])
    w1f = w1f.astype(jnp.bfloat16)
    w2f = w2f.reshape(9, c2, c).astype(jnp.bfloat16)

    x = jnp.transpose(x_nchw, (0, 2, 3, 1)).astype(jnp.bfloat16)   # NHWC bf16
    y1 = jnp.einsum("nhwc,cd->nhwd", x, w1f,
                    preferred_element_type=jnp.float32) + b1
    y1 = jnp.where(y1 > 0, y1, LEAKY_SLOPE * y1).astype(jnp.bfloat16)
    yp = jnp.pad(y1, ((0, 0), (1, 1), (1, 1), (0, 0)))
    acc = jnp.zeros((n, h, w, c), jnp.float32)
    for k in range(9):
        di, dj = k // 3, k % 3
        tap = yp[:, di:di + h, dj:dj + w, :]
        acc = acc + jnp.einsum("nhwc,cd->nhwd", tap, w2f[k],
                               preferred_element_type=jnp.float32)
    y2 = acc + b2
    y2 = jnp.where(y2 > 0, y2, LEAKY_SLOPE * y2)
    out = y2 + x.astype(jnp.float32)
    return jnp.transpose(out, (0, 3, 1, 2))


def init_residual_block_params(key, c):
    """Deterministic ResidualBlock(in_channels=c) parameters (inference BN)."""
    c2 = c // 2
    ks = jax.random.split(key, 4)

    def bn_stats(k, nchan):
        kg, kb, km, kv = jax.random.split(k, 4)
        gamma = 1.0 + 0.1 * jax.random.normal(kg, (nchan,), jnp.float32)
        beta = 0.1 * jax.random.normal(kb, (nchan,), jnp.float32)
        mean = 0.1 * jax.random.normal(km, (nchan,), jnp.float32)
        var = 1.0 + 0.1 * jnp.abs(jax.random.normal(kv, (nchan,), jnp.float32))
        return gamma, beta, mean, var

    w1 = jax.random.normal(ks[0], (c, c2), jnp.float32) / jnp.sqrt(c)
    w2 = jax.random.normal(ks[1], (3, 3, c2, c), jnp.float32) / jnp.sqrt(9 * c2)
    return {"w1": w1, "bn1": bn_stats(ks[2], c2),
            "w2": w2, "bn2": bn_stats(ks[3], c)}


if __name__ == "__main__":
    key = jax.random.PRNGKey(0)
    pkey, xkey = jax.random.split(key)

    N, C, H, W = 2, 128, 16, 16          # ResidualBlock(128) on 16x16 feature maps
    params = init_residual_block_params(pkey, C)
    x = jax.random.normal(xkey, (N, C, H, W), jnp.float32)

    out = jax.jit(residual_block_forward)(params, x)
    out = jax.block_until_ready(out)

    ref = residual_block_reference(params, x)

    assert out.shape == (N, C, H, W), out.shape
    assert bool(jnp.all(jnp.isfinite(out)))
    assert bool(jnp.allclose(out, ref, atol=6e-2, rtol=6e-2)), \
        float(jnp.max(jnp.abs(out - ref)))
    print("KERNEL_OK")
</pallas_src>

<mosaic_0001>
module attributes {stable_mosaic.version = 11 : i64} {
  func.func @_residual_block_kernel(%arg0: i32, %arg1: memref<1x288x128xbf16, #tpu.memory_space<vmem>>, %arg2: memref<128x64xbf16, #tpu.memory_space<vmem>>, %arg3: memref<1x64xf32, #tpu.memory_space<vmem>>, %arg4: memref<9x64x128xbf16, #tpu.memory_space<vmem>>, %arg5: memref<1x128xf32, #tpu.memory_space<vmem>>, %arg6: memref<1x288x128xbf16, #tpu.memory_space<vmem>>, %arg7: memref<328x64xbf16, #tpu.memory_space<vmem>>, %arg8: memref<288x128xf32, #tpu.memory_space<vmem>>) attributes {dimension_semantics = [#tpu.dimension_semantics<parallel>], iteration_bounds = array<i64: 2>, scalar_prefetch = 0 : i64, scratch_operands = 2 : i64, tpu.core_type = #tpu.core_type<tc>, window_params = [{transform_indices = @transform_0, window_bounds = array<i64: 1, 288, 128>}, {pipeline_mode = #tpu.pipeline_mode<synchronous>, transform_indices = @transform_1, window_bounds = array<i64: 128, 64>}, {pipeline_mode = #tpu.pipeline_mode<synchronous>, transform_indices = @transform_2, window_bounds = array<i64: 1, 64>}, {pipeline_mode = #tpu.pipeline_mode<synchronous>, transform_indices = @transform_3, window_bounds = array<i64: 9, 64, 128>}, {pipeline_mode = #tpu.pipeline_mode<synchronous>, transform_indices = @transform_4, window_bounds = array<i64: 1, 128>}, {transform_indices = @transform_5, window_bounds = array<i64: 1, 288, 128>}]} {
    %cst = arith.constant 0.000000e+00 : bf16
    %0 = vector.broadcast %cst : bf16 to vector<19x64xbf16>
    %c0 = arith.constant 0 : index
    %c0_0 = arith.constant 0 : index
    %1 = vector.load %arg7[%c0, %c0_0] : memref<328x64xbf16, #tpu.memory_space<vmem>>, vector<19x64xbf16>
    tpu.vector_store %arg7[%c0, %c0_0], %0 {strides = array<i32>} : memref<328x64xbf16, #tpu.memory_space<vmem>>, vector<19x64xbf16>,
    %cst_1 = arith.constant 0.000000e+00 : bf16
    %2 = vector.broadcast %cst_1 : bf16 to vector<22x64xbf16>
    %c306 = arith.constant 306 : index
    %c0_2 = arith.constant 0 : index
    %3 = vector.load %arg7[%c306, %c0_2] : memref<328x64xbf16, #tpu.memory_space<vmem>>, vector<22x64xbf16>
    tpu.vector_store %arg7[%c306, %c0_2], %2 {strides = array<i32>} : memref<328x64xbf16, #tpu.memory_space<vmem>>, vector<22x64xbf16>,
    %4 = tpu.iota {dimensions = array<i32: 0>} : vector<288x1xi32>
    %c18_i32 = arith.constant 18 : i32
    %5 = vector.broadcast %c18_i32 : i32 to vector<288x1xi32>
    %6 = arith.remsi %4, %5 : vector<288x1xi32>
    %c16_i32 = arith.constant 16 : i32
    %7 = vector.broadcast %c16_i32 : i32 to vector<288x1xi32>
    %8 = arith.cmpi slt, %6, %7 : vector<288x1xi32>
    %c0_3 = arith.constant 0 : index
    %c0_4 = arith.constant 0 : index
    %9 = vector.load %arg2[%c0_3, %c0_4] : memref<128x64xbf16, #tpu.memory_space<vmem>>, vector<128x64xbf16>
    %c0_5 = arith.constant 0 : index
    %c0_6 = arith.constant 0 : index
    %10 = vector.load %arg3[%c0_5, %c0_6] : memref<1x64xf32, #tpu.memory_space<vmem>>, vector<1x64xf32>
    %c0_7 = arith.constant 0 : index
    %c0_8 = arith.constant 0 : index
    %11 = vector.load %arg5[%c0_7, %c0_8] : memref<1x128xf32, #tpu.memory_space<vmem>>, vector<1x128xf32>
    %c0_9 = arith.constant 0 : index
    %c0_10 = arith.constant 0 : index
    %c0_11 = arith.constant 0 : index
    %12 = vector.load %arg1[%c0_9, %c0_10, %c0_11] : memref<1x288x128xbf16, #tpu.memory_space<vmem>>, vector<1x288x128xbf16>
    %13 = vector.shape_cast %12 : vector<1x288x128xbf16> to vector<288x128xbf16>
    %cst_12 = arith.constant dense<0.000000e+00> : vector<288x64xf32>
    %14 = tpu.matmul %13, %9, %cst_12 {dimension_numbers = #tpu.dot_dimension_numbers<[1], [0], [0], [1], [0, 0, 1, 1], [], []>} : vector<288x128xbf16>, vector<128x64xbf16>, vector<288x64xf32> -> vector<288x64xf32>
    %15 = vector.broadcast %10 : vector<1x64xf32> to vector<288x64xf32>
    %16 = arith.addf %14, %15 : vector<288x64xf32>
    %cst_13 = arith.constant 0.000000e+00 : f32
    %17 = vector.broadcast %cst_13 : f32 to vector<288x64xf32>
    %18 = arith.cmpf ogt, %16, %17 : vector<288x64xf32>
    %cst_14 = arith.constant 1.000000e-01 : f32
    %19 = vector.broadcast %cst_14 : f32 to vector<288x64xf32>
    %20 = arith.mulf %19, %16 : vector<288x64xf32>
    %21 = arith.select %18, %16, %20 : vector<288x64xi1>, vector<288x64xf32>
    %cst_15 = arith.constant 0.000000e+00 : f32
    %22 = vector.shape_cast %8 : vector<288x1xi1> to vector<288x1xi1>
    %23 = vector.broadcast %22 : vector<288x1xi1> to vector<288x64xi1>
    %24 = vector.broadcast %cst_15 : f32 to vector<288x64xf32>
    %25 = arith.select %23, %21, %24 : vector<288x64xi1>, vector<288x64xf32>
    %26 = arith.truncf %25 : vector<288x64xf32> to vector<288x64xbf16>
    %c19 = arith.constant 19 : index
    %c0_16 = arith.constant 0 : index
    %27 = vector.load %arg7[%c19, %c0_16] : memref<328x64xbf16, #tpu.memory_space<vmem>>, vector<288x64xbf16>
    tpu.vector_store %arg7[%c19, %c0_16], %26 {strides = array<i32>} : memref<328x64xbf16, #tpu.memory_space<vmem>>, vector<288x64xbf16>,
    %c0_17 = arith.constant 0 : index
    %c0_18 = arith.constant 0 : index
    %28 = vector.load %arg7[%c0_17, %c0_18] : memref<328x64xbf16, #tpu.memory_space<vmem>>, vector<288x64xbf16>
    %c0_19 = arith.constant 0 : index
    %c0_20 = arith.constant 0 : index
    %c0_21 = arith.constant 0 : index
    %29 = vector.load %arg4[%c0_19, %c0_20, %c0_21] : memref<9x64x128xbf16, #tpu.memory_space<vmem>>, vector<1x64x128xbf16>
    %30 = vector.shape_cast %29 : vector<1x64x128xbf16> to vector<64x128xbf16>
    %cst_22 = arith.constant dense<0.000000e+00> : vector<288x128xf32>
    %31 = tpu.matmul %28, %30, %cst_22 {dimension_numbers = #tpu.dot_dimension_numbers<[1], [0], [0], [1], [0, 0, 1, 1], [], []>} : vector<288x64xbf16>, vector<64x128xbf16>, vector<288x128xf32> -> vector<288x128xf32>
    %c0_23 = arith.constant 0 : index
    %c0_24 = arith.constant 0 : index
    %32 = vector.load %arg8[%c0_23, %c0_24] : memref<288x128xf32, #tpu.memory_space<vmem>>, vector<288x128xf32>
    tpu.vector_store %arg8[%c0_23, %c0_24], %31 {strides = array<i32>} : memref<288x128xf32, #tpu.memory_space<vmem>>, vector<288x128xf32>,
    %c1 = arith.constant 1 : index
    %c0_25 = arith.constant 0 : index
    %33 = vector.load %arg7[%c1, %c0_25] : memref<328x64xbf16, #tpu.memory_space<vmem>>, vector<288x64xbf16>
    %c1_26 = arith.constant 1 : index
    %c0_27 = arith.constant 0 : index
    %c0_28 = arith.constant 0 : index
    %34 = vector.load %arg4[%c1_26, %c0_27, %c0_28] : memref<9x64x128xbf16, #tpu.memory_space<vmem>>, vector<1x64x128xbf16>
    %35 = vector.shape_cast %34 : vector<1x64x128xbf16> to vector<64x128xbf16>
    %cst_29 = arith.constant dense<0.000000e+00> : vector<288x128xf32>
    %36 = tpu.matmul %33, %35, %cst_29 {dimension_numbers = #tpu.dot_dimension_numbers<[1], [0], [0], [1], [0, 0, 1, 1], [], []>} : vector<288x64xbf16>, vector<64x128xbf16>, vector<288x128xf32> -> vector<288x128xf32>
    %c0_30 = arith.constant 0 : index
    %c0_31 = arith.constant 0 : index
    %37 = vector.load %arg8[%c0_30, %c0_31] : memref<288x128xf32, #tpu.memory_space<vmem>>, vector<288x128xf32>
    %38 = arith.addf %37, %36 : vector<288x128xf32>
    %c0_32 = arith.constant 0 : index
    %c0_33 = arith.constant 0 : index
    %39 = vector.load %arg8[%c0_32, %c0_33] : memref<288x128xf32, #tpu.memory_space<vmem>>, vector<288x128xf32>
    tpu.vector_store %arg8[%c0_32, %c0_33], %38 {strides = array<i32>} : memref<288x128xf32, #tpu.memory_space<vmem>>, vector<288x128xf32>,
    %c2 = arith.constant 2 : index
    %c0_34 = arith.constant 0 : index
    %40 = vector.load %arg7[%c2, %c0_34] : memref<328x64xbf16, #tpu.memory_space<vmem>>, vector<288x64xbf16>
    %c2_35 = arith.constant 2 : index
    %c0_36 = arith.constant 0 : index
    %c0_37 = arith.constant 0 : index
    %41 = vector.load %arg4[%c2_35, %c0_36, %c0_37] : memref<9x64x128xbf16, #tpu.memory_space<vmem>>, vector<1x64x128xbf16>
    %42 = vector.shape_cast %41 : vector<1x64x128xbf16> to vector<64x128xbf16>
    %cst_38 = arith.constant dense<0.000000e+00> : vector<288x128xf32>
    %43 = tpu.matmul %40, %42, %cst_38 {dimension_numbers = #tpu.dot_dimension_numbers<[1], [0], [0], [1], [0, 0, 1, 1], [], []>} : vector<288x64xbf16>, vector<64x128xbf16>, vector<288x128xf32> -> vector<288x128xf32>
    %c0_39 = arith.constant 0 : index
    %c0_40 = arith.constant 0 : index
    %44 = vector.load %arg8[%c0_39, %c0_40] : memref<288x128xf32, #tpu.memory_space<vmem>>, vector<288x128xf32>
    %45 = arith.addf %44, %43 : vector<288x128xf32>
    %c0_41 = arith.constant 0 : index
    %c0_42 = arith.constant 0 : index
    %46 = vector.load %arg8[%c0_41, %c0_42] : memref<288x128xf32, #tpu.memory_space<vmem>>, vector<288x128xf32>
    tpu.vector_store %arg8[%c0_41, %c0_42], %45 {strides = array<i32>} : memref<288x128xf32, #tpu.memory_space<vmem>>, vector<288x128xf32>,
    %c18 = arith.constant 18 : index
    %c0_43 = arith.constant 0 : index
    %47 = vector.load %arg7[%c18, %c0_43] : memref<328x64xbf16, #tpu.memory_space<vmem>>, vector<288x64xbf16>
    %c3 = arith.constant 3 : index
    %c0_44 = arith.constant 0 : index
    %c0_45 = arith.constant 0 : index
    %48 = vector.load %arg4[%c3, %c0_44, %c0_45] : memref<9x64x128xbf16, #tpu.memory_space<vmem>>, vector<1x64x128xbf16>
    %49 = vector.shape_cast %48 : vector<1x64x128xbf16> to vector<64x128xbf16>
    %cst_46 = arith.constant dense<0.000000e+00> : vector<288x128xf32>
    %50 = tpu.matmul %47, %49, %cst_46 {dimension_numbers = #tpu.dot_dimension_numbers<[1], [0], [0], [1], [0, 0, 1, 1], [], []>} : vector<288x64xbf16>, vector<64x128xbf16>, vector<288x128xf32> -> vector<288x128xf32>
    %c0_47 = arith.constant 0 : index
    %c0_48 = arith.constant 0 : index
    %51 = vector.load %arg8[%c0_47, %c0_48] : memref<288x128xf32, #tpu.memory_space<vmem>>, vector<288x128xf32>
    %52 = arith.addf %51, %50 : vector<288x128xf32>
    %c0_49 = arith.constant 0 : index
    %c0_50 = arith.constant 0 : index
    %53 = vector.load %arg8[%c0_49, %c0_50] : memref<288x128xf32, #tpu.memory_space<vmem>>, vector<288x128xf32>
    tpu.vector_store %arg8[%c0_49, %c0_50], %52 {strides = array<i32>} : memref<288x128xf32, #tpu.memory_space<vmem>>, vector<288x128xf32>,
    %c19_51 = arith.constant 19 : index
    %c0_52 = arith.constant 0 : index
    %54 = vector.load %arg7[%c19_51, %c0_52] : memref<328x64xbf16, #tpu.memory_space<vmem>>, vector<288x64xbf16>
    %c4 = arith.constant 4 : index
    %c0_53 = arith.constant 0 : index
    %c0_54 = arith.constant 0 : index
    %55 = vector.load %arg4[%c4, %c0_53, %c0_54] : memref<9x64x128xbf16, #tpu.memory_space<vmem>>, vector<1x64x128xbf16>
    %56 = vector.shape_cast %55 : vector<1x64x128xbf16> to vector<64x128xbf16>
    %cst_55 = arith.constant dense<0.000000e+00> : vector<288x128xf32>
    %57 = tpu.matmul %54, %56, %cst_55 {dimension_numbers = #tpu.dot_dimension_numbers<[1], [0], [0], [1], [0, 0, 1, 1], [], []>} : vector<288x64xbf16>, vector<64x128xbf16>, vector<288x128xf32> -> vector<288x128xf32>
    %c0_56 = arith.constant 0 : index
    %c0_57 = arith.constant 0 : index
    %58 = vector.load %arg8[%c0_56, %c0_57] : memref<288x128xf32, #tpu.memory_space<vmem>>, vector<288x128xf32>
    %59 = arith.addf %58, %57 : vector<288x128xf32>
    %c0_58 = arith.constant 0 : index
    %c0_59 = arith.constant 0 : index
    %60 = vector.load %arg8[%c0_58, %c0_59] : memref<288x128xf32, #tpu.memory_space<vmem>>, vector<288x128xf32>
    tpu.vector_store %arg8[%c0_58, %c0_59], %59 {strides = array<i32>} : memref<288x128xf32, #tpu.memory_space<vmem>>, vector<288x128xf32>,
    %c20 = arith.constant 20 : index
    %c0_60 = arith.constant 0 : index
    %61 = vector.load %arg7[%c20, %c0_60] : memref<328x64xbf16, #tpu.memory_space<vmem>>, vector<288x64xbf16>
    %c5 = arith.constant 5 : index
    %c0_61 = arith.constant 0 : index
    %c0_62 = arith.constant 0 : index
    %62 = vector.load %arg4[%c5, %c0_61, %c0_62] : memref<9x64x128xbf16, #tpu.memory_space<vmem>>, vector<1x64x128xbf16>
    %63 = vector.shape_cast %62 : vector<1x64x128xbf16> to vector<64x128xbf16>
    %cst_63 = arith.constant dense<0.000000e+00> : vector<288x128xf32>
    %64 = tpu.matmul %61, %63, %cst_63 {dimension_numbers = #tpu.dot_dimension_numbers<[1], [0], [0], [1], [0, 0, 1, 1], [], []>} : vector<288x64xbf16>, vector<64x128xbf16>, vector<288x128xf32> -> vector<288x128xf32>
    %c0_64 = arith.constant 0 : index
    %c0_65 = arith.constant 0 : index
    %65 = vector.load %arg8[%c0_64, %c0_65] : memref<288x128xf32, #tpu.memory_space<vmem>>, vector<288x128xf32>
    %66 = arith.addf %65, %64 : vector<288x128xf32>
    %c0_66 = arith.constant 0 : index
    %c0_67 = arith.constant 0 : index
    %67 = vector.load %arg8[%c0_66, %c0_67] : memref<288x128xf32, #tpu.memory_space<vmem>>, vector<288x128xf32>
    tpu.vector_store %arg8[%c0_66, %c0_67], %66 {strides = array<i32>} : memref<288x128xf32, #tpu.memory_space<vmem>>, vector<288x128xf32>,
    %c36 = arith.constant 36 : index
    %c0_68 = arith.constant 0 : index
    %68 = vector.load %arg7[%c36, %c0_68] : memref<328x64xbf16, #tpu.memory_space<vmem>>, vector<288x64xbf16>
    %c6 = arith.constant 6 : index
    %c0_69 = arith.constant 0 : index
    %c0_70 = arith.constant 0 : index
    %69 = vector.load %arg4[%c6, %c0_69, %c0_70] : memref<9x64x128xbf16, #tpu.memory_space<vmem>>, vector<1x64x128xbf16>
    %70 = vector.shape_cast %69 : vector<1x64x128xbf16> to vector<64x128xbf16>
    %cst_71 = arith.constant dense<0.000000e+00> : vector<288x128xf32>
    %71 = tpu.matmul %68, %70, %cst_71 {dimension_numbers = #tpu.dot_dimension_numbers<[1], [0], [0], [1], [0, 0, 1, 1], [], []>} : vector<288x64xbf16>, vector<64x128xbf16>, vector<288x128xf32> -> vector<288x128xf32>
    %c0_72 = arith.constant 0 : index
    %c0_73 = arith.constant 0 : index
    %72 = vector.load %arg8[%c0_72, %c0_73] : memref<288x128xf32, #tpu.memory_space<vmem>>, vector<288x128xf32>
    %73 = arith.addf %72, %71 : vector<288x128xf32>
    %c0_74 = arith.constant 0 : index
    %c0_75 = arith.constant 0 : index
    %74 = vector.load %arg8[%c0_74, %c0_75] : memref<288x128xf32, #tpu.memory_space<vmem>>, vector<288x128xf32>
    tpu.vector_store %arg8[%c0_74, %c0_75], %73 {strides = array<i32>} : memref<288x128xf32, #tpu.memory_space<vmem>>, vector<288x128xf32>,
    %c37 = arith.constant 37 : index
    %c0_76 = arith.constant 0 : index
    %75 = vector.load %arg7[%c37, %c0_76] : memref<328x64xbf16, #tpu.memory_space<vmem>>, vector<288x64xbf16>
    %c7 = arith.constant 7 : index
    %c0_77 = arith.constant 0 : index
    %c0_78 = arith.constant 0 : index
    %76 = vector.load %arg4[%c7, %c0_77, %c0_78] : memref<9x64x128xbf16, #tpu.memory_space<vmem>>, vector<1x64x128xbf16>
    %77 = vector.shape_cast %76 : vector<1x64x128xbf16> to vector<64x128xbf16>
    %cst_79 = arith.constant dense<0.000000e+00> : vector<288x128xf32>
    %78 = tpu.matmul %75, %77, %cst_79 {dimension_numbers = #tpu.dot_dimension_numbers<[1], [0], [0], [1], [0, 0, 1, 1], [], []>} : vector<288x64xbf16>, vector<64x128xbf16>, vector<288x128xf32> -> vector<288x128xf32>
    %c0_80 = arith.constant 0 : index
    %c0_81 = arith.constant 0 : index
    %79 = vector.load %arg8[%c0_80, %c0_81] : memref<288x128xf32, #tpu.memory_space<vmem>>, vector<288x128xf32>
    %80 = arith.addf %79, %78 : vector<288x128xf32>
    %c0_82 = arith.constant 0 : index
    %c0_83 = arith.constant 0 : index
    %81 = vector.load %arg8[%c0_82, %c0_83] : memref<288x128xf32, #tpu.memory_space<vmem>>, vector<288x128xf32>
    tpu.vector_store %arg8[%c0_82, %c0_83], %80 {strides = array<i32>} : memref<288x128xf32, #tpu.memory_space<vmem>>, vector<288x128xf32>,
    %c38 = arith.constant 38 : index
    %c0_84 = arith.constant 0 : index
    %82 = vector.load %arg7[%c38, %c0_84] : memref<328x64xbf16, #tpu.memory_space<vmem>>, vector<288x64xbf16>
    %c8 = arith.constant 8 : index
    %c0_85 = arith.constant 0 : index
    %c0_86 = arith.constant 0 : index
    %83 = vector.load %arg4[%c8, %c0_85, %c0_86] : memref<9x64x128xbf16, #tpu.memory_space<vmem>>, vector<1x64x128xbf16>
    %84 = vector.shape_cast %83 : vector<1x64x128xbf16> to vector<64x128xbf16>
    %cst_87 = arith.constant dense<0.000000e+00> : vector<288x128xf32>
    %85 = tpu.matmul %82, %84, %cst_87 {dimension_numbers = #tpu.dot_dimension_numbers<[1], [0], [0], [1], [0, 0, 1, 1], [], []>} : vector<288x64xbf16>, vector<64x128xbf16>, vector<288x128xf32> -> vector<288x128xf32>
    %c0_88 = arith.constant 0 : index
    %c0_89 = arith.constant 0 : index
    %86 = vector.load %arg8[%c0_88, %c0_89] : memref<288x128xf32, #tpu.memory_space<vmem>>, vector<288x128xf32>
    %87 = arith.addf %86, %85 : vector<288x128xf32>
    %c0_90 = arith.constant 0 : index
    %c0_91 = arith.constant 0 : index
    %88 = vector.load %arg8[%c0_90, %c0_91] : memref<288x128xf32, #tpu.memory_space<vmem>>, vector<288x128xf32>
    tpu.vector_store %arg8[%c0_90, %c0_91], %87 {strides = array<i32>} : memref<288x128xf32, #tpu.memory_space<vmem>>, vector<288x128xf32>,
    %c0_92 = arith.constant 0 : index
    %c0_93 = arith.constant 0 : index
    %89 = vector.load %arg8[%c0_92, %c0_93] : memref<288x128xf32, #tpu.memory_space<vmem>>, vector<288x128xf32>
    %90 = vector.broadcast %11 : vector<1x128xf32> to vector<288x128xf32>
    %91 = arith.addf %89, %90 : vector<288x128xf32>
    %cst_94 = arith.constant 0.000000e+00 : f32
    %92 = vector.broadcast %cst_94 : f32 to vector<288x128xf32>
    %93 = arith.cmpf ogt, %91, %92 : vector<288x128xf32>
    %cst_95 = arith.constant 1.000000e-01 : f32
    %94 = vector.broadcast %cst_95 : f32 to vector<288x128xf32>
    %95 = arith.mulf %94, %91 : vector<288x128xf32>
    %96 = arith.select %93, %91, %95 : vector<288x128xi1>, vector<288x128xf32>
    %97 = arith.extf %13 : vector<288x128xbf16> to vector<288x128xf32>
    %98 = arith.addf %96, %97 : vector<288x128xf32>
    %99 = arith.truncf %98 : vector<288x128xf32> to vector<288x128xbf16>
    %c0_96 = arith.constant 0 : index
    %c0_97 = arith.constant 0 : index
    %c0_98 = arith.constant 0 : index
    %100 = vector.load %arg6[%c0_96, %c0_97, %c0_98] : memref<1x288x128xbf16, #tpu.memory_space<vmem>>, vector<1x288x128xbf16>
    %101 = vector.shape_cast %100 : vector<1x288x128xbf16> to vector<288x128xbf16>
    %102 = vector.shape_cast %99 : vector<288x128xbf16> to vector<1x288x128xbf16>
    tpu.vector_store %arg6[%c0_96, %c0_97, %c0_98], %102 {strides = array<i32>} : memref<1x288x128xbf16, #tpu.memory_space<vmem>>, vector<1x288x128xbf16>,
    return
  }
  func.func @transform_0(%arg0: i32) -> (i32, i32, i32) {
    %c0_i32 = arith.constant 0 : i32
    %c0_i32_0 = arith.constant 0 : i32
    %c0_i32_1 = arith.constant 0 : i32
    return %arg0, %c0_i32, %c0_i32_0 : i32, i32, i32
  }
  func.func @transform_1(%arg0: i32) -> (i32, i32) {
    %c0_i32 = arith.constant 0 : i32
    %c0_i32_0 = arith.constant 0 : i32
    %c0_i32_1 = arith.constant 0 : i32
    return %c0_i32, %c0_i32_0 : i32, i32
  }
  func.func @transform_2(%arg0: i32) -> (i32, i32) {
    %c0_i32 = arith.constant 0 : i32
    %c0_i32_0 = arith.constant 0 : i32
    %c0_i32_1 = arith.constant 0 : i32
    return %c0_i32, %c0_i32_0 : i32, i32
  }
  func.func @transform_3(%arg0: i32) -> (i32, i32, i32) {
    %c0_i32 = arith.constant 0 : i32
    %c0_i32_0 = arith.constant 0 : i32
    %c0_i32_1 = arith.constant 0 : i32
    %c0_i32_2 = arith.constant 0 : i32
    return %c0_i32, %c0_i32_0, %c0_i32_1 : i32, i32, i32
  }
  func.func @transform_4(%arg0: i32) -> (i32, i32) {
    %c0_i32 = arith.constant 0 : i32
    %c0_i32_0 = arith.constant 0 : i32
    %c0_i32_1 = arith.constant 0 : i32
    return %c0_i32, %c0_i32_0 : i32, i32
  }
  func.func @transform_5(%arg0: i32) -> (i32, i32, i32) {
    %c0_i32 = arith.constant 0 : i32
    %c0_i32_0 = arith.constant 0 : i32
    %c0_i32_1 = arith.constant 0 : i32
    return %arg0, %c0_i32, %c0_i32_0 : i32, i32, i32
  }
}

</mosaic_0001>

<bundles_post_ra>
// kernel: residual_block_forward.1
= control target key start
LH: loop header
LB: loop body
LE: loop exit
PB: predicated region body
PF: predicated region fallthrough
CT: control target
= control target key end

     0   :  { %s8687_s18 = smov 0   ;;  %s10778_s0 = inlined_call_operand.vmem [shape: bf16[2,288,128], index: 0, kind: input, shape index: {}]   ;;  %s10779_s1 = inlined_call_operand.vmem [shape: bf16[128,64], index: 1, kind: input, shape index: {}]   ;;  %s10780_s2 = inlined_call_operand.vmem [shape: f32[1,64], index: 2, kind: input, shape index: {}]   ;;  %s10781_s3 = inlined_call_operand.vmem [shape: bf16[9,64,128], index: 3, kind: input, shape index: {}]   ;;  %s10782_s4 = inlined_call_operand.vmem [shape: f32[1,128], index: 4, kind: input, shape index: {}]   ;;  %s10783_s5 = inlined_call_operand.vmem [shape: bf16[2,288,128], index: 5, kind: output, shape index: {}]  }
   0x1 LB: > { %s7163_s19 = sadd.s32 4294967295, %s8654_s18   ;;  %p7167_p0 = scmp.ge.s32.totalorder %s8654_s18, 1  ;;  %s8654_s18 = sphi %s8687_s18, %s15_s18  }
   0x2   : > { %p187_p1 = scmp.lt.s32.totalorder %s8654_s18, 3 }
   0x4   : > { %p188_p2 = pnand %p7167_p0, %p187_p1 }
   0x6   : > { %191 = sbr.rel (%p188_p2) target bundleno = 1244 (0x4dc), region = 40 }
   0xb   : > { %v8301_v0 = vld [vmem:[%s10779_s1 + $0x38] sm:$0xff]  ;;  %v8300_v1 = vld [vmem:[%s10779_s1 + $0x30] sm:$0xff]  ;;  %v8299_v2 = vld [vmem:[%s10779_s1 + $0x28] sm:$0xff]  ;;  %p215_p3 = scmp.lt.s32.totalorder %s7163_s19, 1  ;;  %v239_v13 = vlaneseq  ;;  %vm229_vm0 = vcmask 517120   ;;  %vm235_vm3 = vcmask 519169  }
   0xc   : > { %1569 = vmatpush.bf16.msra.mxu0 %v8301_v0  ;;  %v8298_v3 = vld [vmem:[%s10779_s1 + $0x20] sm:$0xff]  ;;  %v8297_v4 = vld [vmem:[%s10779_s1 + $0x18] sm:$0xff]  ;;  %v8296_v5 = vld [vmem:[%s10779_s1 + $0x10] sm:$0xff]  ;;  %vm230_vm1 = vsmask.f32 1280  ;;  %v8656_v22 = vmov 0  }
   0xd   : > { %s10939_s19 = smov (!%p215_p3, %s7163_s19), 1  ;;  %v8295_v6 = vld [vmem:[%s10779_s1 + $0x8] sm:$0xff]  ;;  %v8294_v7 = vld [vmem:[%s10779_s1] sm:$0xff]  ;;  %v8734_v14 = vshrl.u32 %v239_v13, 7  ;;  %vm8739_vm2 = vmand %vm229_vm0, %vm230_vm1  ;;  %236 = vst.msk [vmem:[#allocation2 + $0x98] sm:$0xe] %vm235_vm3, %v8656_v22 }
   0xe   : > { %s8633_s9 = smul.u32 144, %s10939_s19  ;;  %v232_v17 = vld [vmem:[#allocation2 + $0x8] sm:$0x3]  ;;  %v8341_v39 = vld [vmem:[%s10781_s3 + $0x18] sm:$0xff]  ;;  %v8340_v50 = vld [vmem:[%s10781_s3 + $0x10] sm:$0xff]  ;;  %vm226_vm9 = vcmask 519168  }
   0xf   : > { %v279_v16 = vand.u32 65535, %v8734_v14  ;;  %v280_v19 = vshrl.u32 %v8734_v14, 16  ;;  %v233_v21 = vsel %vm8739_vm2, 0, %v232_v17  ;;  %v8749_v23 = vadd.s32 8, %v8734_v14  ;;  %2579 = vmatpush.bf16.msra.mxu1 %v8341_v39  ;;  %8625 = vmatpush.bf16.msra.mxu3 %v8341_v39  ;;  %227 = vst.msk [vmem:[#allocation2] sm:$0xf] %vm226_vm9, %v8656_v22 }
  0x10   : > { %1570 = vmatpush.bf16.msra.mxu0 %v8300_v1  ;;  %s8727_s14 = scalar_lea.vmem %s10778_s0, %s8633_s9  ;;  %234 = vst [vmem:[#allocation2 + $0x8] sm:$0x3] %v233_v21  ;;  %v8762_v36 = vadd.s32 16, %v8734_v14  ;;  %v8783_v54 = vadd.s32 24, %v8734_v14  ;;  %v8339_v60 = vld [vmem:[%s10781_s3 + $0x8] sm:$0xff]  ;;  %vm2520_vm12 = vcmask 523264   ;;  %s10565_s12 = scalar_lea.vmem %s10783_s5, %s8633_s9 }
  0x11   : > { %v8302_v8 = vld [vmem:[%s8727_s14] sm:$0xff]  ;;  %v8303_v9 = vld [vmem:[%s8727_s14 + $0x8] sm:$0xff]  ;;  %v8304_v10 = vld [vmem:[%s8727_s14 + $0x10] sm:$0xff]  ;;  %v283_v20 = vmul.u32 58254, %v279_v16  ;;  %v308_v24 = vand.u32 65535, %v8749_v23  ;;  %v282_v25 = vmul.u32 14564, %v279_v16 }
  0x12   : > { %v8305_v11 = vld [vmem:[%s8727_s14 + $0x18] sm:$0xff]  ;;  %v8306_v12 = vld [vmem:[%s8727_s14 + $0x20] sm:$0xff]  ;;  %v8307_v15 = vld [vmem:[%s8727_s14 + $0x28] sm:$0xff]  ;;  %v8752_v26 = vmul.u32 14564, %v280_v19  ;;  %v309_v28 = vshrl.u32 %v8749_v23, 16  ;;  %v285_v35 = vmul.u32 58254, %v280_v19 }
  0x13   : > { %v286_v27 = vshll.u32 %v283_v20, 16  ;;  %v8755_v29 = vmul.u32 58254, %v308_v24  ;;  %v311_v32 = vmul.u32 14564, %v308_v24  ;;  %v8308_v37 = vld [vmem:[%s8727_s14 + $0x30] sm:$0xff]  ;;  %v337_v40 = vand.u32 65535, %v8762_v36  ;;  %2580 = vmatpush.bf16.msra.mxu1 %v8340_v50  ;;  %8626 = vmatpush.bf16.msra.mxu3 %v8340_v50 }
  0x14   : > { %1571 = vmatpush.bf16.msra.mxu0 %v8299_v2  ;;  %v288_v30 = vshll.u32 %v8752_v26, 16  ;;  %v8758_v33 = vmul.u32 14564, %v309_v28  ;;  %v338_v43 = vshrl.u32 %v8762_v36, 16  ;;  %v314_v47 = vmul.u32 58254, %v309_v28  ;;  %228 = vst.msk [vmem:[#allocation2 + $0x4] sm:$0xf] %vm226_vm9, %v8656_v22 }
  0x15   : > { %vm290_vm4 = vc.u32 %v282_v25, %v286_v27  ;;  %v292_v31 = vadd.s32 %v286_v27, %v282_v25  ;;  %v315_v34 = vshll.u32 %v8755_v29, 16  ;;  %v8772_v45 = vmul.u32 58254, %v337_v40  ;;  %237 = vst.msk [vmem:[#allocation2 + $0x9c] sm:$0xf] %vm226_vm9, %v8656_v22 }
  0x16   : > { %v291_v38 = vsel %vm290_vm4, 1, %v8656_v22  ;;  %v317_v41 = vshll.u32 %v8758_v33, 16  ;;  %v340_v48 = vmul.u32 14564, %v337_v40  ;;  %v8775_v49 = vmul.u32 14564, %v338_v43  ;;  %238 = vst.msk [vmem:[#allocation2 + $0xa0] sm:$0xf] %vm226_vm9, %v8656_v22 }
  0x17   : > { %vm294_vm5 = vc.u32 %v292_v31, %v288_v30  ;;  %vm319_vm6 = vc.u32 %v311_v32, %v315_v34  ;;  %v321_v42 = vadd.s32 %v315_v34, %v311_v32  ;;  %v293_v44 = vadd.s32 %v291_v38, %v285_v35  ;;  %2581 = vmatpush.bf16.msra.mxu1 %v8339_v60 }
  0x18   : > { %1572 = vmatpush.bf16.msra.mxu0 %v8298_v3  ;;  %v295_v46 = vsel %vm294_vm5, 1, %v8656_v22  ;;  %v320_v51 = vsel %vm319_vm6, 1, %v8656_v22  ;;  %v344_v52 = vshll.u32 %v8772_v45, 16  ;;  %v287_v53 = vshrl.u32 %v283_v20, 16  ;;  %8627 = vmatpush.bf16.msra.mxu3 %v8339_v60  ;;  %v8309_v20 = vld [vmem:[%s8727_s14 + $0x38] sm:$0xff] }
  0x19   : > { %vm323_vm7 = vc.u32 %v321_v42, %v317_v41  ;;  %v297_v55 = vadd.s32 %v295_v46, %v293_v44  ;;  %v346_v56 = vshll.u32 %v8775_v49, 16  ;;  %v322_v58 = vadd.s32 %v320_v51, %v314_v47 }
  0x1a   : > { %vm348_vm8 = vc.u32 %v340_v48, %v344_v52  ;;  %v350_v57 = vadd.s32 %v344_v52, %v340_v48  ;;  %v324_v59 = vsel %vm323_vm7, 1, %v8656_v22  ;;  %v343_v61 = vmul.u32 58254, %v338_v43 }
  0x1b   : > { %v366_v62 = vand.u32 65535, %v8783_v54  ;;  %v349_v63 = vsel %vm348_vm8, 1, %v8656_v22  ;;  %v367_v0 = vshrl.u32 %v8783_v54, 16  ;;  %v289_v1 = vshrl.u32 %v8752_v26, 16  ;;  %v8320_v28 = vld [vmem:[#allocation2] sm:$0xff] }
  0x1c   : > { %1573 = vmatpush.bf16.msra.mxu0 %v8297_v4  ;;  %v298_v2 = vadd.s32 %v297_v55, %v287_v53  ;;  %vm352_vm10 = vc.u32 %v350_v57, %v346_v56  ;;  %v316_v4 = vshrl.u32 %v8755_v29, 16  ;;  %v318_v17 = vshrl.u32 %v8758_v33, 16 }
  0x1d   : > { %v370_v3 = vmul.u32 58254, %v366_v62  ;;  %v345_v24 = vshrl.u32 %v8772_v45, 16  ;;  %v347_v41 = vshrl.u32 %v8775_v49, 16  ;;  %v8821_v50 = vadd.s32 40, %v8734_v14 }
  0x1e   : > { %v299_v16 = vadd.s32 %v298_v2, %v289_v1  ;;  %v8832_v2 = vld [vmem:[%s10780_s2] ss:$0 sm:$0xff]  ;;  %vm2319_vm6 = vsmask.f32 7942 }
  0x1f   : > { %v374_v33 = vshrl.u32 %v370_v3, 16  ;;  %v424_v55 = vand.u32 65535, %v8821_v50  ;;  %v425_v56 = vshrl.u32 %v8821_v50, 16 }
  0x20   : > { %1574 = vmatpush.bf16.msra.mxu0 %v8296_v5  ;;  %v326_v5 = vadd.s32 %v324_v59, %v322_v58  ;;  %v300_v39 = vshrl.u32 %v299_v16, 4 }
  0x21   : > { %v428_v59 = vmul.u32 58254, %v424_v55 }
  0x22   : > { %v327_v21 = vadd.s32 %v326_v5, %v316_v4  ;;  %v301_v52 = vmul.u32 18, %v300_v39  ;;  %v430_v4 = vmul.u32 58254, %v425_v56 }
  0x23   : > { %v431_v1 = vshll.u32 %v428_v59, 16 }
  0x24   : > { %1575 = vmatpush.bf16.msra.mxu0 %v8295_v6  ;;  %v369_v6 = vmul.u32 14564, %v366_v62  ;;  %v328_v40 = vadd.s32 %v327_v21, %v318_v17  ;;  %v427_v62 = vmul.u32 14564, %v424_v55 }
  0x26   : > { %v329_v49 = vshrl.u32 %v328_v40, 4  ;;  %vm435_vm0 = vc.u32 %v427_v62, %v431_v1  ;;  %v8858_v40 = vadd.s32 56, %v8734_v14 }
  0x28   : > { %1576 = vmatpush.bf16.msra.mxu0 %v8294_v7  ;;  %v371_v7 = vmul.u32 14564, %v367_v0 }
  0x2a   : > { %v375_v13 = vshll.u32 %v371_v7, 16  ;;  %v376_v46 = vshrl.u32 %v371_v7, 16 }
  0x2b   : > { %1577 = vmatmul.bf16.vlgmr.msra.gmra.mxu0 %v8302_v8  ;;  %v8338_v8 = vld [vmem:[%s10781_s3] sm:$0xff] }
  0x2c   : > { %2582 = vmatpush.bf16.msra.mxu1 %v8338_v8  ;;  %8628 = vmatpush.bf16.msra.mxu3 %v8338_v8 }
  0x2f   : > { %7362 = vmatmul.msk.bf16.vlgmr.msra.gmra.mxu1 %vm2520_vm12, %v8320_v28 }
  0x3b   : > { %1582 = vmatmul.bf16.gmra.mxu0 %v8303_v9  ;;  %v351_v9 = vadd.s32 %v349_v63, %v343_v61  ;;  %v8826_v63 = vmul.u32 14564, %v425_v56 }
  0x3d   : > { %v433_v5 = vshll.u32 %v8826_v63, 16 }
  0x4b   : > { %1587 = vmatmul.bf16.gmra.mxu0 %v8304_v10  ;;  %v373_v10 = vshll.u32 %v370_v3, 16  ;;  %v330_v3 = vmul.u32 18, %v329_v49  ;;  %v8869_v49 = vld [vmem:[#allocation2] sm:$0xff] }
  0x4d   : > { %vm377_vm11 = vc.u32 %v369_v6, %v373_v10  ;;  %v379_v19 = vadd.s32 %v373_v10, %v369_v6  ;;  %v8836_v6 = vadd.s32 48, %v8734_v14  ;;  %v8310_v10 = vld [vmem:[%s8727_s14 + $0x40] sm:$0xff] }
  0x4e   : > { %v378_v25 = vsel %vm377_vm11, 1, %v8656_v22  ;;  %vm1920_vm11 = vsmask.f32 5392 }
  0x4f   : > { %vm381_vm13 = vc.u32 %v379_v19, %v375_v13  ;;  %v436_v13 = vsel %vm435_vm0, 1, %v8656_v22  ;;  %v453_v16 = vand.u32 65535, %v8836_v6  ;;  %v454_v28 = vshrl.u32 %v8836_v6, 16  ;;  %vm8881_vm0 = vmand %vm235_vm3, %vm2319_vm6 }
  0x50   : > { %v382_v30 = vsel %vm381_vm13, 1, %v8656_v22 }
  0x51   : > { %v459_v39 = vmul.u32 58254, %v454_v28 }
  0x5b   : > { %1592 = vmatmul.bf16.gmra.mxu0 %v8305_v11  ;;  %v353_v11 = vsel %vm352_vm10, 1, %v8656_v22 }
  0x5c   : > { %v355_v27 = vadd.s32 %v353_v11, %v351_v9  ;;  %v437_v9 = vadd.s32 %v431_v1, %v427_v62 }
  0x5e   : > { %v356_v42 = vadd.s32 %v355_v27, %v345_v24  ;;  %vm439_vm5 = vc.u32 %v437_v9, %v433_v5  ;;  %v331_v24 = vsub.s32 %v8749_v23, %v330_v3  ;;  %v2321_v3 = vld [vmem:[#allocation2 + $0x8] sm:$0xe] }
  0x60   : > { %v357_v57 = vadd.s32 %v356_v42, %v347_v41  ;;  %vm8853_vm8 = vcmp.lt.s32.totalorder %v331_v24, 16  ;;  %v8311_v24 = vld [vmem:[%s8727_s14 + $0x48] sm:$0xff] }
  0x62   : > { %v358_v7 = vshrl.u32 %v357_v57, 4 }
  0x6b   : > { %1597 = vmatmul.bf16.gmra.mxu0 %v8306_v12  ;;  %v372_v12 = vmul.u32 58254, %v367_v0  ;;  %v302_v0 = vsub.s32 %v8734_v14, %v301_v52 }
  0x6d   : > { %v380_v29 = vadd.s32 %v378_v25, %v372_v12  ;;  %vm8841_vm4 = vcmp.lt.s32.totalorder %v302_v0, 16  ;;  %v440_v25 = vsel %vm439_vm5, 1, %v8656_v22 }
  0x6f   : > { %v384_v34 = vadd.s32 %v382_v30, %v380_v29  ;;  %v457_v29 = vmul.u32 58254, %v453_v16 }
  0x71   : > { %v385_v47 = vadd.s32 %v384_v34, %v374_v33  ;;  %v456_v34 = vmul.u32 14564, %v453_v16 }
  0x73   : > { %v386_v58 = vadd.s32 %v385_v47, %v376_v46  ;;  %v482_v47 = vand.u32 65535, %v8858_v40 }
  0x75   : > { %v387_v8 = vshrl.u32 %v386_v58, 4 }
  0x77   : > { %v8848_v27 = vmul.u32 18, %v387_v8  ;;  %v2853_v8 = vshll.u32 %v8869_v49, 16 }
  0x7b   : > { %1602 = vmatmul.bf16.gmra.mxu0 %v8307_v15  ;;  %v8808_v15 = vadd.s32 32, %v8734_v14 }
  0x7d   : > { %v395_v26 = vand.u32 65535, %v8808_v15  ;;  %v396_v31 = vshrl.u32 %v8808_v15, 16 }
  0x7f   : > { %v399_v32 = vmul.u32 58254, %v395_v26  ;;  %v398_v35 = vmul.u32 14564, %v395_v26  ;;  %v401_v43 = vmul.u32 58254, %v396_v31  ;;  %v359_v26 = vmul.u32 18, %v358_v7 }
  0x80   : > { %v485_v7 = vmul.u32 14564, %v482_v47 }
  0x81   : > { %v402_v38 = vshll.u32 %v399_v32, 16  ;;  %v403_v60 = vshrl.u32 %v399_v32, 16  ;;  %v432_v32 = vshrl.u32 %v428_v59, 16  ;;  %v360_v42 = vsub.s32 %v8762_v36, %v359_v26 }
  0x82   : > { %v461_v59 = vshrl.u32 %v457_v29, 16 }
  0x83   : > { %vm406_vm14 = vc.u32 %v398_v35, %v402_v38  ;;  %v408_v45 = vadd.s32 %v402_v38, %v398_v35  ;;  %v8851_v35 = vmul.u32 14564, %v454_v28 }
  0x84   : > { %v407_v48 = vsel %vm406_vm14, 1, %v8656_v22 }
  0x85   : > { %v409_v51 = vadd.s32 %v407_v48, %v401_v43  ;;  %v462_v43 = vshll.u32 %v8851_v35, 16  ;;  %v463_v17 = vshrl.u32 %v8851_v35, 16 }
  0x8b   : > { %1607 = vmatmul.bf16.gmra.mxu0 %v8308_v37  ;;  %v400_v37 = vmul.u32 14564, %v396_v31 }
  0x8d   : > { %v404_v44 = vshll.u32 %v400_v37, 16  ;;  %v405_v11 = vshrl.u32 %v400_v37, 16  ;;  %v460_v37 = vshll.u32 %v457_v29, 16 }
  0x8f   : > { %vm410_vm15 = vc.u32 %v408_v45, %v404_v44  ;;  %vm464_vm10 = vc.u32 %v456_v34, %v460_v37  ;;  %v466_v46 = vadd.s32 %v460_v37, %v456_v34 }
  0x90   : > { %v411_v53 = vsel %vm410_vm15, 1, %v8656_v22  ;;  %v465_v45 = vsel %vm464_vm10, 1, %v8656_v22  ;;  %vm8875_vm15 = vcmp.lt.s32.totalorder %v360_v42, 16 }
  0x91   : > { %v413_v61 = vadd.s32 %v411_v53, %v409_v51  ;;  %v389_v51 = vsub.s32 %v8783_v54, %v8848_v27  ;;  %v434_v53 = vshrl.u32 %v8826_v63, 16  ;;  %v467_v58 = vadd.s32 %v465_v45, %v459_v39 }
  0x92   : > { %vm468_vm13 = vc.u32 %v466_v46, %v462_v43  ;;  %v2851_v63 = vshrl.u32 %v8869_v49, 16  ;;  %v9286_v49 = vadd.s32 168, %v8734_v14 }
  0x93   : > { %v414_v12 = vadd.s32 %v413_v61, %v403_v60  ;;  %v483_v60 = vshrl.u32 %v8858_v40, 16  ;;  %v8873_v61 = vmul.u32 58254, %v482_v47  ;;  %v469_v5 = vsel %vm468_vm13, 1, %v8656_v22 }
  0x94   : > { %vm8902_vm6 = vcmp.lt.s32.totalorder %v389_v51, 16 }
  0x95   : > { %v415_v31 = vadd.s32 %v414_v12, %v405_v11  ;;  %v471_v11 = vadd.s32 %v469_v5, %v467_v58  ;;  %v487_v12 = vmul.u32 14564, %v483_v60  ;;  %v488_v26 = vmul.u32 58254, %v483_v60 }
  0x96   : > { %v490_v45 = vshrl.u32 %v8873_v61, 16 }
  0x97   : > { %v416_v52 = vshrl.u32 %v415_v31, 4  ;;  %v491_v28 = vshll.u32 %v487_v12, 16 }
  0x99   : > { %v8889_v16 = vmul.u32 18, %v416_v52 }
  0x9b   : > { %1612 = vmatmul.bf16.gmra.mxu0 %v8309_v20  ;;  %v438_v20 = vadd.s32 %v436_v13, %v430_v4  ;;  %v418_v60 = vsub.s32 %v8808_v15, %v8889_v16 }
  0x9d   : > { %v442_v33 = vadd.s32 %v440_v25, %v438_v20  ;;  %v472_v25 = vadd.s32 %v471_v11, %v461_v59  ;;  %vm8924_vm10 = vcmp.lt.s32.totalorder %v418_v60, 16 }
  0x9f   : > { %v443_v55 = vadd.s32 %v442_v33, %v432_v32 }
  0xa1   : > { %v444_v4 = vadd.s32 %v443_v55, %v434_v53  ;;  %v492_v53 = vshrl.u32 %v487_v12, 16 }
  0xa3   : > { %v445_v34 = vshrl.u32 %v444_v4, 4 }
  0xa8   : > { %v1578_v19 = vpop.f32.mrf.mxu0 }
  0xa9   : > { %v1579_v21 = vadd.f32 %v8832_v2, %v1578_v19  ;;  %v489_v19 = vshll.u32 %v8873_v61, 16 }
  0xab   : > { %vm1668_vm7 = vcmp.gt.f32.partialorder %v1579_v21, 0.0  ;;  %v1704_v30 = vmul.f32 0.1, %v1579_v21  ;;  %1617 = vmatmul.bf16.gmra.mxu0 %v8310_v10  ;;  %vm493_vm3 = vc.u32 %v485_v7, %v489_v19  ;;  %v495_v29 = vadd.s32 %v489_v19, %v485_v7 }
  0xac   : > { %v494_v37 = vsel %vm493_vm3, 1, %v8656_v22 }
  0xad   : > { %v1740_v38 = vsel %vm1668_vm7, %v1579_v21, %v1704_v30  ;;  %v8897_v30 = vadd.s32 64, %v8734_v14  ;;  %vm8908_vm7 = vmor %vm230_vm1, %vm1920_vm11  ;;  %v496_v46 = vadd.s32 %v494_v37, %v488_v26 }
  0xae   : > { %v1848_v41 = vsel %vm8841_vm4, %v1740_v38, 0.0  ;;  %vm497_vm4 = vc.u32 %v495_v29, %v491_v28 }
  0xaf   : > { %v1884_v44 = vpack.c.bf16 %v1848_v41, %v1848_v41  ;;  %v511_v38 = vand.u32 65535, %v8897_v30  ;;  %v498_v47 = vsel %vm497_vm4, 1, %v8656_v22  ;;  %v512_v51 = vshrl.u32 %v8897_v30, 16 }
  0xb0   : > { %v1580_v48 = vpop.f32.mrf.mxu0 }
  0xb1   : > { %v1923_v36 = vshrl.u32 %v1884_v44, 16  ;;  %v1926_v56 = vshll.u32 %v1884_v44, 16  ;;  %v1581_v57 = vadd.f32 %v8832_v2, %v1580_v48  ;;  %v473_v44 = vadd.s32 %v472_v25, %v463_v17 }
  0xb2   : > { %v516_v61 = vmul.u32 14564, %v512_v51  ;;  %v517_v7 = vmul.u32 58254, %v512_v51  ;;  %v8947_v51 = vadd.s32 80, %v8734_v14 }
  0xb3   : > { %v1925_v62 = vrot.slane %v1923_v36, 6  ;;  %v1928_v54 = vrot.slane %v1926_v56, 7  ;;  %vm1669_vm14 = vcmp.gt.f32.partialorder %v1581_v57, 0.0  ;;  %v1705_v0 = vmul.f32 0.1, %v1581_v57 }
  0xb4   : > { %v500_v36 = vadd.s32 %v498_v47, %v496_v46  ;;  %v514_v56 = vmul.u32 14564, %v511_v38  ;;  %v520_v11 = vshll.u32 %v516_v61, 16 }
  0xb5   : > { %v1929_v9 = vor.u32 %v1928_v54, %v1925_v62  ;;  %v1741_v10 = vsel %vm1669_vm14, %v1581_v57, %v1705_v0  ;;  %v515_v57 = vmul.u32 58254, %v511_v38  ;;  %v446_v54 = vmul.u32 18, %v445_v34 }
  0xb6   : > { %v1849_v13 = vsel %vm8853_vm8, %v1741_v10, 0.0  ;;  %v501_v0 = vadd.s32 %v500_v36, %v490_v45 }
  0xb7   : > { %v2322_v20 = vsel %vm8881_vm0, %v1929_v9, %v2321_v3  ;;  %v1885_v21 = vpack.c.bf16 %v1849_v13, %v1849_v13  ;;  %v1930_v35 = vrot.slane %v1929_v9, 4  ;;  %v518_v1 = vshll.u32 %v515_v57, 16 }
  0xb8   : > { %2323 = vst [vmem:[#allocation2 + $0x8] sm:$0xe] %v2322_v20  ;;  %v1583_v27 = vpop.f32.mrf.mxu0  ;;  %v474_v9 = vshrl.u32 %v473_v44, 4  ;;  %v502_v10 = vadd.s32 %v501_v0, %v492_v53  ;;  %v447_v29 = vsub.s32 %v8821_v50, %v446_v54 }
  0xb9   : > { %v1932_v31 = vshrl.u32 %v1885_v21, 16  ;;  %v1935_v32 = vshll.u32 %v1885_v21, 16  ;;  %v1584_v33 = vadd.f32 %v8832_v2, %v1583_v27  ;;  %vm522_vm1 = vc.u32 %v514_v56, %v518_v1 }
  0xba   : > { %v503_v19 = vshrl.u32 %v502_v10, 4  ;;  %v523_v20 = vsel %vm522_vm1, 1, %v8656_v22  ;;  %v524_v21 = vadd.s32 %v518_v1, %v514_v56  ;;  %v8930_v27 = vadd.s32 72, %v8734_v14 }
  0xbb   : > { %v1934_v23 = vrot.slane %v1932_v31, 6  ;;  %v1937_v39 = vrot.slane %v1935_v32, 7  ;;  %vm1670_vm5 = vcmp.gt.f32.partialorder %v1584_v33, 0.0  ;;  %v1706_v41 = vmul.f32 0.1, %v1584_v33  ;;  %1622 = vmatmul.bf16.gmra.mxu0 %v8311_v24 }
  0xbc   : > { %v525_v26 = vadd.s32 %v523_v20, %v517_v7  ;;  %v519_v31 = vshrl.u32 %v515_v57, 16  ;;  %vm526_vm11 = vc.u32 %v524_v21, %v520_v11  ;;  %v475_v37 = vmul.u32 18, %v474_v9 }
  0xbd   : > { %v1938_v48 = vor.u32 %v1937_v39, %v1934_v23  ;;  %v1742_v52 = vsel %vm1670_vm5, %v1584_v33, %v1706_v41  ;;  %v527_v38 = vsel %vm526_vm11, 1, %v8656_v22  ;;  %v521_v39 = vshrl.u32 %v516_v61, 16 }
  0xbe   : > { %v1850_v55 = vsel %vm8875_vm15, %v1742_v52, 0.0  ;;  %v529_v41 = vadd.s32 %v527_v38, %v525_v26  ;;  %v540_v42 = vand.u32 65535, %v8930_v27  ;;  %v541_v50 = vshrl.u32 %v8930_v27, 16 }
  0xbf   : > { %v1939_v58 = vsel %vm8908_vm7, %v1930_v35, %v1938_v48  ;;  %v1886_v59 = vpack.c.bf16 %v1850_v55, %v1850_v55  ;;  %v1940_v17 = vrot.slane %v1938_v48, 4  ;;  %v8312_v35 = vld [vmem:[%s8727_s14 + $0x50] sm:$0xff]  ;;  %v8944_v47 = vmul.u32 18, %v503_v19 }
  0xc0   : > { %2324 = vst.msk [vmem:[#allocation2 + $0xc] sm:$0xf] %vm226_vm9, %v1939_v58  ;;  %v1585_v62 = vpop.f32.mrf.mxu0  ;;  %v530_v48 = vadd.s32 %v529_v41, %v519_v31  ;;  %v543_v52 = vmul.u32 14564, %v540_v42  ;;  %v544_v53 = vmul.u32 58254, %v540_v42  ;;  %vm8949_vm14 = vcmp.lt.s32.totalorder %v447_v29, 16 }
  0xc1   : > { %v1942_v3 = vshrl.u32 %v1886_v59, 16  ;;  %v1945_v4 = vshll.u32 %v1886_v59, 16  ;;  %v1586_v5 = vadd.f32 %v8832_v2, %v1585_v62  ;;  %v476_v58 = vsub.s32 %v8836_v6, %v475_v37 }
  0xc2   : > { %v531_v59 = vadd.s32 %v530_v48, %v521_v39  ;;  %v545_v60 = vmul.u32 14564, %v541_v50  ;;  %v547_v61 = vshll.u32 %v544_v53, 16  ;;  %v546_v1 = vmul.u32 58254, %v541_v50 }
  0xc3   : > { %v1944_v12 = vrot.slane %v1942_v3, 6  ;;  %v1947_v15 = vrot.slane %v1945_v4, 7  ;;  %vm1671_vm8 = vcmp.gt.f32.partialorder %v1586_v5, 0.0  ;;  %v1707_v13 = vmul.f32 0.1, %v1586_v5 }
  0xc4   : > { %v549_v4 = vshll.u32 %v545_v60, 16  ;;  %v570_v7 = vshrl.u32 %v8947_v51, 16  ;;  %v505_v6 = vsub.s32 %v8858_v40, %v8944_v47  ;;  %vm551_vm15 = vc.u32 %v543_v52, %v547_v61 }
  0xc5   : > { %v1948_v24 = vor.u32 %v1947_v15, %v1944_v12  ;;  %v1743_v25 = vsel %vm1671_vm8, %v1586_v5, %v1707_v13  ;;  %v569_v5 = vand.u32 65535, %v8947_v51  ;;  %v532_v12 = vshrl.u32 %v531_v59, 4 }
  0xc6   : > { %v1851_v28 = vsel %vm8902_vm6, %v1743_v25, 0.0  ;;  %v548_v15 = vshrl.u32 %v544_v53, 16  ;;  %v552_v13 = vsel %vm551_vm15, 1, %v8656_v22  ;;  %v553_v16 = vadd.s32 %v547_v61, %v543_v52  ;;  %v8313_v52 = vld [vmem:[%s8727_s14 + $0x58] sm:$0xff] }
  0xc7   : > { %v1949_v32 = vsel %vm8908_vm7, %v1940_v17, %v1948_v24  ;;  %v1887_v33 = vpack.c.bf16 %v1851_v28, %v1851_v28  ;;  %v8321_v34 = vld [vmem:[#allocation2 + $0x8] sm:$0xff]  ;;  %v1950_v62 = vrot.slane %v1948_v24, 4  ;;  %v554_v21 = vadd.s32 %v552_v13, %v546_v1 }
  0xc8   : > { %2325 = vst.msk [vmem:[#allocation2 + $0x10] sm:$0xf] %vm226_vm9, %v1949_v32  ;;  %v1588_v23 = vpop.f32.mrf.mxu0  ;;  %7363 = vmatmul.msk.bf16.gmra.mxu1 %vm2520_vm12, %v8321_v34  ;;  %vm555_vm0 = vc.u32 %v553_v16, %v549_v4  ;;  %v572_v24 = vmul.u32 14564, %v569_v5  ;;  %v573_v25 = vmul.u32 58254, %v569_v5  ;;  %v8965_v26 = vmul.u32 14564, %v570_v7 }
  0xc9   : > { %v1952_v44 = vshrl.u32 %v1887_v33, 16  ;;  %v1955_v45 = vshll.u32 %v1887_v33, 16  ;;  %v1589_v46 = vadd.f32 %v8832_v2, %v1588_v23  ;;  %vm8967_vm4 = vcmp.lt.s32.totalorder %v476_v58, 16 }
  0xca   : > { %v550_v34 = vshrl.u32 %v545_v60, 16  ;;  %v576_v37 = vshll.u32 %v573_v25, 16  ;;  %v8972_v39 = vmul.u32 18, %v532_v12  ;;  %v575_v50 = vmul.u32 58254, %v570_v7 }
  0xcb   : > { %v1954_v55 = vrot.slane %v1952_v44, 6  ;;  %v1957_v36 = vrot.slane %v1955_v45, 7  ;;  %vm1672_vm13 = vcmp.gt.f32.partialorder %v1589_v46, 0.0  ;;  %v1708_v56 = vmul.f32 0.1, %v1589_v46  ;;  %1627 = vmatmul.bf16.gmra.mxu0 %v8312_v35 }
  0xcc   : > { %v556_v35 = vsel %vm555_vm0, 1, %v8656_v22  ;;  %v578_v44 = vshll.u32 %v8965_v26, 16  ;;  %vm580_vm5 = vc.u32 %v572_v24, %v576_v37  ;;  %v582_v58 = vadd.s32 %v576_v37, %v572_v24 }
  0xcd   : > { %v1958_v54 = vor.u32 %v1957_v36, %v1954_v55  ;;  %v1744_v0 = vsel %vm1672_vm13, %v1589_v46, %v1708_v56  ;;  %v558_v41 = vadd.s32 %v556_v35, %v554_v21  ;;  %v577_v55 = vshrl.u32 %v573_v25, 16 }
  0xce   : > { %v1852_v3 = vsel %vm8924_vm10, %v1744_v0, 0.0  ;;  %v579_v56 = vshrl.u32 %v8965_v26, 16  ;;  %v581_v57 = vsel %vm580_vm5, 1, %v8656_v22  ;;  %v8984_v59 = vadd.s32 88, %v8734_v14 }
  0xcf   : > { %v1959_v9 = vsel %vm8908_vm7, %v1950_v62, %v1958_v54  ;;  %v1888_v10 = vpack.c.bf16 %v1852_v3, %v1852_v3  ;;  %v1960_v33 = vrot.slane %v1958_v54, 4  ;;  %v559_v53 = vadd.s32 %v558_v41, %v548_v15 }
  0xd0   : > { %2326 = vst.msk [vmem:[#allocation2 + $0x14] sm:$0xf] %vm226_vm9, %v1959_v9  ;;  %v1590_v11 = vpop.f32.mrf.mxu0  ;;  %v583_v0 = vadd.s32 %v581_v57, %v575_v50  ;;  %vm584_vm6 = vc.u32 %v582_v58, %v578_v44  ;;  %v598_v1 = vand.u32 65535, %v8984_v59  ;;  %v599_v3 = vshrl.u32 %v8984_v59, 16 }
  0xd1   : > { %v1962_v17 = vshrl.u32 %v1888_v10, 16  ;;  %v1965_v19 = vshll.u32 %v1888_v10, 16  ;;  %v1591_v20 = vadd.f32 %v8832_v2, %v1590_v11  ;;  %v560_v54 = vadd.s32 %v559_v53, %v550_v34 }
  0xd2   : > { %v585_v11 = vsel %vm584_vm6, 1, %v8656_v22  ;;  %v602_v12 = vmul.u32 58254, %v598_v1  ;;  %v8996_v24 = vadd.s32 96, %v8734_v14  ;;  %vm9003_vm8 = vcmp.lt.s32.totalorder %v505_v6, 16 }
  0xd3   : > { %v1964_v28 = vrot.slane %v1962_v17, 6  ;;  %v1967_v29 = vrot.slane %v1965_v19, 7  ;;  %vm1673_vm3 = vcmp.gt.f32.partialorder %v1591_v20, 0.0  ;;  %v1709_v31 = vmul.f32 0.1, %v1591_v20 }
  0xd4   : > { %v561_v10 = vshrl.u32 %v560_v54, 4  ;;  %v587_v16 = vadd.s32 %v585_v11, %v583_v0  ;;  %v8991_v17 = vmul.u32 14564, %v599_v3  ;;  %v605_v21 = vshll.u32 %v602_v12, 16 }
  0xd5   : > { %v1968_v38 = vor.u32 %v1967_v29, %v1964_v28  ;;  %v1745_v23 = vsel %vm1673_vm3, %v1591_v20, %v1709_v31  ;;  %v601_v20 = vmul.u32 14564, %v598_v1  ;;  %v534_v32 = vsub.s32 %v8897_v30, %v8972_v39 }
  0xd6   : > { %v1853_v42 = vsel %vm8949_vm14, %v1745_v23, 0.0  ;;  %v588_v29 = vadd.s32 %v587_v16, %v577_v55  ;;  %v604_v34 = vmul.u32 58254, %v599_v3  ;;  %v607_v35 = vshll.u32 %v8991_v17, 16 }
  0xd7   : > { %v1969_v45 = vsel %vm8908_vm7, %v1960_v33, %v1968_v38  ;;  %v1889_v46 = vpack.c.bf16 %v1853_v42, %v1853_v42  ;;  %v8322_v48 = vld [vmem:[#allocation2 + $0x10] sm:$0xff]  ;;  %v1970_v9 = vrot.slane %v1968_v38, 4  ;;  %v562_v33 = vmul.u32 18, %v561_v10 }
  0xd8   : > { %2327 = vst.msk [vmem:[#allocation2 + $0x18] sm:$0xf] %vm226_vm9, %v1969_v45  ;;  %v1593_v36 = vpop.f32.mrf.mxu0  ;;  %7364 = vmatmul.msk.bf16.gmra.mxu1 %vm2520_vm12, %v8322_v48  ;;  %v589_v47 = vadd.s32 %v588_v29, %v579_v56  ;;  %vm609_vm10 = vc.u32 %v601_v20, %v605_v21  ;;  %v611_v6 = vadd.s32 %v605_v21, %v601_v20  ;;  %v627_v41 = vand.u32 65535, %v8996_v24 }
  0xd9   : > { %v1972_v60 = vshrl.u32 %v1889_v46, 16  ;;  %v1975_v61 = vshll.u32 %v1889_v46, 16  ;;  %v1594_v62 = vadd.f32 %v8832_v2, %v1593_v36  ;;  %v606_v30 = vshrl.u32 %v602_v12, 16 }
  0xda   : > { %v610_v39 = vsel %vm609_vm10, 1, %v8656_v22  ;;  %vm613_vm13 = vc.u32 %v611_v6, %v607_v35  ;;  %v628_v45 = vshrl.u32 %v8996_v24, 16  ;;  %vm9018_vm14 = vcmp.lt.s32.totalorder %v534_v32, 16 }
  0xdb   : > { %v1974_v4 = vrot.slane %v1972_v60, 6  ;;  %v1977_v5 = vrot.slane %v1975_v61, 7  ;;  %vm1674_vm1 = vcmp.gt.f32.partialorder %v1594_v62, 0.0  ;;  %v1710_v7 = vmul.f32 0.1, %v1594_v62  ;;  %1632 = vmatmul.bf16.gmra.mxu0 %v8313_v52 }
  0xdc   : > { %v612_v52 = vadd.s32 %v610_v39, %v604_v34  ;;  %v614_v53 = vsel %vm613_vm13, 1, %v8656_v22  ;;  %v590_v56 = vshrl.u32 %v589_v47, 4  ;;  %v631_v57 = vmul.u32 58254, %v627_v41 }
  0xdd   : > { %v1978_v15 = vor.u32 %v1977_v5, %v1974_v4  ;;  %v1746_v13 = vsel %vm1674_vm1, %v1594_v62, %v1710_v7  ;;  %v8314_v62 = vld [vmem:[%s8727_s14 + $0x60] sm:$0xff]  ;;  %v563_v54 = vsub.s32 %v8930_v27, %v562_v33  ;;  %v608_v3 = vshrl.u32 %v8991_v17, 16 }
  0xde   : > { %v1854_v19 = vsel %vm8967_vm4, %v1746_v13, 0.0  ;;  %v616_v0 = vadd.s32 %v614_v53, %v612_v52  ;;  %v630_v4 = vmul.u32 14564, %v627_v41  ;;  %v632_v5 = vmul.u32 14564, %v628_v45 }
  0xdf   : > { %v1979_v25 = vsel %vm8908_vm7, %v1970_v9, %v1978_v15  ;;  %v1890_v26 = vpack.c.bf16 %v1854_v19, %v1854_v19  ;;  %v1980_v37 = vrot.slane %v1978_v15, 4  ;;  %v634_v7 = vshll.u32 %v631_v57, 16 }
  0xe0   : > { %2328 = vst.msk [vmem:[#allocation2 + $0x1c] sm:$0xf] %vm226_vm9, %v1979_v25  ;;  %v1595_v31 = vpop.f32.mrf.mxu0  ;;  %v617_v12 = vadd.s32 %v616_v0, %v606_v30  ;;  %v591_v13 = vmul.u32 18, %v590_v56  ;;  %v633_v16 = vmul.u32 58254, %v628_v45  ;;  %v636_v27 = vshll.u32 %v632_v5, 16 }
  0xe1   : > { %v1982_v38 = vshrl.u32 %v1890_v26, 16  ;;  %v1985_v23 = vshll.u32 %v1890_v26, 16  ;;  %v1596_v40 = vadd.f32 %v8832_v2, %v1595_v31  ;;  %vm9030_vm0 = vcmp.lt.s32.totalorder %v563_v54, 16 }
  0xe2   : > { %v618_v25 = vadd.s32 %v617_v12, %v608_v3  ;;  %vm638_vm3 = vc.u32 %v630_v4, %v634_v7  ;;  %v640_v26 = vadd.s32 %v634_v7, %v630_v4  ;;  %v9035_v28 = vadd.s32 104, %v8734_v14  ;;  %v8315_v12 = vld [vmem:[%s8727_s14 + $0x68] sm:$0xff] }
  0xe3   : > { %v1984_v42 = vrot.slane %v1982_v38, 6  ;;  %v1987_v50 = vrot.slane %v1985_v23, 7  ;;  %vm1675_vm11 = vcmp.gt.f32.partialorder %v1596_v40, 0.0  ;;  %v1711_v44 = vmul.f32 0.1, %v1596_v40 }
  0xe4   : > { %v635_v32 = vshrl.u32 %v631_v57, 16  ;;  %v639_v33 = vsel %vm638_vm3, 1, %v8656_v22  ;;  %v619_v35 = vshrl.u32 %v618_v25, 4  ;;  %vm642_vm4 = vc.u32 %v640_v26, %v636_v27 }
  0xe5   : > { %v1988_v46 = vor.u32 %v1987_v50, %v1984_v42  ;;  %v1747_v48 = vsel %vm1675_vm11, %v1596_v40, %v1711_v44  ;;  %v592_v40 = vsub.s32 %v8947_v51, %v591_v13  ;;  %v643_v47 = vsel %vm642_vm4, 1, %v8656_v22 }
  0xe6   : > { %v1855_v55 = vsel %vm9003_vm8, %v1747_v48, 0.0  ;;  %v637_v41 = vshrl.u32 %v632_v5, 16  ;;  %v656_v50 = vand.u32 65535, %v9035_v28  ;;  %v657_v44 = vshrl.u32 %v9035_v28, 16 }
  0xe7   : > { %v1989_v58 = vsel %vm8908_vm7, %v1980_v37, %v1988_v46  ;;  %v1891_v60 = vpack.c.bf16 %v1855_v55, %v1855_v55  ;;  %v8323_v61 = vld [vmem:[#allocation2 + $0x18] sm:$0xff]  ;;  %v1990_v15 = vrot.slane %v1988_v46, 4  ;;  %v641_v37 = vadd.s32 %v639_v33, %v633_v16 }
  0xe8   : > { %2329 = vst.msk [vmem:[#allocation2 + $0x20] sm:$0xf] %vm226_vm9, %v1989_v58  ;;  %v1598_v1 = vpop.f32.mrf.mxu0  ;;  %7365 = vmatmul.msk.bf16.gmra.mxu1 %vm2520_vm12, %v8323_v61  ;;  %v9049_v46 = vadd.s32 112, %v8734_v14  ;;  %v620_v48 = vmul.u32 18, %v619_v35  ;;  %v659_v52 = vmul.u32 14564, %v656_v50  ;;  %v660_v53 = vmul.u32 58254, %v656_v50 }
  0xe9   : > { %v1992_v9 = vshrl.u32 %v1891_v60, 16  ;;  %v1995_v10 = vshll.u32 %v1891_v60, 16  ;;  %v1599_v11 = vadd.f32 %v8832_v2, %v1598_v1  ;;  %v645_v42 = vadd.s32 %v643_v47, %v641_v37 }
  0xea   : > { %vm9051_vm6 = vcmp.lt.s32.totalorder %v592_v40, 16  ;;  %v661_v61 = vmul.u32 14564, %v657_v44  ;;  %v662_v0 = vmul.u32 58254, %v657_v44  ;;  %v663_v1 = vshll.u32 %v660_v53, 16 }
  0xeb   : > { %v1994_v19 = vrot.slane %v1992_v9, 6  ;;  %v1997_v20 = vrot.slane %v1995_v10, 7  ;;  %vm1676_vm15 = vcmp.gt.f32.partialorder %v1599_v11, 0.0  ;;  %v1712_v21 = vmul.f32 0.1, %v1599_v11  ;;  %1637 = vmatmul.bf16.gmra.mxu0 %v8314_v62 }
  0xec   : > { %v646_v51 = vadd.s32 %v645_v42, %v635_v32  ;;  %v665_v5 = vshll.u32 %v661_v61, 16  ;;  %v685_v7 = vand.u32 65535, %v9049_v46  ;;  %vm667_vm1 = vc.u32 %v659_v52, %v663_v1 }
  0xed   : > { %v1998_v29 = vor.u32 %v1997_v20, %v1994_v19  ;;  %v1748_v31 = vsel %vm1676_vm15, %v1599_v11, %v1712_v21  ;;  %v664_v16 = vshrl.u32 %v660_v53, 16  ;;  %v668_v27 = vsel %vm667_vm1, 1, %v8656_v22 }
  0xee   : > { %v1856_v34 = vsel %vm9018_vm14, %v1748_v31, 0.0  ;;  %v647_v60 = vadd.s32 %v646_v51, %v637_v41  ;;  %v669_v19 = vadd.s32 %v663_v1, %v659_v52  ;;  %v686_v20 = vshrl.u32 %v9049_v46, 16 }
  0xef   : > { %v1999_v38 = vsel %vm8908_vm7, %v1990_v15, %v1998_v29  ;;  %v1892_v23 = vpack.c.bf16 %v1856_v34, %v1856_v34  ;;  %v2000_v57 = vrot.slane %v1998_v29, 4  ;;  %v621_v15 = vsub.s32 %v8984_v59, %v620_v48 }
  0xf0   : > { %2330 = vst.msk [vmem:[#allocation2 + $0x24] sm:$0xf] %vm226_vm9, %v1999_v38  ;;  %v1600_v6 = vpop.f32.mrf.mxu0  ;;  %v648_v4 = vshrl.u32 %v647_v60, 4  ;;  %v670_v26 = vadd.s32 %v668_v27, %v662_v0  ;;  %v666_v31 = vshrl.u32 %v661_v61, 16  ;;  %vm671_vm8 = vc.u32 %v669_v19, %v665_v5 }
  0xf1   : > { %v2002_v30 = vshrl.u32 %v1892_v23, 16  ;;  %v2005_v39 = vshll.u32 %v1892_v23, 16  ;;  %v1601_v45 = vadd.f32 %v8832_v2, %v1600_v6  ;;  %v9067_v59 = vmul.u32 58254, %v685_v7 }
  0xf2   : > { %v649_v29 = vmul.u32 18, %v648_v4  ;;  %vm9069_vm11 = vcmp.lt.s32.totalorder %v621_v15, 16  ;;  %v672_v38 = vsel %vm671_vm8, 1, %v8656_v22  ;;  %v688_v23 = vmul.u32 14564, %v685_v7 }
  0xf3   : > { %v2004_v55 = vrot.slane %v2002_v30, 6  ;;  %v2007_v36 = vrot.slane %v2005_v39, 7  ;;  %vm1677_vm5 = vcmp.gt.f32.partialorder %v1601_v45, 0.0  ;;  %v1713_v56 = vmul.f32 0.1, %v1601_v45 }
  0xf4   : > { %v690_v40 = vmul.u32 14564, %v686_v20  ;;  %v674_v41 = vadd.s32 %v672_v38, %v670_v26  ;;  %v692_v42 = vshll.u32 %v9067_v59, 16  ;;  %v650_v44 = vsub.s32 %v8996_v24, %v649_v29  ;;  %v8316_v26 = vld [vmem:[%s8727_s14 + $0x70] sm:$0xff] }
  0xf5   : > { %v2008_v62 = vor.u32 %v2007_v36, %v2004_v55  ;;  %v1749_v54 = vsel %vm1677_vm5, %v1601_v45, %v1713_v56  ;;  %v691_v30 = vmul.u32 58254, %v686_v20  ;;  %v693_v52 = vshrl.u32 %v9067_v59, 16 }
  0xf6   : > { %v1857_v3 = vsel %vm9030_vm0, %v1749_v54, 0.0  ;;  %v694_v39 = vshll.u32 %v690_v40, 16  ;;  %v675_v51 = vadd.s32 %v674_v41, %v664_v16  ;;  %v695_v55 = vshrl.u32 %v690_v40, 16 }
  0xf7   : > { %v2009_v9 = vsel %vm8908_vm7, %v2000_v57, %v2008_v62  ;;  %v1893_v10 = vpack.c.bf16 %v1857_v3, %v1857_v3  ;;  %v8324_v11 = vld [vmem:[#allocation2 + $0x20] sm:$0xff]  ;;  %v2010_v37 = vrot.slane %v2008_v62, 4  ;;  %vm696_vm13 = vc.u32 %v688_v23, %v692_v42 }
  0xf8   : > { %2331 = vst.msk [vmem:[#allocation2 + $0x28] sm:$0xf] %vm226_vm9, %v2009_v9  ;;  %v1603_v13 = vpop.f32.mrf.mxu0  ;;  %7366 = vmatmul.msk.bf16.gmra.mxu1 %vm2520_vm12, %v8324_v11  ;;  %v698_v36 = vadd.s32 %v692_v42, %v688_v23  ;;  %v9083_v56 = vadd.s32 120, %v8734_v14  ;;  %v676_v60 = vadd.s32 %v675_v51, %v666_v31  ;;  %v697_v61 = vsel %vm696_vm13, 1, %v8656_v22 }
  0xf9   : > { %v2012_v21 = vshrl.u32 %v1893_v10, 16  ;;  %v2015_v17 = vshll.u32 %v1893_v10, 16  ;;  %v1604_v25 = vadd.f32 %v8832_v2, %v1603_v13  ;;  %vm9089_vm0 = vcmp.lt.s32.totalorder %v650_v44, 16 }
  0xfa   : > { %vm700_vm14 = vc.u32 %v698_v36, %v694_v39  ;;  %v714_v62 = vand.u32 65535, %v9083_v56  ;;  %v715_v54 = vshrl.u32 %v9083_v56, 16  ;;  %v677_v7 = vshrl.u32 %v676_v60, 4 }
  0xfb   : > { %v2014_v32 = vrot.slane %v2012_v21, 6  ;;  %v2017_v33 = vrot.slane %v2015_v17, 7  ;;  %vm1678_vm10 = vcmp.gt.f32.partialorder %v1604_v25, 0.0  ;;  %v1714_v34 = vmul.f32 0.1, %v1604_v25  ;;  %1642 = vmatmul.bf16.gmra.mxu0 %v8315_v12 }
  0xfc   : > { %v699_v9 = vadd.s32 %v697_v61, %v691_v30  ;;  %v701_v10 = vsel %vm700_vm14, 1, %v8656_v22  ;;  %v718_v15 = vmul.u32 58254, %v714_v62  ;;  %v9094_v13 = vmul.u32 14564, %v715_v54 }
  0xfd   : > { %v2018_v47 = vor.u32 %v2017_v33, %v2014_v32  ;;  %v1750_v6 = vsel %vm1678_vm10, %v1604_v25, %v1714_v34  ;;  %v678_v27 = vmul.u32 18, %v677_v7  ;;  %v717_v20 = vmul.u32 14564, %v714_v62 }
  0xfe   : > { %v1858_v50 = vsel %vm9051_vm6, %v1750_v6, 0.0  ;;  %v703_v19 = vadd.s32 %v701_v10, %v699_v9  ;;  %v721_v29 = vshll.u32 %v718_v15, 16  ;;  %v9102_v31 = vadd.s32 128, %v8734_v14 }
  0xff   : > { %v2019_v45 = vsel %vm8908_vm7, %v2010_v37, %v2018_v47  ;;  %v1894_v48 = vpack.c.bf16 %v1858_v50, %v1858_v50  ;;  %v2020_v5 = vrot.slane %v2018_v47, 4  ;;  %v720_v34 = vmul.u32 58254, %v715_v54 }
 0x100   : > { %2332 = vst.msk [vmem:[#allocation2 + $0x2c] sm:$0xf] %vm226_vm9, %v2019_v45  ;;  %v1605_v53 = vpop.f32.mrf.mxu0  ;;  %v704_v33 = vadd.s32 %v703_v19, %v693_v52  ;;  %v723_v35 = vshll.u32 %v9094_v13, 16  ;;  %v679_v40 = vsub.s32 %v9035_v28, %v678_v27  ;;  %v722_v6 = vshrl.u32 %v718_v15, 16 }
 0x101   : > { %v2022_v57 = vshrl.u32 %v1894_v48, 16  ;;  %v2025_v24 = vshll.u32 %v1894_v48, 16  ;;  %v1606_v58 = vadd.f32 %v8832_v2, %v1605_v53  ;;  %vm725_vm3 = vc.u32 %v717_v20, %v721_v29 }
 0x102   : > { %v705_v47 = vadd.s32 %v704_v33, %v695_v55  ;;  %v727_v41 = vadd.s32 %v721_v29, %v717_v20  ;;  %v726_v39 = vsel %vm725_vm3, 1, %v8656_v22  ;;  %v743_v45 = vand.u32 65535, %v9102_v31 }
 0x103   : > { %v2024_v0 = vrot.slane %v2022_v57, 6  ;;  %v2027_v1 = vrot.slane %v2025_v24, 7  ;;  %vm1679_vm15 = vcmp.gt.f32.partialorder %v1606_v58, 0.0  ;;  %v1715_v3 = vmul.f32 0.1, %v1606_v58 }
 0x104   : > { %v706_v30 = vshrl.u32 %v705_v47, 4  ;;  %vm729_vm5 = vc.u32 %v727_v41, %v723_v35  ;;  %v728_v52 = vadd.s32 %v726_v39, %v720_v34  ;;  %v724_v36 = vshrl.u32 %v9094_v13, 16  ;;  %v9145_v39 = vld [vmem:[%s10780_s2] ss:$0 sm:$0xff] }
 0x105   : > { %v2028_v11 = vor.u32 %v2027_v1, %v2024_v0  ;;  %v1751_v12 = vsel %vm1679_vm15, %v1606_v58, %v1715_v3  ;;  %v730_v28 = vsel %vm729_vm5, 1, %v8656_v22  ;;  %v744_v57 = vshrl.u32 %v9102_v31, 16 }
 0x106   : > { %v1859_v16 = vsel %vm9069_vm11, %v1751_v12, 0.0  ;;  %v707_v55 = vmul.u32 18, %v706_v30  ;;  %vm9118_vm6 = vcmp.lt.s32.totalorder %v679_v40, 16  ;;  %v732_v61 = vadd.s32 %v730_v28, %v728_v52 }
 0x107   : > { %v2029_v21 = vsel %vm8908_vm7, %v2020_v5, %v2028_v11  ;;  %v1895_v17 = vpack.c.bf16 %v1859_v16, %v1859_v16  ;;  %v8325_v25 = vld [vmem:[#allocation2 + $0x28] sm:$0xff]  ;;  %v2030_v59 = vrot.slane %v2028_v11, 4  ;;  %v746_v0 = vmul.u32 14564, %v743_v45 }
 0x108   : > { %2333 = vst.msk [vmem:[#allocation2 + $0x30] sm:$0xf] %vm226_vm9, %v2029_v21  ;;  %v1608_v32 = vpop.f32.mrf.mxu0  ;;  %7367 = vmatmul.msk.bf16.gmra.mxu1 %vm2520_vm12, %v8325_v25  ;;  %v708_v54 = vsub.s32 %v9049_v46, %v707_v55  ;;  %v747_v1 = vmul.u32 58254, %v743_v45  ;;  %v748_v3 = vmul.u32 14564, %v744_v57  ;;  %v733_v9 = vadd.s32 %v732_v61, %v722_v6 }
 0x109   : > { %v2032_v37 = vshrl.u32 %v1895_v17, 16  ;;  %v2035_v38 = vshll.u32 %v1895_v17, 16  ;;  %v1609_v23 = vadd.f32 %v8832_v2, %v1608_v32  ;;  %v749_v11 = vmul.u32 58254, %v744_v57 }
 0x10a   : > { %v750_v12 = vshll.u32 %v747_v1, 16  ;;  %v752_v15 = vshll.u32 %v748_v3, 16  ;;  %vm9125_vm8 = vcmp.lt.s32.totalorder %v708_v54, 16  ;;  %v734_v46 = vadd.s32 %v733_v9, %v724_v36 }
 0x10b   : > { %v2034_v42 = vrot.slane %v2032_v37, 6  ;;  %v2037_v50 = vrot.slane %v2035_v38, 7  ;;  %vm1680_vm4 = vcmp.gt.f32.partialorder %v1609_v23, 0.0  ;;  %v1716_v44 = vmul.f32 0.1, %v1609_v23  ;;  %1647 = vmatmul.bf16.gmra.mxu0 %v8316_v26  ;;  %v8317_v37 = vld [vmem:[%s8727_s14 + $0x78] sm:$0xff] }
 0x10c   : > { %v751_v20 = vshrl.u32 %v747_v1, 16  ;;  %vm754_vm10 = vc.u32 %v746_v0, %v750_v12  ;;  %v756_v21 = vadd.s32 %v750_v12, %v746_v0  ;;  %v9131_v26 = vadd.s32 136, %v8734_v14 }
 0x10d   : > { %v2038_v48 = vor.u32 %v2037_v50, %v2034_v42  ;;  %v1752_v51 = vsel %vm1680_vm4, %v1609_v23, %v1716_v44  ;;  %v755_v25 = vsel %vm754_vm10, 1, %v8656_v22  ;;  %v753_v38 = vshrl.u32 %v748_v3, 16 }
 0x10e   : > { %v1860_v53 = vsel %vm9089_vm0, %v1752_v51, 0.0  ;;  %v757_v32 = vadd.s32 %v755_v25, %v749_v11  ;;  %vm758_vm11 = vc.u32 %v756_v21, %v752_v15  ;;  %v772_v41 = vand.u32 65535, %v9131_v26 }
 0x10f   : > { %v2039_v24 = vsel %vm8908_vm7, %v2030_v59, %v2038_v48  ;;  %v1896_v58 = vpack.c.bf16 %v1860_v53, %v1860_v53  ;;  %v2040_v10 = vrot.slane %v2038_v48, 4  ;;  %v735_v59 = vshrl.u32 %v734_v46, 4  ;;  %v8363_v53 = vld [vmem:[%s10781_s3 + $0x38] sm:$0xff] }
 0x110   : > { %2334 = vst.msk [vmem:[#allocation2 + $0x34] sm:$0xf] %vm226_vm9, %v2039_v24  ;;  %v1610_v62 = vpop.f32.mrf.mxu0  ;;  %v759_v23 = vsel %vm758_vm11, 1, %v8656_v22  ;;  %v773_v42 = vshrl.u32 %v9131_v26, 16  ;;  %v775_v52 = vmul.u32 14564, %v772_v41  ;;  %v9150_v28 = vmul.u32 58254, %v772_v41  ;;  %3080 = vmatpush.bf16.msrb.mxu0 %v8363_v53  ;;  %8629 = vmatpush.bf16.msra.mxu2 %v8363_v53 }
 0x111   : > { %v2042_v4 = vshrl.u32 %v1896_v58, 16  ;;  %v2045_v5 = vshll.u32 %v1896_v58, 16  ;;  %v1611_v7 = vadd.f32 %v8832_v2, %v1610_v62  ;;  %v736_v47 = vmul.u32 18, %v735_v59 }
 0x112   : > { %v761_v6 = vadd.s32 %v759_v23, %v757_v32  ;;  %v9159_v60 = vmul.u32 14564, %v773_v42  ;;  %v778_v54 = vmul.u32 58254, %v773_v42  ;;  %v779_v0 = vshll.u32 %v9150_v28, 16 }
 0x113   : > { %v2044_v13 = vrot.slane %v2042_v4, 6  ;;  %v2047_v16 = vrot.slane %v2045_v5, 7  ;;  %vm1681_vm1 = vcmp.gt.f32.partialorder %v1611_v7, 0.0  ;;  %v1717_v27 = vmul.f32 0.1, %v1611_v7 }
 0x114   : > { %v737_v48 = vsub.s32 %v9083_v56, %v736_v47  ;;  %v762_v51 = vadd.s32 %v761_v6, %v751_v20  ;;  %v9162_v56 = vadd.s32 144, %v8734_v14  ;;  %v780_v4 = vshrl.u32 %v9150_v28, 16  ;;  %v8360_v28 = vld [vmem:[%s10781_s3 + $0x20] sm:$0xff] }
 0x115   : > { %v2048_v17 = vor.u32 %v2047_v16, %v2044_v13  ;;  %v1753_v2 = vsel %vm1681_vm1, %v1611_v7, %v1717_v27  ;;  %v781_v5 = vshll.u32 %v9159_v60, 16  ;;  %v8362_v7 = vld [vmem:[%s10781_s3 + $0x30] sm:$0xff]  ;;  %v782_v11 = vshrl.u32 %v9159_v60, 16 }
 0x116   : > { %v1861_v29 = vsel %vm9118_vm6, %v1753_v2, 0.0  ;;  %vm9155_vm14 = vcmp.lt.s32.totalorder %v737_v48, 16  ;;  %v763_v58 = vadd.s32 %v762_v51, %v753_v38  ;;  %vm783_vm15 = vc.u32 %v775_v52, %v779_v0  ;;  %3081 = vmatpush.bf16.msrb.mxu0 %v8362_v7  ;;  %8630 = vmatpush.bf16.msra.mxu2 %v8362_v7  ;;  %v8318_v48 = vld [vmem:[%s8727_s14 + $0x80] sm:$0xff] }
 0x117   : > { %v2049_v33 = vsel %vm8908_vm7, %v2040_v10, %v2048_v17  ;;  %v1897_v34 = vpack.c.bf16 %v1861_v29, %v1861_v29  ;;  %v8326_v35 = vld [vmem:[#allocation2 + $0x30] sm:$0xff]  ;;  %v2050_v50 = vrot.slane %v2048_v17, 4  ;;  %v784_v13 = vsel %vm783_vm15, 1, %v8656_v22  ;;  %v8361_v29 = vld [vmem:[%s10781_s3 + $0x28] sm:$0xff] }
 0x118   : > { %2335 = vst.msk [vmem:[#allocation2 + $0x38] sm:$0xf] %vm226_vm9, %v2049_v33  ;;  %v1613_v40 = vpop.f32.mrf.mxu0  ;;  %7368 = vmatmul.msk.bf16.gmra.mxu1 %vm2520_vm12, %v8326_v35  ;;  %v764_v3 = vshrl.u32 %v763_v58, 4  ;;  %v785_v16 = vadd.s32 %v779_v0, %v775_v52  ;;  %v801_v27 = vand.u32 65535, %v9162_v56  ;;  %v786_v21 = vadd.s32 %v784_v13, %v778_v54 }
 0x119   : > { %v2052_v44 = vshrl.u32 %v1897_v34, 16  ;;  %v2055_v30 = vshll.u32 %v1897_v34, 16  ;;  %v1614_v45 = vadd.f32 %v9145_v39, %v1613_v40  ;;  %v802_v25 = vshrl.u32 %v9162_v56, 16 }
 0x11a   : > { %v765_v15 = vmul.u32 18, %v764_v3  ;;  %vm787_vm0 = vc.u32 %v785_v16, %v781_v5  ;;  %v804_v35 = vmul.u32 14564, %v801_v27  ;;  %3082 = vmatpush.bf16.msrb.mxu0 %v8361_v29  ;;  %8631 = vmatpush.bf16.msra.mxu2 %v8361_v29 }
 0x11b   : > { %v2054_v55 = vrot.slane %v2052_v44, 6  ;;  %v2057_v36 = vrot.slane %v2055_v30, 7  ;;  %vm1682_vm13 = vcmp.gt.f32.partialorder %v1614_v45, 0.0  ;;  %v1718_v57 = vmul.f32 0.1, %v1614_v45  ;;  %1652 = vmatmul.bf16.gmra.mxu0 %v8317_v37 }
 0x11c   : > { %v766_v2 = vsub.s32 %v9102_v31, %v765_v15  ;;  %v788_v34 = vsel %vm787_vm0, 1, %v8656_v22  ;;  %v805_v37 = vmul.u32 58254, %v801_v27  ;;  %v9185_v38 = vmul.u32 14564, %v802_v25 }
 0x11d   : > { %v2058_v61 = vor.u32 %v2057_v36, %v2054_v55  ;;  %v1754_v62 = vsel %vm1682_vm13, %v1614_v45, %v1718_v57  ;;  %v790_v47 = vadd.s32 %v788_v34, %v786_v21  ;;  %v807_v41 = vmul.u32 58254, %v802_v25 }
 0x11e   : > { %v1862_v1 = vsel %vm9125_vm8, %v1754_v62, 0.0  ;;  %vm9187_vm4 = vcmp.lt.s32.totalorder %v766_v2, 16  ;;  %v808_v42 = vshll.u32 %v805_v37, 16  ;;  %v809_v52 = vshrl.u32 %v805_v37, 16  ;;  %3083 = vmatpush.bf16.msrb.mxu0 %v8360_v28  ;;  %8632 = vmatpush.bf16.msra.mxu2 %v8360_v28 }
 0x11f   : > { %v2059_v9 = vsel %vm8908_vm7, %v2050_v50, %v2058_v61  ;;  %v1898_v10 = vpack.c.bf16 %v1862_v1, %v1862_v1  ;;  %v2060_v17 = vrot.slane %v2058_v61, 4  ;;  %v810_v50 = vshll.u32 %v9185_v38, 16 }
 0x120   : > { %2336 = vst.msk [vmem:[#allocation2 + $0x3c] sm:$0xf] %vm226_vm9, %v2059_v9  ;;  %v1615_v12 = vpop.f32.mrf.mxu0  ;;  %v791_v51 = vadd.s32 %v790_v47, %v780_v4  ;;  %vm812_vm5 = vc.u32 %v804_v35, %v808_v42  ;;  %v814_v36 = vadd.s32 %v808_v42, %v804_v35  ;;  %v9202_v57 = vadd.s32 152, %v8734_v14 }
 0x121   : > { %v2062_v19 = vshrl.u32 %v1898_v10, 16  ;;  %v2065_v46 = vshll.u32 %v1898_v10, 16  ;;  %v1616_v20 = vadd.f32 %v9145_v39, %v1615_v12  ;;  %v813_v62 = vsel %vm812_vm5, 1, %v8656_v22 }
 0x122   : > { %v792_v61 = vadd.s32 %v791_v51, %v782_v11  ;;  %vm816_vm6 = vc.u32 %v814_v36, %v810_v50  ;;  %v830_v54 = vand.u32 65535, %v9202_v57  ;;  %v831_v0 = vshrl.u32 %v9202_v57, 16 }
 0x123   : > { %v2064_v59 = vrot.slane %v2062_v19, 6  ;;  %v2067_v32 = vrot.slane %v2065_v46, 7  ;;  %vm1683_vm3 = vcmp.gt.f32.partialorder %v1616_v20, 0.0  ;;  %v1719_v33 = vmul.f32 0.1, %v1616_v20 }
 0x124   : > { %v793_v5 = vshrl.u32 %v792_v61, 4  ;;  %v811_v7 = vshrl.u32 %v9185_v38, 16  ;;  %v815_v9 = vadd.s32 %v813_v62, %v807_v41  ;;  %v817_v10 = vsel %vm816_vm6, 1, %v8656_v22 }
 0x125   : > { %v2068_v31 = vor.u32 %v2067_v32, %v2064_v59  ;;  %v1755_v23 = vsel %vm1683_vm3, %v1616_v20, %v1719_v33  ;;  %v834_v15 = vmul.u32 58254, %v830_v54  ;;  %v9211_v13 = vmul.u32 14564, %v831_v0 }
 0x126   : > { %v1863_v6 = vsel %vm9155_vm14, %v1755_v23, 0.0  ;;  %v794_v27 = vmul.u32 18, %v793_v5  ;;  %v819_v19 = vadd.s32 %v817_v10, %v815_v9  ;;  %v833_v46 = vmul.u32 14564, %v830_v54  ;;  %v9225_v23 = vpop.f32.mrf.mxu1 }
 0x127   : > { %v2069_v44 = vsel %vm8908_vm7, %v2060_v17, %v2068_v31  ;;  %v1899_v30 = vpack.c.bf16 %v1863_v6, %v1863_v6  ;;  %v8327_v45 = vld [vmem:[#allocation2 + $0x38] sm:$0xff]  ;;  %v2070_v53 = vrot.slane %v2068_v31, 4  ;;  %v836_v17 = vmul.u32 58254, %v831_v0 }
 0x128   : > { %2337 = vst.msk [vmem:[#allocation2 + $0x40] sm:$0xf] %vm226_vm9, %v2069_v44  ;;  %v1618_v55 = vpop.f32.mrf.mxu0  ;;  %7369 = vmatmul.msk.bf16.gmra.mxu1 %vm2520_vm12, %v8327_v45  ;;  %v837_v2 = vshll.u32 %v834_v15, 16  ;;  %v795_v29 = vsub.s32 %v9131_v26, %v794_v27  ;;  %v820_v32 = vadd.s32 %v819_v19, %v809_v52  ;;  %v839_v33 = vshll.u32 %v9211_v13, 16 }
 0x129   : > { %v2072_v24 = vshrl.u32 %v1899_v30, 16  ;;  %v2075_v58 = vshll.u32 %v1899_v30, 16  ;;  %v1619_v60 = vadd.f32 %v9145_v39, %v1618_v55  ;;  %v838_v38 = vshrl.u32 %v834_v15, 16 }
 0x12a   : > { %vm9221_vm8 = vcmp.lt.s32.totalorder %v795_v29, 16  ;;  %v821_v40 = vadd.s32 %v820_v32, %v811_v7  ;;  %vm841_vm10 = vc.u32 %v833_v46, %v837_v2  ;;  %v843_v47 = vadd.s32 %v837_v2, %v833_v46 }
 0x12b   : > { %v2074_v1 = vrot.slane %v2072_v24, 6  ;;  %v2077_v3 = vrot.slane %v2075_v58, 7  ;;  %vm1684_vm1 = vcmp.gt.f32.partialorder %v1619_v60, 0.0  ;;  %v1720_v4 = vmul.f32 0.1, %v1619_v60  ;;  %1657 = vmatmul.bf16.gmra.mxu0 %v8318_v48 }
 0x12c   : > { %v822_v42 = vshrl.u32 %v821_v40, 4  ;;  %v842_v50 = vsel %vm841_vm10, 1, %v8656_v22  ;;  %vm845_vm13 = vc.u32 %v843_v47, %v839_v33  ;;  %v9229_v44 = vadd.s32 160, %v8734_v14 }
 0x12d   : > { %v2078_v11 = vor.u32 %v2077_v3, %v2074_v1  ;;  %v1756_v12 = vsel %vm1684_vm1, %v1619_v60, %v1720_v4  ;;  %v844_v48 = vadd.s32 %v842_v50, %v836_v17  ;;  %v846_v51 = vsel %vm845_vm13, 1, %v8656_v22  ;;  %v8319_v60 = vld [vmem:[%s8727_s14 + $0x88] sm:$0xff] }
 0x12e   : > { %v1864_v16 = vsel %vm9187_vm4, %v1756_v12, 0.0  ;;  %v823_v28 = vmul.u32 18, %v822_v42  ;;  %v860_v55 = vshrl.u32 %v9229_v44, 16  ;;  %v840_v61 = vshrl.u32 %v9211_v13, 16  ;;  %v9261_v17 = vpop.f32.mrf.mxu1 }
 0x12f   : > { %v2079_v20 = vsel %vm8908_vm7, %v2070_v53, %v2078_v11  ;;  %v1900_v21 = vpack.c.bf16 %v1864_v16, %v1864_v16  ;;  %v2080_v25 = vrot.slane %v2078_v11, 4  ;;  %v859_v53 = vand.u32 65535, %v9229_v44  ;;  %v8407_v11 = vld [vmem:[%s10781_s3 + $0x78] sm:$0xff] }
 0x130   : > { %2338 = vst.msk [vmem:[#allocation2 + $0x44] sm:$0xf] %vm226_vm9, %v2079_v20  ;;  %v1620_v59 = vpop.f32.mrf.mxu0  ;;  %v848_v62 = vadd.s32 %v846_v51, %v844_v48  ;;  %v824_v54 = vsub.s32 %v9162_v56, %v823_v28  ;;  %v9242_v4 = vmul.u32 14564, %v860_v55  ;;  %v865_v56 = vmul.u32 58254, %v860_v55  ;;  %v8429_v16 = vld [vmem:[%s10781_s3 + $0x98] sm:$0xff]  ;;  %4003 = vmatpush.bf16.msrb.mxu1 %v8407_v11  ;;  %v8406_v20 = vld [vmem:[%s10781_s3 + $0x70] sm:$0xff] }
 0x131   : > { %v2082_v34 = vshrl.u32 %v1900_v21, 16  ;;  %v2085_v35 = vshll.u32 %v1900_v21, 16  ;;  %v1621_v37 = vadd.f32 %v9145_v39, %v1620_v59  ;;  %v862_v1 = vmul.u32 14564, %v859_v53  ;;  %4598 = vmatpush.bf16.msrb.mxu2 %v8429_v16 }
 0x132   : > { %v863_v3 = vmul.u32 58254, %v859_v53  ;;  %v849_v10 = vadd.s32 %v848_v62, %v838_v38  ;;  %vm9249_vm14 = vcmp.lt.s32.totalorder %v824_v54, 16  ;;  %v2855_v13 = vrot.slane %v2853_v8, 1  ;;  %v8386_v54 = vld [vmem:[#allocation2 + $0x8] sm:$0xf0] }
 0x133   : > { %v2084_v6 = vrot.slane %v2082_v34, 6  ;;  %v2087_v26 = vrot.slane %v2085_v35, 7  ;;  %vm1685_vm11 = vcmp.gt.f32.partialorder %v1621_v37, 0.0  ;;  %v1721_v41 = vmul.f32 0.1, %v1621_v37 }
 0x134   : > { %v866_v15 = vshll.u32 %v863_v3, 16  ;;  %vm2849_vm0 = vsmask.f32 7424  ;;  %v850_v2 = vadd.s32 %v849_v10, %v840_v61  ;;  %v868_v8 = vshll.u32 %v9242_v4, 16  ;;  %4004 = vmatpush.bf16.msrb.mxu1 %v8406_v20  ;;  %v7618_v10 = vld [vmem:[#allocation2 + $0x8] sm:$0xe] }
 0x135   : > { %v2088_v30 = vor.u32 %v2087_v26, %v2084_v6  ;;  %v1757_v45 = vsel %vm1685_vm11, %v1621_v37, %v1721_v41  ;;  %v867_v38 = vshrl.u32 %v863_v3, 16  ;;  %v869_v6 = vshrl.u32 %v9242_v4, 16 }
 0x136   : > { %v1865_v52 = vsel %vm9221_vm8, %v1757_v45, 0.0  ;;  %vm870_vm3 = vc.u32 %v862_v1, %v866_v15  ;;  %v872_v34 = vadd.s32 %v866_v15, %v862_v1  ;;  %v851_v37 = vshrl.u32 %v850_v2, 4 }
 0x137   : > { %v2089_v36 = vsel %vm8908_vm7, %v2080_v25, %v2088_v30  ;;  %v1901_v24 = vpack.c.bf16 %v1865_v52, %v1865_v52  ;;  %v8328_v58 = vld [vmem:[#allocation2 + $0x40] sm:$0xff]  ;;  %v2090_v21 = vrot.slane %v2088_v30, 4  ;;  %v9264_v25 = vld [vmem:[#allocation2 + $0x8] sm:$0xff]  ;;  %v871_v33 = vsel %vm870_vm3, 1, %v8656_v22 }
 0x138   : > { %2339 = vst.msk [vmem:[#allocation2 + $0x48] sm:$0xf] %vm226_vm9, %v2089_v36  ;;  %v1623_v0 = vpop.f32.mrf.mxu0  ;;  %7370 = vmatmul.msk.bf16.gmra.mxu1 %vm2520_vm12, %v8328_v58  ;;  %v8350_v29 = vld [vmem:[#allocation2 + $0x40] sm:$0xff]  ;;  %v873_v31 = vadd.s32 %v871_v33, %v865_v56  ;;  %vm874_vm4 = vc.u32 %v872_v34, %v868_v8  ;;  %v852_v26 = vmul.u32 18, %v851_v37  ;;  %v2858_v50 = vshll.u32 %v9264_v25, 16 }
 0x139   : > { %v2092_v5 = vshrl.u32 %v1901_v24, 16  ;;  %v2095_v7 = vshll.u32 %v1901_v24, 16  ;;  %v1624_v9 = vadd.f32 %v9145_v39, %v1623_v0  ;;  %v875_v42 = vsel %vm874_vm4, 1, %v8656_v22  ;;  %v9283_v0 = vld [vmem:[#allocation2 + $0x10] sm:$0xff] }
 0x13a   : > { %v2914_v30 = vshll.u32 %v8350_v29, 16  ;;  %v877_v52 = vadd.s32 %v875_v42, %v873_v31  ;;  %v853_v28 = vsub.s32 %v9202_v57, %v852_v26  ;;  %v2856_v53 = vor.u32 %v2855_v13, %v2851_v63 }
 0x13b   : > { %v2094_v27 = vrot.slane %v2092_v5, 6  ;;  %v2097_v19 = vrot.slane %v2095_v7, 7  ;;  %vm1686_vm15 = vcmp.gt.f32.partialorder %v1624_v9, 0.0  ;;  %v1722_v46 = vmul.f32 0.1, %v1624_v9  ;;  %1662 = vmatmul.bf16.gmra.mxu0 %v8319_v60 }
 0x13c   : > { %v9279_v55 = vrot.slane %v2858_v50, 1  ;;  %v9281_v36 = vrot.slane %v2914_v30, 1  ;;  %vm1339_vm6 = vcmp.lt.s32.totalorder %v853_v28, 16  ;;  %v878_v61 = vadd.s32 %v877_v52, %v867_v38  ;;  %v8404_v30 = vld [vmem:[%s10781_s3 + $0x60] sm:$0xff] }
 0x13d   : > { %v2098_v59 = vor.u32 %v2097_v19, %v2094_v27  ;;  %v1758_v32 = vsel %vm1686_vm15, %v1624_v9, %v1722_v46  ;;  %v2918_v62 = vshrl.u32 %v8350_v29, 16  ;;  %v888_v13 = vand.u32 65535, %v9286_v49 }
 0x13e   : > { %v1866_v35 = vsel %vm9249_vm14, %v1758_v32, 0.0  ;;  %v879_v5 = vadd.s32 %v878_v61, %v869_v6  ;;  %v2861_v7 = vsel %vm2849_vm0, %v2856_v53, %v9279_v55  ;;  %v7619_v16 = vor.u32 %v8386_v54, %v7618_v10 }
 0x13f   : > { %v2099_v40 = vsel %vm8908_vm7, %v2090_v21, %v2098_v59  ;;  %v1902_v47 = vpack.c.bf16 %v1866_v35, %v1866_v35  ;;  %v2100_v1 = vrot.slane %v2098_v59, 4  ;;  %v2920_v9 = vor.u32 %v2918_v62, %v9281_v36 }
 0x140   : > { %2340 = vst.msk [vmem:[#allocation2 + $0x4c] sm:$0xf] %vm226_vm9, %v2099_v40  ;;  %v1625_v41 = vpop.f32.mrf.mxu0  ;;  %v880_v19 = vshrl.u32 %v879_v5, 4  ;;  %v889_v20 = vshrl.u32 %v9286_v49, 16  ;;  %v3885_v21 = vrot.slane %v9283_v0, 1  ;;  %v891_v33 = vmul.u32 14564, %v888_v13 }
 0x141   : > { %v2102_v45 = vshrl.u32 %v1902_v47, 16  ;;  %v2105_v48 = vshll.u32 %v1902_v47, 16  ;;  %v1626_v51 = vadd.f32 %v9145_v39, %v1625_v41  ;;  %v892_v34 = vmul.u32 58254, %v888_v13  ;;  %v8405_v40 = vld [vmem:[%s10781_s3 + $0x68] sm:$0xff] }
 0x142   : > { %v881_v32 = vmul.u32 18, %v880_v19  ;;  %v9304_v35 = vmul.u32 14564, %v889_v20  ;;  %vm3422_vm8 = vcmask 1046528   ;;  %v894_v26 = vmul.u32 58254, %v889_v20  ;;  %4005 = vmatpush.bf16.msrb.mxu1 %v8405_v40 }
 0x143   : > { %v2104_v24 = vrot.slane %v2102_v45, 6  ;;  %v2107_v58 = vrot.slane %v2105_v48, 7  ;;  %vm1687_vm5 = vcmp.gt.f32.partialorder %v1626_v51, 0.0  ;;  %v1723_v60 = vmul.f32 0.1, %v1626_v51  ;;  %v9316_v48 = vld [vmem:[#allocation2 + $0x10] sm:$0xff] }
 0x144   : > { %v882_v47 = vsub.s32 %v9229_v44, %v881_v32  ;;  %v895_v41 = vshll.u32 %v892_v34, 16  ;;  %v3884_v45 = vrot.slane %v7619_v16, 1  ;;  %v897_v28 = vshll.u32 %v9304_v35, 16 }
 0x145   : > { %v2108_v3 = vor.u32 %v2107_v58, %v2104_v24  ;;  %v1759_v57 = vsel %vm1687_vm5, %v1626_v51, %v1723_v60  ;;  %v9288_v4 = vpop.f32.mrf.mxu1  ;;  %v2862_v51 = vshrl.u32 %v9264_v25, 16  ;;  %v896_v58 = vshrl.u32 %v892_v34, 16 }
 0x146   : > { %v1867_v63 = vsel %vm1339_vm6, %v1759_v57, 0.0  ;;  %vm1340_vm10 = vcmp.lt.s32.totalorder %v882_v47, 16  ;;  %vm899_vm11 = vc.u32 %v891_v33, %v895_v41  ;;  %v901_v61 = vadd.s32 %v895_v41, %v891_v33  ;;  %4006 = vmatpush.bf16.msrb.mxu1 %v8404_v30 }
 0x147   : > { %v2109_v11 = vsel %vm8908_vm7, %v2100_v1, %v2108_v3  ;;  %v1903_v12 = vpack.c.bf16 %v1867_v63, %v1867_v63  ;;  %v8329_v56 = vld [vmem:[#allocation2 + $0x48] sm:$0xff]  ;;  %v2110_v27 = vrot.slane %v2108_v3, 4  ;;  %v900_v60 = vsel %vm899_vm11, 1, %v8656_v22 }
 0x148   : > { %v9295_v15 = vld [vmem:[#allocation2 + $0x48] sm:$0xff]  ;;  %2341 = vst.msk [vmem:[#allocation2 + $0x50] sm:$0xf] %vm226_vm9, %v2109_v11  ;;  %v1628_v46 = vpop.f32.mrf.mxu0  ;;  %7371 = vmatmul.msk.bf16.gmra.mxu1 %vm2520_vm12, %v8329_v56  ;;  %v902_v62 = vadd.s32 %v900_v60, %v894_v26  ;;  %v9330_v1 = vadd.s32 176, %v8734_v14  ;;  %v898_v57 = vshrl.u32 %v9304_v35, 16  ;;  %v2866_v5 = vshll.u32 %v9316_v48, 16 }
 0x149   : > { %v2112_v2 = vshrl.u32 %v1903_v12, 16  ;;  %v2115_v8 = vshll.u32 %v1903_v12, 16  ;;  %v1629_v29 = vadd.f32 %v9145_v39, %v1628_v46  ;;  %v2922_v59 = vshll.u32 %v9295_v15, 16 }
 0x14a   : > { %vm903_vm13 = vc.u32 %v901_v61, %v897_v28  ;;  %v917_v10 = vand.u32 65535, %v9330_v1  ;;  %v918_v56 = vshrl.u32 %v9330_v1, 16  ;;  %v3886_v19 = vsel %vm3422_vm8, %v3884_v45, %v3885_v21 }
 0x14b   : > { %v2114_v37 = vrot.slane %v2112_v2, 6  ;;  %v2117_v38 = vrot.slane %v2115_v8, 7  ;;  %vm1688_vm1 = vcmp.gt.f32.partialorder %v1629_v29, 0.0  ;;  %v1724_v31 = vmul.f32 0.1, %v1629_v29  ;;  %7476 = vmatmul.msk.bf16.vlgmr.msrb.gmra.mxu0 %vm2520_vm12, %v2861_v7 }
 0x14c   : > { %v9311_v6 = vrot.slane %v2922_v59, 1  ;;  %v904_v11 = vsel %vm903_vm13, 1, %v8656_v22  ;;  %v920_v46 = vmul.u32 14564, %v917_v10  ;;  %v921_v20 = vmul.u32 58254, %v917_v10 }
 0x14d   : > { %v2118_v42 = vor.u32 %v2117_v38, %v2114_v37  ;;  %v1760_v50 = vsel %vm1688_vm1, %v1629_v29, %v1724_v31  ;;  %v9319_v52 = vpop.f32.mrf.mxu1  ;;  %v922_v2 = vmul.u32 14564, %v918_v56  ;;  %v2864_v8 = vor.u32 %v2862_v51, %v9279_v55 }
 0x14e   : > { %v2925_v44 = vsel %vm2849_vm0, %v2920_v9, %v9311_v6  ;;  %v1868_v24 = vsel %vm1340_vm10, %v1760_v50, 0.0  ;;  %v9344_v33 = vrot.slane %v2866_v5, 1  ;;  %v923_v35 = vmul.u32 58254, %v918_v56 }
 0x14f   : > { %v2119_v53 = vsel %vm8908_vm7, %v2110_v27, %v2118_v42  ;;  %7484 = vmatmul.msk.bf16.vlgmr.msra.gmra.mxu2 %vm2520_vm12, %v2925_v44  ;;  %v1904_v25 = vpack.c.bf16 %v1868_v24, %v1868_v24  ;;  %v2120_v3 = vrot.slane %v2118_v42, 4  ;;  %v906_v27 = vadd.s32 %v904_v11, %v902_v62 }
 0x150   : > { %2342 = vst.msk [vmem:[#allocation2 + $0x54] sm:$0xf] %vm226_vm9, %v2119_v53  ;;  %v1630_v54 = vpop.f32.mrf.mxu0  ;;  %v924_v37 = vshll.u32 %v921_v20, 16  ;;  %v926_v38 = vshll.u32 %v922_v2, 16  ;;  %v2926_v47 = vshrl.u32 %v9295_v15, 16  ;;  %v925_v41 = vshrl.u32 %v921_v20, 16 }
 0x151   : > { %v1631_v63 = vadd.f32 %v9145_v39, %v1630_v54  ;;  %v2122_v7 = vshrl.u32 %v1904_v25, 16  ;;  %v2125_v9 = vshll.u32 %v1904_v25, 16  ;;  %v907_v59 = vadd.s32 %v906_v27, %v896_v58  ;;  %v9360_v15 = vld [vmem:[#allocation2 + $0x18] sm:$0xff] }
 0x152   : > { %v2869_v50 = vsel %vm2849_vm0, %v2864_v8, %v9344_v33  ;;  %vm928_vm15 = vc.u32 %v920_v46, %v924_v37  ;;  %v930_v30 = vadd.s32 %v924_v37, %v920_v46  ;;  %v2928_v28 = vor.u32 %v2926_v47, %v9311_v6 }
 0x153   : > { %vm1689_vm14 = vcmp.gt.f32.partialorder %v1631_v63, 0.0  ;;  %v1725_v12 = vmul.f32 0.1, %v1631_v63  ;;  %v2124_v13 = vrot.slane %v2122_v7, 6  ;;  %v2127_v16 = vrot.slane %v2125_v9, 7 }
 0x154   : > { %v908_v26 = vadd.s32 %v907_v59, %v898_v57  ;;  %v929_v44 = vsel %vm928_vm15, 1, %v8656_v22  ;;  %vm932_vm3 = vc.u32 %v930_v30, %v926_v38  ;;  %v9370_v62 = vadd.s32 184, %v8734_v14 }
 0x155   : > { %v9342_v29 = vor.u32 %v2127_v16, %v2124_v13  ;;  %v1761_v32 = vsel %vm1689_vm14, %v1631_v63, %v1725_v12  ;;  %v9346_v34 = vpop.f32.mrf.mxu1  ;;  %v931_v24 = vadd.s32 %v929_v44, %v923_v35  ;;  %v933_v25 = vsel %vm932_vm3, 1, %v8656_v22 }
 0x156   : > { %v909_v51 = vshrl.u32 %v908_v26, 4  ;;  %v3887_v57 = vrot.slane %v9360_v15, 1  ;;  %v946_v7 = vand.u32 65535, %v9370_v62  ;;  %v947_v9 = vshrl.u32 %v9370_v62, 16 }
 0x157   : > { %v8330_v31 = vld [vmem:[#allocation2 + $0x50] sm:$0xff]  ;;  %v2129_v55 = vsel %vm8908_vm7, %v2120_v3, %v9342_v29  ;;  %v2130_v54 = vrot.slane %v9342_v29, 4  ;;  %v927_v3 = vshrl.u32 %v922_v2, 16  ;;  %v935_v6 = vadd.s32 %v933_v25, %v931_v24 }
 0x158   : > { %v9348_v40 = vld [vmem:[#allocation2 + $0x50] sm:$0xff]  ;;  %v1633_v42 = vpop.f32.mrf.mxu0  ;;  %2343 = vst.msk [vmem:[#allocation2 + $0x58] sm:$0xf] %vm226_vm9, %v2129_v55  ;;  %7372 = vmatmul.msk.bf16.vlgmr.msra.gmra.mxu3 %vm2520_vm12, %v8330_v31  ;;  %7704 = vmatmul.msk.bf16.vlgmr.msrb.gmra.mxu1 %vm2520_vm12, %v3886_v19  ;;  %v910_v60 = vmul.u32 18, %v909_v51  ;;  %v9382_v12 = vadd.s32 192, %v8734_v14  ;;  %v2870_v56 = vshrl.u32 %v9316_v48, 16  ;;  %v3888_v8 = vsel %vm3422_vm8, %v3885_v21, %v3887_v57 }
 0x159   : > { %v1634_v45 = vadd.f32 %v9145_v39, %v1633_v42  ;;  %v2930_v53 = vshll.u32 %v9348_v40, 16  ;;  %v936_v10 = vadd.s32 %v935_v6, %v925_v41  ;;  %v949_v13 = vmul.u32 14564, %v946_v7 }
 0x15a   : > { %v911_v63 = vsub.s32 %v9286_v49, %v910_v60  ;;  %v950_v49 = vmul.u32 58254, %v946_v7  ;;  %v951_v16 = vmul.u32 14564, %v947_v9  ;;  %v952_v59 = vmul.u32 58254, %v947_v9 }
 0x15b   : > { %vm1690_vm4 = vcmp.gt.f32.partialorder %v1634_v45, 0.0  ;;  %v1726_v58 = vmul.f32 0.1, %v1634_v45  ;;  %7477 = vmatmul.msk.bf16.gmra.mxu0 %vm2520_vm12, %v2869_v50  ;;  %v9367_v61 = vrot.slane %v2930_v53, 1  ;;  %v937_v46 = vadd.s32 %v936_v10, %v927_v3  ;;  %v8385_v3 = vld [vmem:[%s10781_s3 + $0x58] sm:$0xff] }
 0x15c   : > { %vm1341_vm5 = vcmp.lt.s32.totalorder %v911_v63, 16  ;;  %v953_v48 = vshll.u32 %v950_v49, 16  ;;  %v955_v35 = vshll.u32 %v951_v16, 16  ;;  %v954_v38 = vshrl.u32 %v950_v49, 16  ;;  %3542 = vmatpush.bf16.msrb.mxu3 %v8385_v3 }
 0x15d   : > { %v2933_v5 = vsel %vm2849_vm0, %v2928_v28, %v9367_v61  ;;  %v1762_v11 = vsel %vm1690_vm4, %v1634_v45, %v1726_v58  ;;  %v1869_v19 = vsel %vm1341_vm5, %v1761_v32, 0.0  ;;  %v9385_v20 = vpop.f32.mrf.mxu1  ;;  %v938_v37 = vshrl.u32 %v937_v46, 4  ;;  %v9396_v45 = vld [vmem:[#allocation2 + $0x18] sm:$0xff] }
 0x15e   : > { %v1905_v29 = vpack.c.bf16 %v1869_v19, %v1869_v19  ;;  %v2872_v32 = vor.u32 %v2870_v56, %v9344_v33  ;;  %vm957_vm6 = vc.u32 %v949_v13, %v953_v48  ;;  %v959_v26 = vadd.s32 %v953_v48, %v949_v13 }
 0x15f   : > { %7485 = vmatmul.msk.bf16.gmra.mxu2 %vm2520_vm12, %v2933_v5  ;;  %v939_v41 = vmul.u32 18, %v938_v37  ;;  %v958_v42 = vsel %vm957_vm6, 1, %v8656_v22  ;;  %v975_v0 = vand.u32 65535, %v9382_v12  ;;  %v956_v44 = vshrl.u32 %v951_v16, 16 }
 0x160   : > { %v1635_v27 = vpop.f32.mrf.mxu0  ;;  %v2132_v47 = vshrl.u32 %v1905_v29, 16  ;;  %v2135_v55 = vshll.u32 %v1905_v29, 16  ;;  %v960_v30 = vadd.s32 %v958_v42, %v952_v59  ;;  %vm961_vm10 = vc.u32 %v959_v26, %v955_v35 }
 0x161   : > { %v1636_v2 = vadd.f32 %v9145_v39, %v1635_v27  ;;  %v940_v51 = vsub.s32 %v9330_v1, %v939_v41  ;;  %v962_v33 = vsel %vm961_vm10, 1, %v8656_v22  ;;  %v976_v28 = vshrl.u32 %v9382_v12, 16 }
 0x162   : > { %v2134_v21 = vrot.slane %v2132_v47, 6  ;;  %v2137_v50 = vrot.slane %v2135_v55, 7  ;;  %v964_v24 = vadd.s32 %v962_v33, %v960_v30  ;;  %v979_v60 = vmul.u32 58254, %v975_v0  ;;  %v9417_v47 = vld [vmem:[#allocation2 + $0x20] sm:$0xff] }
 0x163   : > { %v1727_v31 = vmul.f32 0.1, %v1636_v2  ;;  %vm1691_vm1 = vcmp.gt.f32.partialorder %v1636_v2, 0.0  ;;  %vm1342_vm11 = vcmp.lt.s32.totalorder %v940_v51, 16  ;;  %v978_v6 = vmul.u32 14564, %v975_v0 }
 0x164   : > { %v2138_v53 = vor.u32 %v2137_v50, %v2134_v21  ;;  %v980_v63 = vmul.u32 14564, %v976_v28  ;;  %v1870_v7 = vsel %vm1342_vm11, %v1762_v11, 0.0  ;;  %v965_v9 = vadd.s32 %v964_v24, %v954_v38 }
 0x165   : > { %v9401_v58 = vsel %vm1691_vm1, %v1636_v2, %v1727_v31  ;;  %v2874_v10 = vshll.u32 %v9396_v45, 16  ;;  %v1906_v56 = vpack.c.bf16 %v1870_v7, %v1870_v7  ;;  %v9412_v13 = vpop.f32.mrf.mxu1  ;;  %v981_v49 = vmul.u32 58254, %v976_v28 }
 0x166   : > { %v2139_v5 = vsel %vm8908_vm7, %v2130_v54, %v2138_v53  ;;  %v982_v16 = vshll.u32 %v979_v60, 16  ;;  %v984_v27 = vshll.u32 %v980_v63, 16  ;;  %v2140_v19 = vrot.slane %v2138_v53, 4 }
 0x167   : > { %2344 = vst.msk [vmem:[#allocation2 + $0x5c] sm:$0xf] %vm226_vm9, %v2139_v5  ;;  %v966_v46 = vadd.s32 %v965_v9, %v956_v44  ;;  %v983_v2 = vshrl.u32 %v979_v60, 16  ;;  %v2145_v29 = vshll.u32 %v1906_v56, 16  ;;  %v9415_v35 = vrot.slane %v2874_v10, 1  ;;  %v8428_v10 = vld [vmem:[%s10781_s3 + $0x90] sm:$0xff] }
 0x168   : > { %v1638_v25 = vpop.f32.mrf.mxu0  ;;  %7705 = vmatmul.msk.bf16.gmra.mxu1 %vm2520_vm12, %v3888_v8  ;;  %v2142_v8 = vshrl.u32 %v1906_v56, 16  ;;  %vm986_vm14 = vc.u32 %v978_v6, %v982_v16  ;;  %v988_v54 = vadd.s32 %v982_v16, %v978_v6  ;;  %v2934_v42 = vshrl.u32 %v9348_v40, 16  ;;  %4599 = vmatpush.bf16.msrb.mxu2 %v8428_v10  ;;  %v9478_v10 = vld [vmem:[#allocation2 + $0x20] sm:$0xff] }
 0x169   : > { %v1639_v1 = vadd.f32 %v9145_v39, %v1638_v25  ;;  %v967_v11 = vshrl.u32 %v966_v46, 4  ;;  %v987_v59 = vsel %vm986_vm14, 1, %v8656_v22  ;;  %v2147_v38 = vrot.slane %v2145_v29, 7 }
 0x16a   : > { %v2144_v37 = vrot.slane %v2142_v8, 6  ;;  %v989_v31 = vadd.s32 %v987_v59, %v981_v49  ;;  %vm990_vm15 = vc.u32 %v988_v54, %v984_v27  ;;  %v2877_v41 = vsel %vm2849_vm0, %v2872_v32, %v9415_v35 }
 0x16b   : > { %vm1692_vm13 = vcmp.gt.f32.partialorder %v1639_v1, 0.0  ;;  %v1728_v48 = vmul.f32 0.1, %v1639_v1  ;;  %v968_v55 = vmul.u32 18, %v967_v11  ;;  %v991_v26 = vsel %vm990_vm15, 1, %v8656_v22  ;;  %7478 = vmatmul.msk.bf16.gmra.mxu0 %vm2520_vm12, %v2877_v41 }
 0x16c   : > { %v9423_v21 = vor.u32 %v2147_v38, %v2144_v37  ;;  %v985_v50 = vshrl.u32 %v980_v63, 16  ;;  %v993_v30 = vadd.s32 %v991_v26, %v989_v31  ;;  %v9427_v51 = vadd.s32 200, %v8734_v14 }
 0x16d   : > { %v969_v44 = vsub.s32 %v9370_v62, %v968_v55  ;;  %v1764_v33 = vsel %vm1692_vm13, %v1639_v1, %v1728_v48  ;;  %v2936_v32 = vor.u32 %v2934_v42, %v9367_v61  ;;  %v3889_v3 = vrot.slane %v9417_v47, 1  ;;  %v9446_v5 = vpop.f32.mrf.mxu1 }
 0x16e   : > { %v8331_v28 = vld [vmem:[#allocation2 + $0x58] sm:$0xff]  ;;  %v2149_v24 = vsel %vm8908_vm7, %v2140_v19, %v9423_v21  ;;  %v994_v60 = vadd.s32 %v993_v30, %v983_v2  ;;  %v1004_v25 = vand.u32 65535, %v9427_v51  ;;  %v2150_v62 = vrot.slane %v9423_v21, 4 }
 0x16f   : > { %v9431_v53 = vld [vmem:[#allocation2 + $0x58] sm:$0xff]  ;;  %2345 = vst.msk [vmem:[#allocation2 + $0x60] sm:$0xf] %vm226_vm9, %v2149_v24  ;;  %vm1343_vm3 = vcmp.lt.s32.totalorder %v969_v44, 16  ;;  %7373 = vmatmul.msk.bf16.gmra.mxu3 %vm2520_vm12, %v8331_v28  ;;  %v1005_v6 = vshrl.u32 %v9427_v51, 16  ;;  %v3890_v44 = vsel %vm3422_vm8, %v3887_v57, %v3889_v3 }
 0x170   : > { %v1640_v0 = vpop.f32.mrf.mxu0  ;;  %v2938_v61 = vshll.u32 %v9431_v53, 16  ;;  %v1871_v63 = vsel %vm1343_vm3, %v9401_v58, 0.0  ;;  %v995_v1 = vadd.s32 %v994_v60, %v985_v50  ;;  %v1007_v7 = vmul.u32 14564, %v1004_v25 }
 0x171   : > { %v1641_v40 = vadd.f32 %v9145_v39, %v1640_v0  ;;  %v1008_v9 = vmul.u32 58254, %v1004_v25  ;;  %v1907_v56 = vpack.c.bf16 %v1871_v63, %v1871_v63  ;;  %v1009_v16 = vmul.u32 14564, %v1005_v6 }
 0x172   : > { %v9451_v49 = vrot.slane %v2938_v61, 1  ;;  %v996_v27 = vshrl.u32 %v995_v1, 4  ;;  %v1010_v19 = vmul.u32 58254, %v1005_v6  ;;  %v9459_v0 = vadd.s32 208, %v8734_v14 }
 0x173   : > { %vm1693_vm4 = vcmp.gt.f32.partialorder %v1641_v40, 0.0  ;;  %v1011_v46 = vshll.u32 %v1008_v9, 16  ;;  %v1012_v2 = vshrl.u32 %v1008_v9, 16  ;;  %v2152_v58 = vshrl.u32 %v1907_v56, 16 }
 0x174   : > { %v2155_v8 = vshll.u32 %v1907_v56, 16  ;;  %v2941_v29 = vsel %vm2849_vm0, %v2936_v32, %v9451_v49  ;;  %v1013_v54 = vshll.u32 %v1009_v16, 16  ;;  %v997_v11 = vmul.u32 18, %v996_v27 }
 0x175   : > { %7486 = vmatmul.msk.bf16.gmra.mxu2 %vm2520_vm12, %v2941_v29  ;;  %vm1015_vm5 = vc.u32 %v1007_v7, %v1011_v46  ;;  %v1017_v59 = vadd.s32 %v1011_v46, %v1007_v7  ;;  %v1729_v48 = vmul.f32 0.1, %v1641_v40  ;;  %v2154_v38 = vrot.slane %v2152_v58, 6  ;;  %v9476_v61 = vpop.f32.mrf.mxu1 }
 0x176   : > { %v2157_v31 = vrot.slane %v2155_v8, 7  ;;  %v1014_v55 = vshrl.u32 %v1009_v16, 16  ;;  %v1016_v26 = vsel %vm1015_vm5, 1, %v8656_v22  ;;  %v998_v41 = vsub.s32 %v9382_v12, %v997_v11 }
 0x177   : > { %v1018_v42 = vadd.s32 %v1016_v26, %v1010_v19  ;;  %vm1019_vm6 = vc.u32 %v1017_v59, %v1013_v54  ;;  %v1033_v12 = vand.u32 65535, %v9459_v0  ;;  %v1034_v32 = vshrl.u32 %v9459_v0, 16 }
 0x178   : > { %v1643_v37 = vpop.f32.mrf.mxu0  ;;  %v2158_v21 = vor.u32 %v2157_v31, %v2154_v38  ;;  %v1020_v50 = vsel %vm1019_vm6, 1, %v8656_v22  ;;  %vm1344_vm1 = vcmp.lt.s32.totalorder %v998_v41, 16  ;;  %7706 = vmatmul.msk.bf16.gmra.mxu1 %vm2520_vm12, %v3890_v44  ;;  %v2878_v25 = vshrl.u32 %v9396_v45, 16 }
 0x179   : > { %v1644_v30 = vadd.f32 %v9145_v39, %v1643_v37  ;;  %v1022_v28 = vadd.s32 %v1020_v50, %v1018_v42  ;;  %v1872_v60 = vsel %vm1344_vm1, %v1764_v33, 0.0  ;;  %v1765_v39 = vsel %vm1693_vm4, %v1641_v40, %v1729_v48  ;;  %v9498_v42 = vld [vmem:[%s10780_s2] ss:$0 sm:$0xff] }
 0x17a   : > { %v2159_v24 = vsel %vm8908_vm7, %v2150_v62, %v2158_v21  ;;  %v1908_v15 = vpack.c.bf16 %v1872_v60, %v1872_v60  ;;  %v1036_v6 = vmul.u32 14564, %v1033_v12  ;;  %v1037_v63 = vmul.u32 58254, %v1033_v12 }
 0x17b   : > { %2346 = vst.msk [vmem:[#allocation2 + $0x64] sm:$0xf] %vm226_vm9, %v2159_v24  ;;  %v1023_v57 = vadd.s32 %v1022_v28, %v1012_v2  ;;  %v2160_v1 = vrot.slane %v2158_v21, 4  ;;  %v1038_v7 = vmul.u32 14564, %v1034_v32  ;;  %v1039_v9 = vmul.u32 58254, %v1034_v32 }
 0x17c   : > { %vm1694_vm10 = vcmp.gt.f32.partialorder %v1644_v30, 0.0  ;;  %v2162_v62 = vshrl.u32 %v1908_v15, 16  ;;  %v2165_v33 = vshll.u32 %v1908_v15, 16  ;;  %v1040_v40 = vshll.u32 %v1037_v63, 16 }
 0x17d   : > { %v1024_v56 = vadd.s32 %v1023_v57, %v1014_v55  ;;  %v1041_v16 = vshrl.u32 %v1037_v63, 16  ;;  %v1042_v45 = vshll.u32 %v1038_v7, 16  ;;  %v1730_v27 = vmul.f32 0.1, %v1644_v30 }
 0x17e   : > { %v2880_v19 = vor.u32 %v2878_v25, %v9415_v35  ;;  %v2164_v46 = vrot.slane %v2162_v62, 6  ;;  %v2167_v2 = vrot.slane %v2165_v33, 7  ;;  %vm1044_vm11 = vc.u32 %v1036_v6, %v1040_v40 }
 0x17f   : > { %v1025_v58 = vshrl.u32 %v1024_v56, 4  ;;  %v1043_v29 = vshrl.u32 %v1038_v7, 16  ;;  %v1045_v54 = vsel %vm1044_vm11, 1, %v8656_v22  ;;  %v1046_v11 = vadd.s32 %v1040_v40, %v1036_v6 }
 0x180   : > { %v1645_v8 = vpop.f32.mrf.mxu0  ;;  %v2882_v59 = vshll.u32 %v9478_v10, 16  ;;  %v9483_v48 = vor.u32 %v2167_v2, %v2164_v46  ;;  %v1047_v38 = vadd.s32 %v1045_v54, %v1039_v9  ;;  %v9486_v31 = vadd.s32 216, %v8734_v14 }
 0x181   : > { %v1026_v37 = vmul.u32 18, %v1025_v58  ;;  %vm1048_vm13 = vc.u32 %v1046_v11, %v1042_v45  ;;  %v9489_v35 = vsel %vm1694_vm10, %v1644_v30, %v1730_v27  ;;  %v9501_v21 = vadd.f32 %v9498_v42, %v1645_v8 }
 0x182   : > { %v8332_v55 = vld [vmem:[#allocation2 + $0x60] sm:$0xff]  ;;  %v9491_v26 = vrot.slane %v2882_v59, 1  ;;  %v2169_v50 = vsel %vm8908_vm7, %v2160_v1, %v9483_v48  ;;  %v1049_v44 = vsel %vm1048_vm13, 1, %v8656_v22  ;;  %v2942_v28 = vshrl.u32 %v9431_v53, 16 }
 0x183   : > { %v9493_v41 = vld [vmem:[#allocation2 + $0x60] sm:$0xff]  ;;  %v1027_v30 = vsub.s32 %v9427_v51, %v1026_v37  ;;  %2347 = vst.msk [vmem:[#allocation2 + $0x68] sm:$0xf] %vm226_vm9, %v2169_v50  ;;  %v1051_v12 = vadd.s32 %v1049_v44, %v1047_v38  ;;  %7374 = vmatmul.msk.bf16.gmra.mxu3 %vm2520_vm12, %v8332_v55  ;;  %v1062_v60 = vand.u32 65535, %v9486_v31  ;;  %v2170_v25 = vrot.slane %v9483_v48, 4  ;;  %v9517_v51 = vpop.f32.mrf.mxu1  ;;  %v8384_v38 = vld [vmem:[%s10781_s3 + $0x50] sm:$0xff] }
 0x184   : > { %v2885_v32 = vsel %vm2849_vm0, %v2880_v19, %v9491_v26  ;;  %v2946_v24 = vshll.u32 %v9493_v41, 16  ;;  %v2944_v53 = vor.u32 %v2942_v28, %v9451_v49  ;;  %v1063_v15 = vshrl.u32 %v9486_v31, 16  ;;  %3543 = vmatpush.bf16.msrb.mxu3 %v8384_v38 }
 0x185   : > { %vm1345_vm14 = vcmp.lt.s32.totalorder %v1027_v30, 16  ;;  %7479 = vmatmul.msk.bf16.gmra.mxu0 %vm2520_vm12, %v2885_v32  ;;  %v1052_v6 = vadd.s32 %v1051_v12, %v1041_v16  ;;  %vm1695_vm15 = vcmp.gt.f32.partialorder %v9501_v21, 0.0  ;;  %v1065_v7 = vmul.u32 14564, %v1062_v60 }
 0x186   : > { %v1873_v57 = vsel %vm1345_vm14, %v1765_v39, 0.0  ;;  %v9521_v63 = vrot.slane %v2946_v24, 1  ;;  %v1066_v9 = vmul.u32 58254, %v1062_v60  ;;  %v1067_v62 = vmul.u32 14564, %v1063_v15  ;;  %v9541_v24 = vld [vmem:[#allocation2 + $0x28] sm:$0xff] }
 0x187   : > { %v1909_v1 = vpack.c.bf16 %v1873_v57, %v1873_v57  ;;  %v1053_v33 = vadd.s32 %v1052_v6, %v1043_v29  ;;  %v1731_v40 = vmul.f32 0.1, %v9501_v21  ;;  %v9528_v49 = vadd.s32 224, %v8734_v14 }
 0x188   : > { %v2949_v56 = vsel %vm2849_vm0, %v2944_v53, %v9521_v63  ;;  %v1068_v16 = vmul.u32 58254, %v1063_v15  ;;  %v1069_v27 = vshll.u32 %v1066_v9, 16  ;;  %v1070_v46 = vshrl.u32 %v1066_v9, 16 }
 0x189   : > { %v2172_v45 = vshrl.u32 %v1909_v1, 16  ;;  %v2175_v39 = vshll.u32 %v1909_v1, 16  ;;  %7487 = vmatmul.msk.bf16.gmra.mxu2 %vm2520_vm12, %v2949_v56  ;;  %v1054_v19 = vshrl.u32 %v1053_v33, 4  ;;  %v1071_v2 = vshll.u32 %v1067_v62, 16 }
 0x18a   : > { %v1091_v58 = vand.u32 65535, %v9528_v49  ;;  %vm1073_vm3 = vc.u32 %v1065_v7, %v1069_v27  ;;  %v1075_v54 = vadd.s32 %v1069_v27, %v1065_v7  ;;  %v1092_v48 = vshrl.u32 %v9528_v49, 16  ;;  %v1648_v7 = vpop.f32.mrf.mxu0 }
 0x18b   : > { %v2174_v8 = vrot.slane %v2172_v45, 6  ;;  %v2177_v29 = vrot.slane %v2175_v39, 7  ;;  %v1055_v11 = vmul.u32 18, %v1054_v19  ;;  %v1074_v59 = vsel %vm1073_vm3, 1, %v8656_v22  ;;  %v9546_v15 = vpop.f32.mrf.mxu1 }
 0x18c   : > { %v1094_v37 = vmul.u32 14564, %v1091_v58  ;;  %v1076_v50 = vadd.s32 %v1074_v59, %v1068_v16  ;;  %vm1077_vm4 = vc.u32 %v1075_v54, %v1071_v2  ;;  %v1095_v30 = vmul.u32 58254, %v1091_v58  ;;  %v9555_v16 = vld [vmem:[#allocation2 + $0x28] sm:$0xff] }
 0x18d   : > { %v9537_v55 = vor.u32 %v2177_v29, %v2174_v8  ;;  %v1056_v44 = vsub.s32 %v9459_v0, %v1055_v11  ;;  %v1072_v28 = vshrl.u32 %v1067_v62, 16  ;;  %v1078_v12 = vsel %vm1077_vm4, 1, %v8656_v22 }
 0x18e   : > { %v1096_v32 = vmul.u32 14564, %v1092_v48  ;;  %v1080_v53 = vadd.s32 %v1078_v12, %v1076_v50  ;;  %v1097_v57 = vmul.u32 58254, %v1092_v48  ;;  %v1098_v6 = vshll.u32 %v1095_v30, 16 }
 0x18f   : > { %v2179_v60 = vsel %vm8908_vm7, %v2170_v25, %v9537_v55  ;;  %vm1346_vm5 = vcmp.lt.s32.totalorder %v1056_v44, 16  ;;  %v1767_v0 = vsel %vm1695_vm15, %v9501_v21, %v1731_v40  ;;  %v1099_v56 = vshrl.u32 %v1095_v30, 16 }
 0x190   : > { %2348 = vst.msk [vmem:[#allocation2 + $0x6c] sm:$0xf] %vm226_vm9, %v2179_v60  ;;  %v1100_v1 = vshll.u32 %v1096_v32, 16  ;;  %v1874_v9 = vsel %vm1346_vm5, %v9489_v35, 0.0  ;;  %v1081_v62 = vadd.s32 %v1080_v53, %v1070_v46  ;;  %vm1102_vm6 = vc.u32 %v1094_v37, %v1098_v6 }
 0x191   : > { %v1104_v33 = vadd.s32 %v1098_v6, %v1094_v37  ;;  %v1910_v25 = vpack.c.bf16 %v1874_v9, %v1874_v9  ;;  %v1103_v45 = vsel %vm1102_vm6, 1, %v8656_v22  ;;  %v3891_v39 = vrot.slane %v9541_v24, 1 }
 0x192   : > { %v1082_v27 = vadd.s32 %v1081_v62, %v1072_v28  ;;  %v1105_v19 = vadd.s32 %v1103_v45, %v1097_v57  ;;  %v1649_v21 = vadd.f32 %v9498_v42, %v1648_v7  ;;  %v1101_v58 = vshrl.u32 %v1096_v32, 16  ;;  %v1650_v7 = vpop.f32.mrf.mxu0 }
 0x193   : > { %vm1106_vm1 = vc.u32 %v1104_v33, %v1100_v1  ;;  %v2182_v40 = vshrl.u32 %v1910_v25, 16  ;;  %v2185_v2 = vshll.u32 %v1910_v25, 16  ;;  %v3892_v29 = vsel %vm3422_vm8, %v3889_v3, %v3891_v39  ;;  %v9579_v53 = vpop.f32.mrf.mxu1 }
 0x194   : > { %v1107_v35 = vsel %vm1106_vm1, 1, %v8656_v22  ;;  %v1083_v46 = vshrl.u32 %v1082_v27, 4  ;;  %v2886_v54 = vshrl.u32 %v9478_v10, 16  ;;  %v2180_v11 = vrot.slane %v9537_v55, 4  ;;  %7707 = vmatmul.msk.bf16.gmra.mxu1 %vm2520_vm12, %v3892_v29 }
 0x195   : > { %v1109_v8 = vadd.s32 %v1107_v35, %v1105_v19  ;;  %v2184_v59 = vrot.slane %v2182_v40, 6  ;;  %v2187_v48 = vrot.slane %v2185_v2, 7  ;;  %v2890_v37 = vshll.u32 %v9555_v16, 16 }
 0x196   : > { %v1084_v38 = vmul.u32 18, %v1083_v46  ;;  %vm1696_vm10 = vcmp.gt.f32.partialorder %v1649_v21, 0.0  ;;  %v2888_v44 = vor.u32 %v2886_v54, %v9491_v26  ;;  %v2950_v10 = vshrl.u32 %v9493_v41, 16 }
 0x197   : > { %v1110_v50 = vadd.s32 %v1109_v8, %v1099_v56  ;;  %v8333_v30 = vld [vmem:[#allocation2 + $0x68] sm:$0xff]  ;;  %v2188_v47 = vor.u32 %v2187_v48, %v2184_v59  ;;  %v9571_v3 = vrot.slane %v2890_v37, 1  ;;  %v9575_v55 = vadd.s32 232, %v8734_v14 }
 0x198   : > { %v9569_v28 = vld [vmem:[#allocation2 + $0x68] sm:$0xff]  ;;  %v1085_v12 = vsub.s32 %v9486_v31, %v1084_v38  ;;  %v1732_v60 = vmul.f32 0.1, %v1649_v21  ;;  %7375 = vmatmul.msk.bf16.gmra.mxu3 %vm2520_vm12, %v8333_v30  ;;  %v2952_v41 = vor.u32 %v2950_v10, %v9521_v63  ;;  %v1651_v35 = vadd.f32 %v9498_v42, %v1650_v7  ;;  %v9600_v38 = vld [vmem:[#allocation2 + $0x30] sm:$0xff] }
 0x199   : > { %v1111_v32 = vadd.s32 %v1110_v50, %v1101_v58  ;;  %v2954_v26 = vshll.u32 %v9569_v28, 16  ;;  %v2189_v57 = vsel %vm8908_vm7, %v2180_v11, %v2188_v47  ;;  %v2893_v6 = vsel %vm2849_vm0, %v2888_v44, %v9571_v3 }
 0x19a   : > { %v1120_v1 = vand.u32 65535, %v9575_v55  ;;  %2349 = vst.msk [vmem:[#allocation2 + $0x70] sm:$0xf] %vm226_vm9, %v2189_v57  ;;  %vm1347_vm11 = vcmp.lt.s32.totalorder %v1085_v12, 16  ;;  %7480 = vmatmul.msk.bf16.gmra.mxu0 %vm2520_vm12, %v2893_v6  ;;  %v1121_v62 = vshrl.u32 %v9575_v55, 16  ;;  %v1768_v40 = vsel %vm1696_vm10, %v1649_v21, %v1732_v60 }
 0x19b   : > { %v1112_v31 = vshrl.u32 %v1111_v32, 4  ;;  %v9590_v9 = vrot.slane %v2954_v26, 1  ;;  %v1875_v33 = vsel %vm1347_vm11, %v1767_v0, 0.0  ;;  %v2190_v54 = vrot.slane %v2188_v47, 4  ;;  %v9606_v32 = vpop.f32.mrf.mxu1 }
 0x19c   : > { %v1123_v25 = vmul.u32 14564, %v1120_v1  ;;  %v1124_v56 = vmul.u32 58254, %v1120_v1  ;;  %v1911_v45 = vpack.c.bf16 %v1875_v33, %v1875_v33  ;;  %v1125_v19 = vmul.u32 14564, %v1121_v62  ;;  %v8427_v33 = vld [vmem:[%s10781_s3 + $0x88] sm:$0xff] }
 0x19d   : > { %v1113_v27 = vmul.u32 18, %v1112_v31  ;;  %v2957_v63 = vsel %vm2849_vm0, %v2952_v41, %v9590_v9  ;;  %v1126_v2 = vmul.u32 58254, %v1121_v62  ;;  %v9603_v44 = vadd.s32 240, %v8734_v14  ;;  %v1653_v41 = vpop.f32.mrf.mxu0  ;;  %4600 = vmatpush.bf16.msrb.mxu2 %v8427_v33 }
 0x19e   : > { %7488 = vmatmul.msk.bf16.gmra.mxu2 %vm2520_vm12, %v2957_v63  ;;  %v1127_v58 = vshll.u32 %v1124_v56, 16  ;;  %v2192_v46 = vshrl.u32 %v1911_v45, 16  ;;  %v2195_v8 = vshll.u32 %v1911_v45, 16  ;;  %v1129_v29 = vshll.u32 %v1125_v19, 16 }
 0x19f   : > { %v1114_v0 = vsub.s32 %v9528_v49, %v1113_v27  ;;  %v1128_v11 = vshrl.u32 %v1124_v56, 16  ;;  %v1733_v12 = vmul.f32 0.1, %v1651_v35  ;;  %v1130_v60 = vshrl.u32 %v1125_v19, 16 }
 0x1a0   : > { %vm1131_vm13 = vc.u32 %v1123_v25, %v1127_v58  ;;  %v1133_v59 = vadd.s32 %v1127_v58, %v1123_v25  ;;  %v2194_v48 = vrot.slane %v2192_v46, 6  ;;  %v2197_v37 = vrot.slane %v2195_v8, 7 }
 0x1a1   : > { %vm1348_vm14 = vcmp.lt.s32.totalorder %v1114_v0, 16  ;;  %v1132_v21 = vsel %vm1131_vm13, 1, %v8656_v22  ;;  %v1149_v57 = vand.u32 65535, %v9603_v44  ;;  %v1150_v6 = vshrl.u32 %v9603_v44, 16 }
 0x1a2   : > { %v1876_v50 = vsel %vm1348_vm14, %v1768_v40, 0.0  ;;  %v1134_v30 = vadd.s32 %v1132_v21, %v1126_v2  ;;  %vm1135_vm15 = vc.u32 %v1133_v59, %v1129_v29  ;;  %v2198_v10 = vor.u32 %v2197_v37, %v2194_v48 }
 0x1a3   : > { %v1912_v49 = vpack.c.bf16 %v1876_v50, %v1876_v50  ;;  %v1136_v47 = vsel %vm1135_vm15, 1, %v8656_v22  ;;  %v3893_v62 = vrot.slane %v9600_v38, 1  ;;  %v1152_v56 = vmul.u32 14564, %v1149_v57 }
 0x1a4   : > { %v1138_v26 = vadd.s32 %v1136_v47, %v1134_v30  ;;  %v2199_v1 = vsel %vm8908_vm7, %v2190_v54, %v2198_v10  ;;  %v1153_v45 = vmul.u32 58254, %v1149_v57  ;;  %v1154_v27 = vmul.u32 14564, %v1150_v6 }
 0x1a5   : > { %v2202_v7 = vshrl.u32 %v1912_v49, 16  ;;  %v2205_v31 = vshll.u32 %v1912_v49, 16  ;;  %2350 = vst.msk [vmem:[#allocation2 + $0x74] sm:$0xf] %vm226_vm9, %v2199_v1  ;;  %vm1697_vm3 = vcmp.gt.f32.partialorder %v1651_v35, 0.0  ;;  %v9618_v40 = vadd.f32 %v9498_v42, %v1653_v41 }
 0x1a6   : > { %v1139_v25 = vadd.s32 %v1138_v26, %v1128_v11  ;;  %v1155_v58 = vmul.u32 58254, %v1150_v6  ;;  %v1156_v46 = vshll.u32 %v1153_v45, 16  ;;  %v1158_v8 = vshll.u32 %v1154_v27, 16  ;;  %v9627_v11 = vld [vmem:[#allocation2 + $0x30] sm:$0xff] }
 0x1a7   : > { %v2204_v63 = vrot.slane %v2202_v7, 6  ;;  %v2207_v19 = vrot.slane %v2205_v31, 7  ;;  %v2200_v0 = vrot.slane %v2198_v10, 4  ;;  %v3894_v54 = vsel %vm3422_vm8, %v3891_v39, %v3893_v62 }
 0x1a8   : > { %v1140_v2 = vadd.s32 %v1139_v25, %v1130_v60  ;;  %v1769_v48 = vsel %vm1697_vm3, %v1651_v35, %v1733_v12  ;;  %vm1160_vm4 = vc.u32 %v1152_v56, %v1156_v46  ;;  %v1162_v37 = vadd.s32 %v1156_v46, %v1152_v56  ;;  %7708 = vmatmul.msk.bf16.gmra.mxu1 %vm2520_vm12, %v3894_v54  ;;  %v9639_v60 = vpop.f32.mrf.mxu1  ;;  %v1655_v56 = vpop.f32.mrf.mxu0 }
 0x1a9   : > { %v9620_v29 = vor.u32 %v2207_v19, %v2204_v63  ;;  %v1157_v50 = vshrl.u32 %v1153_v45, 16  ;;  %v1161_v30 = vsel %vm1160_vm4, 1, %v8656_v22  ;;  %vm1698_vm5 = vcmp.gt.f32.partialorder %v9618_v40, 0.0 }
 0x1aa   : > { %v1141_v59 = vshrl.u32 %v1140_v2, 4  ;;  %v1159_v39 = vshrl.u32 %v1154_v27, 16  ;;  %v1163_v10 = vadd.s32 %v1161_v30, %v1155_v58  ;;  %vm1164_vm6 = vc.u32 %v1162_v37, %v1158_v8  ;;  %v9661_v2 = vld [vmem:[#allocation2 + $0x38] sm:$0xff] }
 0x1ab   : > { %v2209_v21 = vsel %vm8908_vm7, %v2200_v0, %v9620_v29  ;;  %v1165_v35 = vsel %vm1164_vm6, 1, %v8656_v22  ;;  %v2894_v47 = vshrl.u32 %v9555_v16, 16  ;;  %v2898_v12 = vshll.u32 %v9627_v11, 16 }
 0x1ac   : > { %2351 = vst.msk [vmem:[#allocation2 + $0x78] sm:$0xf] %vm226_vm9, %v2209_v21  ;;  %v1142_v24 = vmul.u32 18, %v1141_v59  ;;  %v8334_v49 = vld [vmem:[#allocation2 + $0x70] sm:$0xff]  ;;  %v9644_v57 = vadd.s32 248, %v8734_v14  ;;  %v1167_v41 = vadd.s32 %v1165_v35, %v1163_v10  ;;  %v2958_v7 = vshrl.u32 %v9569_v28, 16 }
 0x1ad   : > { %v9641_v26 = vld [vmem:[#allocation2 + $0x70] sm:$0xff]  ;;  %v1734_v1 = vmul.f32 0.1, %v9618_v40  ;;  %7376 = vmatmul.msk.bf16.gmra.mxu3 %vm2520_vm12, %v8334_v49  ;;  %v2896_v16 = vor.u32 %v2894_v47, %v9571_v3  ;;  %v9651_v31 = vrot.slane %v2898_v12, 1  ;;  %v2210_v54 = vrot.slane %v9620_v29, 4 }
 0x1ae   : > { %v1143_v6 = vsub.s32 %v9575_v55, %v1142_v24  ;;  %v2962_v33 = vshll.u32 %v9641_v26, 16  ;;  %v1178_v25 = vand.u32 65535, %v9644_v57  ;;  %v1168_v45 = vadd.s32 %v1167_v41, %v1157_v50 }
 0x1af   : > { %v2960_v55 = vor.u32 %v2958_v7, %v9590_v9  ;;  %v1179_v27 = vshrl.u32 %v9644_v57, 16  ;;  %v2901_v28 = vsel %vm2849_vm0, %v2896_v16, %v9651_v31  ;;  %v1770_v24 = vsel %vm1698_vm5, %v9618_v40, %v1734_v1 }
 0x1b0   : > { %vm1349_vm1 = vcmp.lt.s32.totalorder %v1143_v6, 16  ;;  %v9659_v19 = vrot.slane %v2962_v33, 1  ;;  %v1181_v3 = vmul.u32 14564, %v1178_v25  ;;  %v1169_v46 = vadd.s32 %v1168_v45, %v1159_v39  ;;  %7481 = vmatmul.msk.bf16.gmra.mxu0 %vm2520_vm12, %v2901_v28  ;;  %v9679_v41 = vpop.f32.mrf.mxu1 }
 0x1b1   : > { %v1877_v63 = vsel %vm1349_vm1, %v1769_v48, 0.0  ;;  %v1182_v8 = vmul.u32 58254, %v1178_v25  ;;  %v1183_v0 = vmul.u32 14564, %v1179_v27  ;;  %v1184_v59 = vmul.u32 58254, %v1179_v27  ;;  %10828 = vst [vmem:[#allocation4_spill] sm:$0xff] %v9679_v41 }
 0x1b2   : > { %v1913_v58 = vpack.c.bf16 %v1877_v63, %v1877_v63  ;;  %v2965_v9 = vsel %vm2849_vm0, %v2960_v55, %v9659_v19  ;;  %v9668_v48 = vadd.s32 256, %v8734_v14  ;;  %v1170_v50 = vshrl.u32 %v1169_v46, 4  ;;  %v1658_v63 = vpop.f32.mrf.mxu0 }
 0x1b3   : > { %7489 = vmatmul.msk.bf16.gmra.mxu2 %vm2520_vm12, %v2965_v9  ;;  %v1185_v30 = vshll.u32 %v1182_v8, 16  ;;  %v1187_v39 = vshll.u32 %v1183_v0, 16  ;;  %v9675_v29 = vadd.f32 %v9498_v42, %v1655_v56  ;;  %v3895_v10 = vrot.slane %v9661_v2, 1  ;;  %v8383_v56 = vld [vmem:[%s10781_s3 + $0x48] sm:$0xff] }
 0x1b4   : > { %v2212_v37 = vshrl.u32 %v1913_v58, 16  ;;  %v2215_v21 = vshll.u32 %v1913_v58, 16  ;;  %v1171_v47 = vmul.u32 18, %v1170_v50  ;;  %v1207_v7 = vand.u32 65535, %v9668_v48  ;;  %3544 = vmatpush.bf16.msrb.mxu3 %v8383_v56 }
 0x1b5   : > { %vm1189_vm10 = vc.u32 %v1181_v3, %v1185_v30  ;;  %v1191_v6 = vadd.s32 %v1185_v30, %v1181_v3  ;;  %v1208_v16 = vshrl.u32 %v9668_v48, 16  ;;  %v1186_v33 = vshrl.u32 %v1182_v8, 16 }
 0x1b6   : > { %v2214_v35 = vrot.slane %v2212_v37, 6  ;;  %v2217_v49 = vrot.slane %v2215_v21, 7  ;;  %v1190_v12 = vsel %vm1189_vm10, 1, %v8656_v22  ;;  %v1172_v1 = vsub.s32 %v9603_v44, %v1171_v47 }
 0x1b7   : > { %v1192_v25 = vadd.s32 %v1190_v12, %v1184_v59  ;;  %vm1193_vm11 = vc.u32 %v1191_v6, %v1187_v39  ;;  %vm1699_vm13 = vcmp.gt.f32.partialorder %v9675_v29, 0.0  ;;  %v1210_v45 = vmul.u32 14564, %v1207_v7 }
 0x1b8   : > { %v2218_v40 = vor.u32 %v2217_v49, %v2214_v35  ;;  %v1211_v55 = vmul.u32 58254, %v1207_v7  ;;  %v1212_v27 = vmul.u32 14564, %v1208_v16  ;;  %vm1350_vm14 = vcmp.lt.s32.totalorder %v1172_v1, 16 }
 0x1b9   : > { %v1188_v3 = vshrl.u32 %v1183_v0, 16  ;;  %v1194_v44 = vsel %vm1193_vm11, 1, %v8656_v22  ;;  %v1878_v58 = vsel %vm1350_vm14, %v1770_v24, 0.0  ;;  %v1213_v8 = vmul.u32 58254, %v1208_v16  ;;  %v9694_v0 = vld [vmem:[#allocation2 + $0x38] sm:$0xff] }
 0x1ba   : > { %v2219_v28 = vsel %vm8908_vm7, %v2210_v54, %v2218_v40  ;;  %v1196_v46 = vadd.s32 %v1194_v44, %v1192_v25  ;;  %v1214_v9 = vshll.u32 %v1211_v55, 16  ;;  %v1914_v59 = vpack.c.bf16 %v1878_v58, %v1878_v58 }
 0x1bb   : > { %2352 = vst.msk [vmem:[#allocation2 + $0x7c] sm:$0xf] %vm226_vm9, %v2219_v28  ;;  %v1735_v37 = vmul.f32 0.1, %v9675_v29  ;;  %v1216_v21 = vshll.u32 %v1212_v27, 16  ;;  %v1659_v50 = vadd.f32 %v9498_v42, %v1658_v63  ;;  %v2220_v30 = vrot.slane %v2218_v40, 4  ;;  %v9706_v63 = vpop.f32.mrf.mxu1 }
 0x1bc   : > { %v1197_v39 = vadd.s32 %v1196_v46, %v1186_v33  ;;  %vm1218_vm15 = vc.u32 %v1210_v45, %v1214_v9  ;;  %v1220_v54 = vadd.s32 %v1214_v9, %v1210_v45  ;;  %v2222_v35 = vshrl.u32 %v1914_v59, 16  ;;  %10829 = vst [vmem:[#allocation5_spill] sm:$0xff] %v9706_v63 }
 0x1bd   : > { %v2225_v49 = vshll.u32 %v1914_v59, 16  ;;  %v1215_v47 = vshrl.u32 %v1211_v55, 16  ;;  %v1219_v24 = vsel %vm1218_vm15, 1, %v8656_v22  ;;  %v3896_v7 = vsel %vm3422_vm8, %v3893_v62, %v3895_v10 }
 0x1be   : > { %v1198_v12 = vadd.s32 %v1197_v39, %v1188_v3  ;;  %v1221_v6 = vadd.s32 %v1219_v24, %v1213_v8  ;;  %vm1222_vm3 = vc.u32 %v1220_v54, %v1216_v21  ;;  %v2224_v16 = vrot.slane %v2222_v35, 6  ;;  %7709 = vmatmul.msk.bf16.gmra.mxu1 %vm2520_vm12, %v3896_v7  ;;  %v1660_v35 = vpop.f32.mrf.mxu0 }
 0x1bf   : > { %v2227_v40 = vrot.slane %v2225_v49, 7  ;;  %v1217_v1 = vshrl.u32 %v1212_v27, 16  ;;  %v1223_v33 = vsel %vm1222_vm3, 1, %v8656_v22  ;;  %v2902_v45 = vshrl.u32 %v9627_v11, 16 }
 0x1c0   : > { %v1199_v25 = vshrl.u32 %v1198_v12, 4  ;;  %v1225_v56 = vadd.s32 %v1223_v33, %v1221_v6  ;;  %v2906_v55 = vshll.u32 %v9694_v0, 16  ;;  %vm1700_vm4 = vcmp.gt.f32.partialorder %v1659_v50, 0.0 }
 0x1c1   : > { %v9708_v28 = vor.u32 %v2227_v40, %v2224_v16  ;;  %v1736_v38 = vmul.f32 0.1, %v1659_v50  ;;  %v9713_v27 = vadd.s32 264, %v8734_v14  ;;  %v2904_v46 = vor.u32 %v2902_v45, %v9651_v31 }
 0x1c2   : > { %v8335_v62 = vld [vmem:[#allocation2 + $0x78] sm:$0xff]  ;;  %v1200_v44 = vmul.u32 18, %v1199_v25  ;;  %v1226_v58 = vadd.s32 %v1225_v56, %v1215_v47  ;;  %v9716_v8 = vrot.slane %v2906_v55, 1  ;;  %v1771_v9 = vsel %vm1699_vm13, %v9675_v29, %v1735_v37 }
 0x1c3   : > { %v9710_v3 = vld [vmem:[#allocation2 + $0x78] sm:$0xff]  ;;  %v2229_v11 = vsel %vm8908_vm7, %v2220_v30, %v9708_v28  ;;  %7377 = vmatmul.msk.bf16.gmra.mxu3 %vm2520_vm12, %v8335_v62  ;;  %v2966_v59 = vshrl.u32 %v9641_v26, 16  ;;  %v1236_v30 = vand.u32 65535, %v9713_v27  ;;  %v1772_v49 = vsel %vm1700_vm4, %v1659_v50, %v1736_v38 }
 0x1c4   : > { %v2970_v21 = vshll.u32 %v9710_v3, 16  ;;  %2353 = vst.msk [vmem:[#allocation2 + $0x80] sm:$0xf] %vm226_vm9, %v2229_v11  ;;  %v1201_v31 = vsub.s32 %v9644_v57, %v1200_v44  ;;  %v1227_v39 = vadd.s32 %v1226_v58, %v1217_v1  ;;  %v2909_v54 = vsel %vm2849_vm0, %v2904_v46, %v9716_v8  ;;  %v9749_v44 = vpop.f32.mrf.mxu1 }
 0x1c5   : > { %7482 = vmatmul.msk.bf16.gmra.mxu0 %vm2520_vm12, %v2909_v54  ;;  %v2968_v29 = vor.u32 %v2966_v59, %v9659_v19  ;;  %v1237_v37 = vshrl.u32 %v9713_v27, 16  ;;  %v1239_v57 = vmul.u32 14564, %v1236_v30  ;;  %v1240_v24 = vmul.u32 58254, %v1236_v30 }
 0x1c6   : > { %v9735_v26 = vrot.slane %v2970_v21, 1  ;;  %vm1351_vm5 = vcmp.lt.s32.totalorder %v1201_v31, 16  ;;  %v1228_v47 = vshrl.u32 %v1227_v39, 4  ;;  %v9741_v16 = vadd.f32 %v9498_v42, %v1660_v35 }
 0x1c7   : > { %v1879_v12 = vsel %vm1351_vm5, %v1771_v9, 0.0  ;;  %v1241_v7 = vmul.u32 14564, %v1237_v37  ;;  %v1242_v19 = vmul.u32 58254, %v1237_v37  ;;  %v1243_v1 = vshll.u32 %v1240_v24, 16 }
 0x1c8   : > { %v2973_v6 = vsel %vm2849_vm0, %v2968_v29, %v9735_v26  ;;  %v1915_v50 = vpack.c.bf16 %v1879_v12, %v1879_v12  ;;  %v1229_v40 = vmul.u32 18, %v1228_v47  ;;  %v2230_v33 = vrot.slane %v9708_v28, 4 }
 0x1c9   : > { %7490 = vmatmul.msk.bf16.gmra.mxu2 %vm2520_vm12, %v2973_v6  ;;  %v1244_v25 = vshrl.u32 %v1240_v24, 16  ;;  %v1245_v56 = vshll.u32 %v1241_v7, 16  ;;  %v9746_v45 = vadd.s32 272, %v8734_v14  ;;  %vm1247_vm6 = vc.u32 %v1239_v57, %v1243_v1  ;;  %v9758_v6 = vld [vmem:[#allocation2 + $0x40] sm:$0xff] }
 0x1ca   : > { %v2232_v55 = vshrl.u32 %v1915_v50, 16  ;;  %v2235_v38 = vshll.u32 %v1915_v50, 16  ;;  %v1230_v62 = vsub.s32 %v9668_v48, %v1229_v40  ;;  %v1248_v58 = vsel %vm1247_vm6, 1, %v8656_v22  ;;  %v8473_v48 = vld [vmem:[%s10781_s3 + $0xd8] sm:$0xff] }
 0x1cb   : > { %v1249_v46 = vadd.s32 %v1243_v1, %v1239_v57  ;;  %v1265_v11 = vand.u32 65535, %v9746_v45  ;;  %v1266_v9 = vshrl.u32 %v9746_v45, 16  ;;  %v1250_v21 = vadd.s32 %v1248_v58, %v1242_v19  ;;  %5521 = vmatpush.bf16.msra.mxu0 %v8473_v48 }
 0x1cc   : > { %v2234_v28 = vrot.slane %v2232_v55, 6  ;;  %v2237_v59 = vrot.slane %v2235_v38, 7  ;;  %vm1352_vm1 = vcmp.lt.s32.totalorder %v1230_v62, 16  ;;  %v1246_v47 = vshrl.u32 %v1241_v7, 16 }
 0x1cd   : > { %v1880_v31 = vsel %vm1352_vm1, %v1772_v49, 0.0  ;;  %vm1251_vm10 = vc.u32 %v1249_v46, %v1245_v56  ;;  %v1268_v39 = vmul.u32 14564, %v1265_v11  ;;  %v1269_v54 = vmul.u32 58254, %v1265_v11 }
 0x1ce   : > { %v2238_v30 = vor.u32 %v2237_v59, %v2234_v28  ;;  %v1916_v35 = vpack.c.bf16 %v1880_v31, %v1880_v31  ;;  %v1252_v29 = vsel %vm1251_vm10, 1, %v8656_v22  ;;  %v1270_v37 = vmul.u32 14564, %v1266_v9  ;;  %v1663_v28 = vpop.f32.mrf.mxu0 }
 0x1cf   : > { %v1254_v57 = vadd.s32 %v1252_v29, %v1250_v21  ;;  %v1271_v24 = vmul.u32 58254, %v1266_v9  ;;  %v1272_v12 = vshll.u32 %v1269_v54, 16  ;;  %vm1701_vm13 = vcmp.gt.f32.partialorder %v9741_v16, 0.0 }
 0x1d0   : > { %v2239_v49 = vsel %vm8908_vm7, %v2230_v33, %v2238_v30  ;;  %v2242_v50 = vshrl.u32 %v1916_v35, 16  ;;  %v2245_v40 = vshll.u32 %v1916_v35, 16  ;;  %v1274_v1 = vshll.u32 %v1270_v37, 16 }
 0x1d1   : > { %2354 = vst.msk [vmem:[#allocation2 + $0x84] sm:$0xf] %vm226_vm9, %v2239_v49  ;;  %v1255_v19 = vadd.s32 %v1254_v57, %v1244_v25  ;;  %vm1276_vm11 = vc.u32 %v1268_v39, %v1272_v12  ;;  %v1278_v38 = vadd.s32 %v1272_v12, %v1268_v39  ;;  %v3897_v46 = vrot.slane %v9758_v6, 1  ;;  %v9768_v25 = vpop.f32.mrf.mxu1 }
 0x1d2   : > { %v2244_v56 = vrot.slane %v2242_v50, 6  ;;  %v2247_v55 = vrot.slane %v2245_v40, 7  ;;  %v1277_v7 = vsel %vm1276_vm11, 1, %v8656_v22  ;;  %v2240_v11 = vrot.slane %v2238_v30, 4  ;;  %10830 = vst [vmem:[#allocation6_spill] sm:$0xff] %v9768_v25 }
 0x1d3   : > { %v1256_v62 = vadd.s32 %v1255_v19, %v1246_v47  ;;  %v1279_v58 = vadd.s32 %v1277_v7, %v1271_v24  ;;  %v1273_v9 = vshrl.u32 %v1269_v54, 16  ;;  %vm1280_vm14 = vc.u32 %v1278_v38, %v1274_v1 }
 0x1d4   : > { %v9766_v33 = vor.u32 %v2247_v55, %v2244_v56  ;;  %v1737_v21 = vmul.f32 0.1, %v9741_v16  ;;  %v1281_v31 = vsel %vm1280_vm14, 1, %v8656_v22  ;;  %v2910_v39 = vshrl.u32 %v9694_v0, 16 }
 0x1d5   : > { %v1257_v59 = vshrl.u32 %v1256_v62, 4  ;;  %v1275_v35 = vshrl.u32 %v1270_v37, 16  ;;  %v1283_v30 = vadd.s32 %v1281_v31, %v1279_v58  ;;  %v3898_v54 = vsel %vm3422_vm8, %v3895_v10, %v3897_v46 }
 0x1d6   : > { %v2249_v48 = vsel %vm8908_vm7, %v2240_v11, %v9766_v33  ;;  %v1664_v47 = vadd.f32 %v9498_v42, %v1663_v28  ;;  %7710 = vmatmul.msk.bf16.gmra.mxu1 %vm2520_vm12, %v3898_v54  ;;  %v2912_v0 = vor.u32 %v2910_v39, %v9716_v8  ;;  %v9788_v37 = vadd.s32 280, %v8734_v14  ;;  %v8472_v11 = vld [vmem:[%s10781_s3 + $0xd0] sm:$0xff]  ;;  %v9817_v28 = vld [vmem:[#allocation2 + $0x48] sm:$0xff] }
 0x1d7   : > { %2355 = vst.msk [vmem:[#allocation2 + $0x88] sm:$0xf] %vm226_vm9, %v2249_v48  ;;  %v1258_v29 = vmul.u32 18, %v1257_v59  ;;  %v1284_v57 = vadd.s32 %v1283_v30, %v1273_v9  ;;  %v1773_v10 = vsel %vm1701_vm13, %v9741_v16, %v1737_v21  ;;  %v2974_v50 = vshrl.u32 %v9710_v3, 16  ;;  %v8382_v48 = vld [vmem:[%s10781_s3 + $0x40] sm:$0xff]  ;;  %5522 = vmatpush.bf16.msra.mxu0 %v8472_v11 }
 0x1d8   : > { %v8336_v24 = vld [vmem:[#allocation2 + $0x80] sm:$0xff]  ;;  %v2917_v49 = vsel %vm2849_vm0, %v2912_v0, %v9281_v36  ;;  %v1294_v14 = vand.u32 65535, %v9788_v37  ;;  %vm1702_vm3 = vcmp.gt.f32.partialorder %v1664_v47, 0.0  ;;  %v1738_v19 = vmul.f32 0.1, %v1664_v47  ;;  %3545 = vmatpush.bf16.msrb.mxu3 %v8382_v48 }
 0x1d9   : > { %v9785_v12 = vld [vmem:[#allocation2 + $0x80] sm:$0xff]  ;;  %v1259_v2 = vsub.s32 %v9713_v27, %v1258_v29  ;;  %v1285_v40 = vadd.s32 %v1284_v57, %v1275_v35  ;;  %7378 = vmatmul.msk.bf16.gmra.mxu3 %vm2520_vm12, %v8336_v24  ;;  %7483 = vmatmul.msk.bf16.gmra.mxu0 %vm2520_vm12, %v2917_v49  ;;  %v1295_v27 = vshrl.u32 %v9788_v37, 16  ;;  %v2976_v36 = vor.u32 %v2974_v50, %v9735_v26  ;;  %v9812_v9 = vpop.f32.mrf.mxu1  ;;  %v3125_v35 = vpop.f32.mrf.mxu2  ;;  %v8471_v57 = vld [vmem:[%s10781_s3 + $0xc8] sm:$0xff]  ;;  %v8452_v49 = vld [vmem:[#allocation2 + $0x10] sm:$0xf0] }
 0x1da   : > { %v2978_v8 = vshll.u32 %v9785_v12, 16  ;;  %v1297_v55 = vmul.u32 14564, %v1294_v14  ;;  %v1298_v7 = vmul.u32 58254, %v1294_v14  ;;  %v8426_v26 = vld [vmem:[%s10781_s3 + $0x80] sm:$0xff]  ;;  %v2250_v30 = vrot.slane %v9766_v33, 4  ;;  %v9832_v50 = vld [vmem:[#allocation2 + $0x18] sm:$0xff] }
 0x1db   : > { %vm1353_vm15 = vcmp.lt.s32.totalorder %v1259_v2, 16  ;;  %v1286_v1 = vshrl.u32 %v1285_v40, 4  ;;  %v9805_v38 = vmul.u32 14564, %v1295_v27  ;;  %v1300_v31 = vmul.u32 58254, %v1295_v27  ;;  %4601 = vmatpush.bf16.msrb.mxu2 %v8426_v26  ;;  %v1665_v27 = vpop.f32.mrf.mxu0  ;;  %5523 = vmatpush.bf16.msra.mxu0 %v8471_v57 }
 0x1dc   : > { %v1881_v16 = vsel %vm1353_vm15, %v1773_v10, 0.0  ;;  %v9803_v56 = vrot.slane %v2978_v8, 1  ;;  %v1301_v39 = vshll.u32 %v1298_v7, 16  ;;  %v1774_v29 = vsel %vm1702_vm3, %v1664_v47, %v1738_v19  ;;  %v7960_v19 = vld [vmem:[#allocation2 + $0x10] sm:$0xc] }
 0x1dd   : > { %v1917_v3 = vpack.c.bf16 %v1881_v16, %v1881_v16  ;;  %v1287_v62 = vmul.u32 18, %v1286_v1  ;;  %v1303_v0 = vshll.u32 %v9805_v38, 16  ;;  %v1302_v33 = vshrl.u32 %v1298_v7, 16 }
 0x1de   : > { %v2981_v58 = vsel %vm2849_vm0, %v2976_v36, %v9803_v56  ;;  %vm1305_vm4 = vc.u32 %v1297_v55, %v1301_v39  ;;  %v1307_v10 = vadd.s32 %v1301_v39, %v1297_v55  ;;  %v3899_v47 = vrot.slane %v9817_v28, 1  ;;  %v8470_v36 = vld [vmem:[%s10781_s3 + $0xc0] sm:$0xff]  ;;  %v8451_v55 = vld [vmem:[%s10781_s3 + $0xb8] sm:$0xff]  ;;  %v9856_v39 = vpop.f32.mrf.mxu3 }
 0x1df   : > { %v2252_v59 = vshrl.u32 %v1917_v3, 16  ;;  %v2255_v21 = vshll.u32 %v1917_v3, 16  ;;  %7491 = vmatmul.msk.bf16.gmra.mxu2 %vm2520_vm12, %v2981_v58  ;;  %v1288_v54 = vsub.s32 %v9746_v45, %v1287_v62  ;;  %v1306_v45 = vsel %vm1305_vm4, 1, %v8656_v22  ;;  %5060 = vmatpush.bf16.msra.mxu3 %v8451_v55  ;;  %v2359_v28 = vld [vmem:[#allocation2 + $0x98] sm:$0x3] }
 0x1e0   : > { %v1308_v14 = vadd.s32 %v1306_v45, %v1300_v31  ;;  %vm1309_vm6 = vc.u32 %v1307_v10, %v1303_v0  ;;  %v7961_v3 = vor.u32 %v8452_v49, %v7960_v19  ;;  %v1304_v62 = vshrl.u32 %v9805_v38, 16  ;;  %5524 = vmatpush.bf16.msra.mxu0 %v8470_v36 }
 0x1e1   : > { %v2254_v24 = vrot.slane %v2252_v59, 6  ;;  %v2257_v2 = vrot.slane %v2255_v21, 7  ;;  %vm1354_vm5 = vcmp.lt.s32.totalorder %v1288_v54, 16  ;;  %v1310_v1 = vsel %vm1309_vm6, 1, %v8656_v22  ;;  %v9854_v31 = vpop.f32.mrf.mxu1  ;;  %v9860_v48 = vpop.f32.mrf.mxu2 }
 0x1e2   : > { %v1882_v8 = vsel %vm1354_vm5, %v1774_v29, 0.0  ;;  %v1312_v58 = vadd.s32 %v1310_v1, %v1308_v14  ;;  %v9845_v11 = vadd.f32 %v3125_v35, %v9749_v44  ;;  %v3900_v59 = vsel %vm3422_vm8, %v3897_v46, %v3899_v47  ;;  %10832 = vst [vmem:[#allocation8_spill] sm:$0xff] %v9854_v31 }
 0x1e3   : > { %v2258_v40 = vor.u32 %v2257_v2, %v2254_v24  ;;  %v1918_v16 = vpack.c.bf16 %v1882_v8, %v1882_v8  ;;  %v5403_v21 = vrot.slane %v9832_v50, 2  ;;  %v1666_v44 = vadd.f32 %v9498_v42, %v1665_v27  ;;  %10833 = vst [vmem:[#allocation9_spill] sm:$0xff] %v9860_v48  ;;  %v9869_v10 = vpop.f32.mrf.mxu0  ;;  %v8396_v50 = vld [vmem:[#allocation2 + $0x58] sm:$0xff] }
 0x1e4   : > { %10831 = vst [vmem:[#allocation7_spill] sm:$0xff] %v9845_v11  ;;  %v1313_v38 = vadd.s32 %v1312_v58, %v1302_v33  ;;  %v5402_v6 = vrot.slane %v7961_v3, 2  ;;  %vm4940_vm1 = vcmask 1045504   ;;  %v2982_v27 = vshrl.u32 %v9785_v12, 16  ;;  %v8414_v48 = vld [vmem:[#allocation2 + $0x38] sm:$0xff]  ;;  %v8415_v11 = vld [vmem:[#allocation2 + $0x40] sm:$0xff] }
 0x1e5   : > { %v2259_v7 = vsel %vm8908_vm7, %v2250_v30, %v2258_v40  ;;  %v2262_v22 = vshrl.u32 %v1918_v16, 16  ;;  %v2265_v26 = vshll.u32 %v1918_v16, 16  ;;  %v2260_v46 = vrot.slane %v2258_v40, 4  ;;  %v9875_v40 = vld [vmem:[#allocation2 + $0x50] sm:$0xff] }
 0x1e6   : > { %2356 = vst.msk [vmem:[#allocation2 + $0x8c] sm:$0xf] %vm226_vm9, %v2259_v7  ;;  %7711 = vmatmul.msk.bf16.gmra.mxu1 %vm2520_vm12, %v3900_v59  ;;  %v1314_v54 = vadd.s32 %v1313_v38, %v1304_v62  ;;  %v5404_v0 = vsel %vm4940_vm1, %v5402_v6, %v5403_v21  ;;  %v1739_v24 = vmul.f32 0.1, %v1666_v44  ;;  %vm1703_vm10 = vcmp.gt.f32.partialorder %v1666_v44, 0.0  ;;  %v9884_v36 = vpop.f32.mrf.mxu3  ;;  %v9888_v62 = vld [vmem:[#allocation2 + $0x20] sm:$0xff] }
 0x1e7   : > { %v2264_v35 = vrot.slane %v2262_v22, 6  ;;  %v2267_v30 = vrot.slane %v2265_v26, 7  ;;  %10835 = vst [vmem:[#allocation11_spill] sm:$0xff] %v9884_v36  ;;  %v2984_v3 = vor.u32 %v2982_v27, %v9803_v56  ;;  %v7504_v22 = vld [vmem:[#allocation2] sm:$0xe]  ;;  %v8517_v59 = vld [vmem:[%s10781_s3 + $0x118] sm:$0xff] }
 0x1e8   : > { %v1315_v57 = vshrl.u32 %v1314_v54, 4  ;;  %v1775_v14 = vsel %vm1703_vm10, %v1666_v44, %v1739_v24  ;;  %v8364_v26 = vld [vmem:[#allocation2] sm:$0xf0]  ;;  %v8495_v56 = vld [vmem:[%s10781_s3 + $0xf8] sm:$0xff]  ;;  %6578 = vmatpush.bf16.msra.mxu2 %v8517_v59  ;;  %v3903_v18 = vrot.slane %v8396_v50, 1  ;;  %v8455_v59 = vld [vmem:[#allocation2 + $0x28] sm:$0xff] }
 0x1e9   : > { %v2268_v29 = vor.u32 %v2267_v30, %v2264_v35  ;;  %8046 = vmatmul.msk.bf16.vlgmr.msra.gmra.mxu0 %vm2520_vm12, %v5404_v0  ;;  %v9873_v45 = vpop.f32.mrf.mxu1  ;;  %v3130_v16 = vpop.f32.mrf.mxu2  ;;  %v9898_v30 = vld [vmem:[#allocation2 + $0x8] sm:$0xff]  ;;  %v7505_v6 = vor.u32 %v8364_v26, %v7504_v22  ;;  %6116 = vmatpush.bf16.msra.mxu1 %v8495_v56  ;;  %v8397_v50 = vld [vmem:[#allocation2 + $0x60] sm:$0xff] }
 0x1ea   : > { %v1316_v2 = vmul.u32 18, %v1315_v57  ;;  %v9882_v1 = vadd.f32 %v3130_v16, %v9812_v9  ;;  %v8408_v56 = vld [vmem:[#allocation2 + $0x8] sm:$0xf0] }
 0x1eb   : > { %v2269_v42 = vsel %vm8908_vm7, %v2260_v46, %v2268_v29  ;;  %v5405_v46 = vrot.slane %v9888_v62, 2 }
 0x1ec   : > { %2357 = vst.msk [vmem:[#allocation2 + $0x90] sm:$0xf] %vm226_vm9, %v2269_v42  ;;  %v1317_v8 = vsub.s32 %v9788_v37, %v1316_v2  ;;  %v3901_v37 = vrot.slane %v9875_v40, 1  ;;  %v9906_v42 = vpop.f32.mrf.mxu0  ;;  %v2270_v40 = vrot.slane %v2268_v29, 4 }
 0x1ed   : > { %v8337_v49 = vld [vmem:[#allocation2 + $0x88] sm:$0xff]  ;;  %10834 = vst [vmem:[#allocation10_spill] sm:$0xff] %v9882_v1  ;;  %v5406_v27 = vsel %vm4940_vm1, %v5403_v21, %v5405_v46 }
 0x1ee   : > { %v9871_v33 = vld [vmem:[#allocation2 + $0x88] sm:$0xff]  ;;  %7379 = vmatmul.msk.bf16.gmra.mxu3 %vm2520_vm12, %v8337_v49  ;;  %vm1355_vm11 = vcmp.lt.s32.totalorder %v1317_v8, 16  ;;  %v3902_v54 = vsel %vm3422_vm8, %v3899_v47, %v3901_v37  ;;  %v3424_v47 = vrot.slane %v9898_v30, 1 }
 0x1ef   : > { %v2986_v19 = vshll.u32 %v9871_v33, 16  ;;  %v1883_v7 = vsel %vm1355_vm11, %v1775_v14, 0.0  ;;  %v3423_v14 = vrot.slane %v7505_v6, 1  ;;  %v2990_v43 = vshrl.u32 %v9871_v33, 16  ;;  %v8366_v6 = vld [vmem:[#allocation2 + $0x10] sm:$0xff] }
 0x1f0   : > { %v1919_v58 = vpack.c.bf16 %v1883_v7, %v1883_v7 }
 0x1f1   : > { %v2988_v55 = vrot.slane %v2986_v19, 1  ;;  %v9904_v0 = vpop.f32.mrf.mxu1  ;;  %v9909_v49 = vpop.f32.mrf.mxu2  ;;  %v3425_v62 = vsel %vm3422_vm8, %v3423_v14, %v3424_v47 }
 0x1f2   : > { %v2272_v38 = vshrl.u32 %v1919_v58, 16  ;;  %v2275_v44 = vshll.u32 %v1919_v58, 16  ;;  %10836 = vst [vmem:[#allocation12_spill] sm:$0xff] %v9909_v49  ;;  %v2639_v19 = vpop.f32.mrf.mxu3 }
 0x1f3   : > { %v2989_v12 = vsel %vm2849_vm0, %v2984_v3, %v2988_v55  ;;  %v2746_v9 = vld [vmem:[#allocation2 + $0x90] sm:$0x1] }
 0x1f4   : > { %7492 = vmatmul.msk.bf16.gmra.mxu2 %vm2520_vm12, %v2989_v12  ;;  %v2829_v35 = vunpack.c.l.b16 %v2746_v9  ;;  %v2274_v57 = vrot.slane %v2272_v38, 6  ;;  %v2277_v24 = vrot.slane %v2275_v44, 7  ;;  %v9929_v26 = vpop.f32.mrf.mxu0  ;;  %v2992_v9 = vor.u32 %v2990_v43, %v2988_v55  ;;  %v8409_v44 = vld [vmem:[#allocation2 + $0x10] sm:$0xff] }
 0x1f5   : > { %v4355_v55 = vshrl.u32 %v8409_v44, 16 }
 0x1f6   : > { %7712 = vmatmul.msk.bf16.gmra.mxu1 %vm2520_vm12, %v3902_v54  ;;  %v2848_v2 = vpack.c.b16 %v2829_v35, %v2829_v35  ;;  %v2278_v8 = vor.u32 %v2277_v24, %v2274_v57  ;;  %v7732_v35 = vld [vmem:[#allocation2 + $0x8] sm:$0xe]  ;;  %v3904_v54 = vsel %vm3422_vm8, %v3901_v37, %v3903_v18  ;;  %v4358_v24 = vshll.u32 %v8409_v44, 16  ;;  %v8410_v44 = vld [vmem:[#allocation2 + $0x18] sm:$0xff] }
 0x1f7   : > { %v7733_v33 = vor.u32 %v8408_v56, %v7732_v35  ;;  %v8456_v56 = vld [vmem:[#allocation2 + $0x30] sm:$0xff]  ;;  %v8367_v35 = vld [vmem:[#allocation2 + $0x18] sm:$0xff] }
 0x1f8   : > { %v2279_v16 = vsel %vm8908_vm7, %v2270_v40, %v2278_v8  ;;  %v2280_v3 = vrot.slane %v2278_v8, 4  ;;  %v2994_v7 = vshll.u32 %v2848_v2, 16  ;;  %v4360_v37 = vrot.slane %v4358_v24, 2 }
 0x1f9   : > { %8047 = vmatmul.msk.bf16.gmra.mxu0 %vm2520_vm12, %v5406_v27  ;;  %2358 = vst.msk [vmem:[#allocation2 + $0x94] sm:$0xf] %vm226_vm9, %v2279_v16  ;;  %v9922_v58 = vpop.f32.mrf.mxu1  ;;  %v3135_v12 = vpop.f32.mrf.mxu2  ;;  %v4347_v40 = vshrl.u32 %v7733_v33, 16  ;;  %v4350_v8 = vshll.u32 %v7733_v33, 16  ;;  %v4357_v16 = vrot.slane %v4355_v55, 1  ;;  %v4367_v55 = vshll.u32 %v8410_v44, 16 }
 0x1fa   : > { %v2360_v29 = vsel %vm8739_vm2, %v2280_v3, %v2359_v28  ;;  %v2996_v21 = vrot.slane %v2994_v7, 1  ;;  %v9927_v22 = vadd.f32 %v3135_v12, %v9856_v39  ;;  %v9933_v30 = vpop.f32.mrf.mxu3  ;;  %v5407_v39 = vrot.slane %v8455_v59, 2 }
 0x1fb   : > { %2361 = vst [vmem:[#allocation2 + $0x98] sm:$0x3] %v2360_v29  ;;  %v3426_v28 = vrot.slane %v8366_v6, 1  ;;  %v4349_v3 = vrot.slane %v4347_v40, 1  ;;  %v4352_v7 = vrot.slane %v4350_v8, 2  ;;  %v3905_v59 = vrot.slane %v8397_v50, 1 }
 0x1fc   : > { %10837 = vst [vmem:[#allocation13_spill] sm:$0xff] %v9927_v22  ;;  %v2997_v38 = vsel %vm2849_vm0, %v2992_v9, %v2996_v21  ;;  %v5408_v14 = vsel %vm4940_vm1, %v5405_v46, %v5407_v39  ;;  %v9942_v27 = vpop.f32.mrf.mxu0  ;;  %v4361_v21 = vor.u32 %v4360_v37, %v4357_v16  ;;  %vm4345_vm2 = vsmask.f32 6400 }
 0x1fd   : > { %10838 = vst [vmem:[#allocation14_spill] sm:$0xff] %v9933_v30  ;;  %v3427_v29 = vsel %vm3422_vm8, %v3424_v47, %v3426_v28  ;;  %v4353_v9 = vor.u32 %v4352_v7, %v4349_v3  ;;  %v3906_v33 = vsel %vm3422_vm8, %v3903_v18, %v3905_v59  ;;  %v5409_v6 = vrot.slane %v8456_v56, 2  ;;  %v8398_v7 = vld [vmem:[#allocation2 + $0x68] sm:$0xff] }
 0x1fe   : > { %7590 = vmatmul.msk.bf16.vlgmr.msrb.gmra.mxu3 %vm2520_vm12, %v3425_v62  ;;  %v3428_v8 = vrot.slane %v8367_v35, 1  ;;  %v4369_v37 = vrot.slane %v4367_v55, 2  ;;  %v3907_v56 = vrot.slane %v8398_v7, 1  ;;  %v8411_v35 = vld [vmem:[#allocation2 + $0x20] sm:$0xff]  ;;  %vm5863_vm9 = vsmask.f32 5376 }
 0x1ff   : > { %vm6458_vm7 = vcmask 1044480  }
 0x200   : > { %v3429_v18 = vsel %vm3422_vm8, %v3426_v28, %v3428_v8  ;;  %v8368_v28 = vld [vmem:[#allocation2 + $0x20] sm:$0xff] }
 0x201   : > { %v9936_v57 = vpop.f32.mrf.mxu1  ;;  %v9939_v2 = vpop.f32.mrf.mxu2 }
 0x202   : > { %10839 = vst [vmem:[#allocation15_spill] sm:$0xff] %v9939_v2 }
 0x204   : > { %7493 = vmatmul.msk.bf16.gmra.mxu2 %vm2520_vm12, %v2997_v38  ;;  %v4362_v38 = vsel %vm4345_vm2, %v4353_v9, %v4361_v21  ;;  %v9953_v47 = vpop.f32.mrf.mxu0 }
 0x206   : > { %7713 = vmatmul.msk.bf16.gmra.mxu1 %vm2520_vm12, %v3904_v54  ;;  %v2644_v43 = vpop.f32.mrf.mxu3 }
 0x209   : > { %8048 = vmatmul.msk.bf16.gmra.mxu0 %vm2520_vm12, %v5408_v14  ;;  %v9946_v62 = vpop.f32.mrf.mxu1  ;;  %v5410_v14 = vsel %vm4940_vm1, %v5407_v39, %v5409_v6 }
 0x20c   : > { %v3140_v12 = vpop.f32.mrf.mxu2 }
 0x20d   : > { %v9949_v46 = vadd.f32 %v3140_v12, %v2639_v19  ;;  %v4364_v19 = vshrl.u32 %v8410_v44, 16 }
 0x20e   : > { %7591 = vmatmul.msk.bf16.gmra.mxu3 %vm2520_vm12, %v3427_v29  ;;  %v9961_v40 = vpop.f32.mrf.mxu3  ;;  %v9968_v29 = vpop.f32.mrf.mxu0 }
 0x20f   : > { %10840 = vst [vmem:[#allocation16_spill] sm:$0xff] %v9949_v46  ;;  %v4366_v16 = vrot.slane %v4364_v19, 1 }
 0x210   : > { %10842 = vst [vmem:[#allocation18_spill] sm:$0xff] %v9961_v40 }
 0x211   : > { %v9956_v54 = vpop.f32.mrf.mxu1  ;;  %v4370_v50 = vor.u32 %v4369_v37, %v4366_v16  ;;  %v4376_v16 = vshll.u32 %v8411_v35, 16  ;;  %v3430_v37 = vrot.slane %v8368_v28, 1  ;;  %v8458_v28 = vld [vmem:[#allocation2 + $0x40] sm:$0xff] }
 0x213   : > { %v4371_v44 = vsel %vm4345_vm2, %v4361_v21, %v4370_v50  ;;  %v4378_v7 = vrot.slane %v4376_v16, 2  ;;  %v8450_v16 = vld [vmem:[%s10781_s3 + $0xb0] sm:$0xff] }
 0x214   : > { %7818 = vmatmul.msk.bf16.vlgmr.msrb.gmra.mxu2 %vm2520_vm12, %v4362_v38  ;;  %v9959_v24 = vpop.f32.mrf.mxu2  ;;  %v8457_v38 = vld [vmem:[#allocation2 + $0x38] sm:$0xff]  ;;  %5061 = vmatpush.bf16.msra.mxu3 %v8450_v16 }
 0x215   : > { %10841 = vst [vmem:[#allocation17_spill] sm:$0xff] %v9959_v24  ;;  %v5411_v19 = vrot.slane %v8457_v38, 2  ;;  %v8400_v16 = vld [vmem:[#allocation2 + $0x78] sm:$0xff] }
 0x216   : > { %7714 = vmatmul.msk.bf16.gmra.mxu1 %vm2520_vm12, %v3906_v33  ;;  %v3908_v33 = vsel %vm3422_vm8, %v3905_v59, %v3907_v56  ;;  %v3431_v59 = vsel %vm3422_vm8, %v3428_v8, %v3430_v37  ;;  %v8516_v8 = vld [vmem:[%s10781_s3 + $0x110] sm:$0xff] }
 0x217   : > { %6579 = vmatpush.bf16.msra.mxu2 %v8516_v8 }
 0x219   : > { %8049 = vmatmul.msk.bf16.gmra.mxu0 %vm2520_vm12, %v5410_v14  ;;  %v9966_v3 = vpop.f32.mrf.mxu1  ;;  %v4373_v14 = vshrl.u32 %v8411_v35, 16 }
 0x21b   : > { %v2649_v39 = vpop.f32.mrf.mxu3  ;;  %v4375_v21 = vrot.slane %v4373_v14, 1  ;;  %v8412_v14 = vld [vmem:[#allocation2 + $0x28] sm:$0xff] }
 0x21d   : > { %v4379_v35 = vor.u32 %v4378_v7, %v4375_v21  ;;  %v5413_v7 = vrot.slane %v8458_v28, 2 }
 0x21e   : > { %7592 = vmatmul.msk.bf16.gmra.mxu3 %vm2520_vm12, %v3429_v18  ;;  %v5412_v18 = vsel %vm4940_vm1, %v5409_v6, %v5411_v19 }
 0x21f   : > { %v4380_v6 = vsel %vm4345_vm2, %v4370_v50, %v4379_v35  ;;  %v4382_v50 = vshrl.u32 %v8412_v14, 16 }
 0x221   : > { %v3145_v12 = vpop.f32.mrf.mxu2  ;;  %v9976_v55 = vpop.f32.mrf.mxu1  ;;  %v4384_v2 = vrot.slane %v4382_v50, 1  ;;  %v8413_v50 = vld [vmem:[#allocation2 + $0x30] sm:$0xff] }
 0x222   : > { %v9971_v9 = vadd.f32 %v3145_v12, %v2644_v43  ;;  %v9979_v43 = vpop.f32.mrf.mxu0 }
 0x223   : > { %v9983_v12 = vpop.f32.mrf.mxu3 }
 0x224   : > { %10843 = vst [vmem:[#allocation19_spill] sm:$0xff] %v9971_v9  ;;  %7819 = vmatmul.msk.bf16.gmra.mxu2 %vm2520_vm12, %v4371_v44  ;;  %v5414_v9 = vsel %vm4940_vm1, %v5411_v19, %v5413_v7 }
 0x225   : > { %10844 = vst [vmem:[#allocation20_spill] sm:$0xff] %v9983_v12 }
 0x226   : > { %7715 = vmatmul.msk.bf16.gmra.mxu1 %vm2520_vm12, %v3908_v33  ;;  %v8399_v33 = vld [vmem:[#allocation2 + $0x70] sm:$0xff] }
 0x227   : > { %v3909_v40 = vrot.slane %v8399_v33, 1 }
 0x229   : > { %8050 = vmatmul.msk.bf16.gmra.mxu0 %vm2520_vm12, %v5412_v18  ;;  %v9985_v44 = vpop.f32.mrf.mxu2  ;;  %v9988_v38 = vpop.f32.mrf.mxu1  ;;  %v8369_v18 = vld [vmem:[#allocation2 + $0x28] sm:$0xff]  ;;  %v3910_v21 = vsel %vm3422_vm8, %v3907_v56, %v3909_v40 }
 0x22a   : > { %10845 = vst [vmem:[#allocation21_spill] sm:$0xff] %v9985_v44  ;;  %v9991_v24 = vpop.f32.mrf.mxu0  ;;  %v3432_v30 = vrot.slane %v8369_v18, 1  ;;  %v8459_v18 = vld [vmem:[#allocation2 + $0x48] sm:$0xff] }
 0x22c   : > { %v3433_v36 = vsel %vm3422_vm8, %v3430_v37, %v3432_v30  ;;  %v8370_v37 = vld [vmem:[#allocation2 + $0x30] sm:$0xff] }
 0x22d   : > { %v3434_v46 = vrot.slane %v8370_v37, 1 }
 0x22e   : > { %7593 = vmatmul.msk.bf16.gmra.mxu3 %vm2520_vm12, %v3431_v59 }
 0x230   : > { %v2654_v59 = vpop.f32.mrf.mxu3 }
 0x231   : > { %v10002_v33 = vpop.f32.mrf.mxu1 }
 0x232   : > { %v10009_v28 = vpop.f32.mrf.mxu0 }
 0x234   : > { %7820 = vmatmul.msk.bf16.gmra.mxu2 %vm2520_vm12, %v4380_v6  ;;  %v4385_v6 = vshll.u32 %v8412_v14, 16 }
 0x236   : > { %7716 = vmatmul.msk.bf16.gmra.mxu1 %vm2520_vm12, %v3910_v21  ;;  %v3150_v12 = vpop.f32.mrf.mxu2  ;;  %v4387_v56 = vrot.slane %v4385_v6, 2 }
 0x237   : > { %v10005_v44 = vadd.f32 %v3150_v12, %v2649_v39  ;;  %v8494_v39 = vld [vmem:[%s10781_s3 + $0xf0] sm:$0xff] }
 0x238   : > { %v4388_v8 = vor.u32 %v4387_v56, %v4384_v2  ;;  %v2656_v12 = vpop.f32.mrf.mxu3  ;;  %6117 = vmatpush.bf16.msra.mxu1 %v8494_v39  ;;  %v5415_v2 = vrot.slane %v8459_v18, 2  ;;  %v4391_v56 = vshrl.u32 %v8413_v50, 16  ;;  %v8401_v18 = vld [vmem:[#allocation2 + $0x80] sm:$0xff] }
 0x239   : > { %10846 = vst [vmem:[#allocation22_spill] sm:$0xff] %v10005_v44  ;;  %8051 = vmatmul.msk.bf16.gmra.mxu0 %vm2520_vm12, %v5414_v9  ;;  %v3911_v9 = vrot.slane %v8400_v16, 1  ;;  %v4394_v44 = vshll.u32 %v8413_v50, 16  ;;  %v3913_v37 = vrot.slane %v8401_v18, 1 }
 0x23a   : > { %v4389_v21 = vsel %vm4345_vm2, %v4379_v35, %v4388_v8  ;;  %v10023_v6 = vpop.f32.mrf.mxu0  ;;  %v5416_v39 = vsel %vm4940_vm1, %v5413_v7, %v5415_v2  ;;  %v4393_v35 = vrot.slane %v4391_v56, 1  ;;  %v8460_v7 = vld [vmem:[#allocation2 + $0x50] sm:$0xff] }
 0x23b   : > { %v10016_v14 = vpop.f32.mrf.mxu1 }
 0x23e   : > { %7594 = vmatmul.msk.bf16.gmra.mxu3 %vm2520_vm12, %v3433_v36  ;;  %v10018_v19 = vpop.f32.mrf.mxu2  ;;  %v3912_v36 = vsel %vm3422_vm8, %v3909_v40, %v3911_v9  ;;  %v3435_v40 = vsel %vm3422_vm8, %v3432_v30, %v3434_v46  ;;  %v8371_v30 = vld [vmem:[#allocation2 + $0x38] sm:$0xff] }
 0x23f   : > { %10847 = vst [vmem:[#allocation23_spill] sm:$0xff] %v10018_v19 }
 0x242   : > { %v10034_v50 = vpop.f32.mrf.mxu0 }
 0x243   : > { %v10027_v19 = vpop.f32.mrf.mxu1 }
 0x244   : > { %7821 = vmatmul.msk.bf16.gmra.mxu2 %vm2520_vm12, %v4389_v21  ;;  %10848 = vst [vmem:[#allocation24_spill] sm:$0xff] %v10027_v19  ;;  %v4396_v21 = vrot.slane %v4394_v44, 2 }
 0x246   : > { %7717 = vmatmul.msk.bf16.gmra.mxu1 %vm2520_vm12, %v3912_v36  ;;  %v2659_v16 = vpop.f32.mrf.mxu3  ;;  %v4397_v36 = vor.u32 %v4396_v21, %v4393_v35  ;;  %v4400_v35 = vshrl.u32 %v8414_v48, 16  ;;  %v4403_v21 = vshll.u32 %v8414_v48, 16 }
 0x248   : > { %v4398_v31 = vsel %vm4345_vm2, %v4388_v8, %v4397_v36 }
 0x249   : > { %8052 = vmatmul.msk.bf16.gmra.mxu0 %vm2520_vm12, %v5416_v39  ;;  %v5417_v39 = vrot.slane %v8460_v7, 2 }
 0x24a   : > { %v10045_v18 = vpop.f32.mrf.mxu0 }
 0x24b   : > { %v5418_v8 = vsel %vm4940_vm1, %v5415_v2, %v5417_v39 }
 0x24c   : > { %v3155_v22 = vpop.f32.mrf.mxu2 }
 0x24d   : > { %v10030_v49 = vadd.f32 %v3155_v22, %v2654_v59  ;;  %v3914_v59 = vsel %vm3422_vm8, %v3911_v9, %v3913_v37  ;;  %v8402_v9 = vld [vmem:[#allocation2 + $0x88] sm:$0xff] }
 0x24e   : > { %7595 = vmatmul.msk.bf16.gmra.mxu3 %vm2520_vm12, %v3435_v40  ;;  %v2661_v44 = vpop.f32.mrf.mxu3  ;;  %v3436_v40 = vrot.slane %v8371_v30, 1  ;;  %v3915_v48 = vrot.slane %v8402_v9, 1  ;;  %v8461_v30 = vld [vmem:[#allocation2 + $0x58] sm:$0xff] }
 0x24f   : > { %10849 = vst [vmem:[#allocation25_spill] sm:$0xff] %v10030_v49  ;;  %v4405_v49 = vrot.slane %v4403_v21, 2 }
 0x252   : > { %v10058_v21 = vpop.f32.mrf.mxu0 }
 0x253   : > { %v10038_v56 = vpop.f32.mrf.mxu1 }
 0x254   : > { %v3157_v1 = vpop.f32.mrf.mxu2  ;;  %7822 = vmatmul.msk.bf16.gmra.mxu2 %vm2520_vm12, %v4398_v31  ;;  %10850 = vst [vmem:[#allocation26_spill] sm:$0xff] %v10038_v56  ;;  %v4402_v31 = vrot.slane %v4400_v35, 1  ;;  %v10072_v56 = vld [vmem:[#allocation2 + $0x60] sm:$0xff] }
 0x255   : > { %v10040_v22 = vadd.f32 %v3157_v1, %v2656_v12  ;;  %v3437_v1 = vsel %vm3422_vm8, %v3434_v46, %v3436_v40  ;;  %v8372_v46 = vld [vmem:[#allocation2 + $0x40] sm:$0xff] }
 0x256   : > { %7718 = vmatmul.msk.bf16.gmra.mxu1 %vm2520_vm12, %v3914_v59  ;;  %v4406_v7 = vor.u32 %v4405_v49, %v4402_v31  ;;  %v4409_v49 = vshrl.u32 %v8415_v11, 16  ;;  %v4412_v31 = vshll.u32 %v8415_v11, 16 }
 0x257   : > { %10851 = vst [vmem:[#allocation27_spill] sm:$0xff] %v10040_v22 }
 0x258   : > { %v4407_v2 = vsel %vm4345_vm2, %v4397_v36, %v4406_v7  ;;  %v3438_v36 = vrot.slane %v8372_v46, 1 }
 0x259   : > { %8053 = vmatmul.msk.bf16.gmra.mxu0 %vm2520_vm12, %v5418_v8  ;;  %v3916_v8 = vsel %vm3422_vm8, %v3913_v37, %v3915_v48 }
 0x25a   : > { %v3439_v37 = vsel %vm3422_vm8, %v3436_v40, %v3438_v36  ;;  %v10069_v63 = vpop.f32.mrf.mxu0 }
 0x25b   : > { %v10048_v25 = vpop.f32.mrf.mxu1 }
 0x25c   : > { %10852 = vst [vmem:[#allocation28_spill] sm:$0xff] %v10048_v25  ;;  %v2664_v12 = vpop.f32.mrf.mxu3  ;;  %v5419_v25 = vrot.slane %v8461_v30, 2  ;;  %v8403_v30 = vld [vmem:[#allocation2 + $0x90] sm:$0xff] }
 0x25d   : > { %v3917_v46 = vrot.slane %v8403_v30, 1 }
 0x25e   : > { %7596 = vmatmul.msk.bf16.gmra.mxu3 %vm2520_vm12, %v3437_v1 }
 0x25f   : > { %v3918_v40 = vsel %vm3422_vm8, %v3915_v48, %v3917_v46 }
 0x262   : > { %v3160_v59 = vpop.f32.mrf.mxu2 }
 0x263   : > { %v10053_v22 = vadd.f32 %v3160_v59, %v2659_v16  ;;  %v10056_v35 = vpop.f32.mrf.mxu1  ;;  %v5420_v16 = vsel %vm4940_vm1, %v5417_v39, %v5419_v25  ;;  %v8416_v39 = vld [vmem:[#allocation2 + $0x48] sm:$0xff] }
 0x264   : > { %7823 = vmatmul.msk.bf16.gmra.mxu2 %vm2520_vm12, %v4407_v2  ;;  %10854 = vst [vmem:[#allocation30_spill] sm:$0xff] %v10056_v35  ;;  %v2666_v1 = vpop.f32.mrf.mxu3  ;;  %v4411_v2 = vrot.slane %v4409_v49, 1 }
 0x265   : > { %10853 = vst [vmem:[#allocation29_spill] sm:$0xff] %v10053_v22  ;;  %v4414_v22 = vrot.slane %v4412_v31, 2  ;;  %v10078_v31 = vld [vmem:[#allocation2 + $0x48] sm:$0xff] }
 0x266   : > { %7719 = vmatmul.msk.bf16.gmra.mxu1 %vm2520_vm12, %v3916_v8 }
 0x267   : > { %v4415_v11 = vor.u32 %v4414_v22, %v4411_v2  ;;  %v4418_v22 = vshrl.u32 %v8416_v39, 16  ;;  %v4421_v2 = vshll.u32 %v8416_v39, 16 }
 0x269   : > { %8054 = vmatmul.msk.bf16.gmra.mxu0 %vm2520_vm12, %v5420_v16  ;;  %v4423_v39 = vrot.slane %v4421_v2, 2 }
 0x26a   : > { %v3162_v9 = vpop.f32.mrf.mxu2 }
 0x26b   : > { %v10063_v59 = vadd.f32 %v3162_v9, %v2661_v44  ;;  %v10066_v35 = vpop.f32.mrf.mxu1  ;;  %v4416_v44 = vsel %vm4345_vm2, %v4406_v7, %v4415_v11  ;;  %v5421_v9 = vrot.slane %v10072_v56, 2  ;;  %v8493_v7 = vld [vmem:[%s10781_s3 + $0xe8] sm:$0xff] }
 0x26c   : > { %10856 = vst [vmem:[#allocation32_spill] sm:$0xff] %v10066_v35  ;;  %6118 = vmatpush.bf16.msra.mxu1 %v8493_v7  ;;  %v3211_v7 = vadd.f32 %v9869_v10, %v9225_v23  ;;  %v10118_v23 = vld [vmem:[#allocation2 + $0x50] sm:$0xff] }
 0x26d   : > { %10855 = vst [vmem:[#allocation31_spill] sm:$0xff] %v10063_v59  ;;  %v5422_v48 = vsel %vm4940_vm1, %v5419_v25, %v5421_v9 }
 0x26e   : > { %7597 = vmatmul.msk.bf16.gmra.mxu3 %vm2520_vm12, %v3439_v37  ;;  %v3781_v37 = vld [vmem:[#allocation2 + $0x98] sm:$0x1] }
 0x26f   : > { %v3864_v56 = vunpack.c.l.b16 %v3781_v37 }
 0x271   : > { %v2669_v8 = vpop.f32.mrf.mxu3  ;;  %v3883_v25 = vpack.c.b16 %v3864_v56, %v3864_v56  ;;  %v8417_v56 = vld [vmem:[#allocation2 + $0x50] sm:$0xff] }
 0x273   : > { %v10076_v49 = vpop.f32.mrf.mxu1  ;;  %v3919_v35 = vrot.slane %v3883_v25, 1 }
 0x274   : > { %7824 = vmatmul.msk.bf16.gmra.mxu2 %vm2520_vm12, %v4416_v44  ;;  %10857 = vst [vmem:[#allocation33_spill] sm:$0xff] %v10076_v49  ;;  %v10088_v44 = vpop.f32.mrf.mxu0  ;;  %v3440_v49 = vrot.slane %v10078_v31, 1 }
 0x275   : > { %10859 = vst [vmem:[#allocation35_spill] sm:$0xff] %v10088_v44  ;;  %v10107_v44 = vld [vmem:[#allocation2 + $0x68] sm:$0xff]  ;;  %v3920_v10 = vsel %vm3422_vm8, %v3917_v46, %v3919_v35 }
 0x276   : > { %7720 = vmatmul.msk.bf16.gmra.mxu1 %vm2520_vm12, %v3918_v40  ;;  %v4420_v40 = vrot.slane %v4418_v22, 1  ;;  %v3441_v31 = vsel %vm3422_vm8, %v3438_v36, %v3440_v49 }
 0x277   : > { %v3165_v16 = vpop.f32.mrf.mxu2 }
 0x278   : > { %v10083_v30 = vadd.f32 %v3165_v16, %v2664_v12  ;;  %v8492_v12 = vld [vmem:[%s10781_s3 + $0xe0] sm:$0xff]  ;;  %v8449_v16 = vld [vmem:[%s10781_s3 + $0xa8] sm:$0xff]  ;;  %v4424_v22 = vor.u32 %v4423_v39, %v4420_v40  ;;  %v8474_v39 = vld [vmem:[#allocation2 + $0x10] sm:$0xf0] }
 0x279   : > { %v2671_v59 = vpop.f32.mrf.mxu3  ;;  %8055 = vmatmul.msk.bf16.gmra.mxu0 %vm2520_vm12, %v5422_v48  ;;  %5062 = vmatpush.bf16.msra.mxu3 %v8449_v16 }
 0x27a   : > { %10858 = vst [vmem:[#allocation34_spill] sm:$0xff] %v10083_v30  ;;  %6119 = vmatpush.bf16.msra.mxu1 %v8492_v12  ;;  %v4425_v36 = vsel %vm4345_vm2, %v4415_v11, %v4424_v22  ;;  %v5423_v12 = vrot.slane %v10107_v44, 2  ;;  %v4427_v11 = vshrl.u32 %v8417_v56, 16 }
 0x27b   : > { %v10099_v30 = vpop.f32.mrf.mxu1 }
 0x27c   : > { %10860 = vst [vmem:[#allocation36_spill] sm:$0xff] %v10099_v30  ;;  %v10109_v41 = vpop.f32.mrf.mxu0  ;;  %v5424_v30 = vsel %vm4940_vm1, %v5421_v9, %v5423_v12  ;;  %v4429_v46 = vrot.slane %v4427_v11, 1  ;;  %v3213_v11 = vadd.f32 %v9929_v26, %v9288_v4 }
 0x27d   : > { %10862 = vst [vmem:[#allocation38_spill] sm:$0xff] %v10109_v41 }
 0x27e   : > { %7598 = vmatmul.msk.bf16.gmra.mxu3 %vm2520_vm12, %v3441_v31  ;;  %v8475_v31 = vld [vmem:[#allocation2 + $0x18] sm:$0xff] }
 0x27f   : > { %v3167_v37 = vpop.f32.mrf.mxu2  ;;  %v5873_v41 = vshrl.u32 %v8475_v31, 16  ;;  %v5876_v35 = vshll.u32 %v8475_v31, 16 }
 0x280   : > { %v10103_v2 = vadd.f32 %v3167_v37, %v2666_v1  ;;  %v8515_v1 = vld [vmem:[%s10781_s3 + $0x108] sm:$0xff]  ;;  %v4430_v37 = vshll.u32 %v8417_v56, 16 }
 0x281   : > { %v3547_v48 = vpop.f32.mrf.mxu3  ;;  %6580 = vmatpush.bf16.msra.mxu2 %v8515_v1 }
 0x282   : > { %10861 = vst [vmem:[#allocation37_spill] sm:$0xff] %v10103_v2  ;;  %v3673_v16 = vadd.f32 %v3547_v48, %v3211_v7  ;;  %v8074_v7 = vld [vmem:[#allocation2 + $0x10] sm:$0xc]  ;;  %v4432_v44 = vrot.slane %v4430_v37, 2 }
 0x283   : > { %v10116_v40 = vpop.f32.mrf.mxu1 }
 0x284   : > { %7825 = vmatmul.msk.bf16.gmra.mxu2 %vm2520_vm12, %v4425_v36  ;;  %10863 = vst [vmem:[#allocation39_spill] sm:$0xff] %v10116_v40  ;;  %v8075_v36 = vor.u32 %v8474_v39, %v8074_v7  ;;  %v3442_v40 = vrot.slane %v10118_v23, 1  ;;  %v4433_v9 = vor.u32 %v4432_v44, %v4429_v46  ;;  %v8476_v46 = vld [vmem:[#allocation2 + $0x20] sm:$0xff]  ;;  %v8375_v44 = vld [vmem:[#allocation2 + $0x58] sm:$0xff] }
 0x286   : > { %7721 = vmatmul.msk.bf16.gmra.mxu1 %vm2520_vm12, %v3920_v10  ;;  %v5865_v1 = vshrl.u32 %v8075_v36, 16  ;;  %v5868_v19 = vshll.u32 %v8075_v36, 16  ;;  %v10128_v10 = vpop.f32.mrf.mxu0  ;;  %v3443_v56 = vsel %vm3422_vm8, %v3440_v49, %v3442_v40 }
 0x287   : > { %v3170_v25 = vpop.f32.mrf.mxu2  ;;  %10864 = vst [vmem:[#allocation40_spill] sm:$0xff] %v10128_v10  ;;  %v10138_v10 = vld [vmem:[#allocation2 + $0x70] sm:$0xff] }
 0x288   : > { %v10123_v48 = vadd.f32 %v3170_v25, %v2669_v8  ;;  %v5875_v8 = vrot.slane %v5873_v41, 2  ;;  %v5878_v25 = vrot.slane %v5876_v35, 3  ;;  %v5867_v31 = vrot.slane %v5865_v1, 2  ;;  %v8418_v35 = vld [vmem:[#allocation2 + $0x58] sm:$0xff] }
 0x289   : > { %v3549_v2 = vpop.f32.mrf.mxu3  ;;  %8056 = vmatmul.msk.bf16.gmra.mxu0 %vm2520_vm12, %v5424_v30  ;;  %v5870_v30 = vrot.slane %v5868_v19, 3  ;;  %v4434_v41 = vsel %vm4345_vm2, %v4424_v22, %v4433_v9  ;;  %v5425_v4 = vrot.slane %v10138_v10, 2  ;;  %v4439_v22 = vshll.u32 %v8418_v35, 16 }
 0x28a   : > { %v5879_v36 = vor.u32 %v5878_v25, %v5875_v8  ;;  %v4436_v8 = vshrl.u32 %v8418_v35, 16  ;;  %v3212_v25 = vadd.f32 %v9906_v42, %v9261_v17 }
 0x28b   : > { %v10132_v23 = vpop.f32.mrf.mxu1  ;;  %v5426_v10 = vsel %vm4940_vm1, %v5423_v12, %v5425_v4  ;;  %v3215_v12 = vadd.f32 %v9953_v47, %v9346_v34 }
 0x28e   : > { %7599 = vmatmul.msk.bf16.gmra.mxu3 %vm2520_vm12, %v3443_v56  ;;  %v5871_v56 = vor.u32 %v5870_v30, %v5867_v31  ;;  %v10145_v26 = vpop.f32.mrf.mxu0 }
 0x28f   : > { %v3172_v39 = vpop.f32.mrf.mxu2 }
 0x290   : > { %v10134_v7 = vadd.f32 %v3172_v39, %v2671_v59  ;;  %v4134_v59 = vadd.f32 %v9873_v45, %v3673_v16  ;;  %v5880_v19 = vsel %vm5863_vm9, %v5871_v56, %v5879_v36  ;;  %v5882_v45 = vshrl.u32 %v8476_v46, 16 }
 0x291   : > { %v3552_v37 = vpop.f32.mrf.mxu3  ;;  %v3674_v16 = vadd.f32 %v3549_v2, %v3212_v25  ;;  %v4441_v56 = vrot.slane %v4439_v22, 2  ;;  %v10165_v22 = vld [vmem:[#allocation2 + $0x78] sm:$0xff] }
 0x292   : > { %v3675_v49 = vadd.f32 %v3552_v37, %v3213_v11  ;;  %v3444_v11 = vrot.slane %v8375_v44, 1  ;;  %v5885_v37 = vshll.u32 %v8476_v46, 16  ;;  %v5884_v17 = vrot.slane %v5882_v45, 2  ;;  %v8419_v45 = vld [vmem:[#allocation2 + $0x60] sm:$0xff] }
 0x293   : > { %v10152_v31 = vpop.f32.mrf.mxu1  ;;  %v5427_v47 = vrot.slane %v10165_v22, 2 }
 0x294   : > { %7826 = vmatmul.msk.bf16.gmra.mxu2 %vm2520_vm12, %v4434_v41  ;;  %v4438_v41 = vrot.slane %v4436_v8, 1  ;;  %v3445_v35 = vsel %vm3422_vm8, %v3442_v40, %v3444_v11  ;;  %v5887_v42 = vrot.slane %v5885_v37, 3  ;;  %v8376_v37 = vld [vmem:[#allocation2 + $0x60] sm:$0xff] }
 0x296   : > { %8160 = vmatmul.msk.bf16.vlgmr.msra.gmra.mxu1 %vm2520_vm12, %v5880_v19  ;;  %v4135_v19 = vadd.f32 %v9904_v0, %v3674_v16  ;;  %v10163_v46 = vpop.f32.mrf.mxu0  ;;  %v5888_v8 = vor.u32 %v5887_v42, %v5884_v17  ;;  %v8477_v16 = vld [vmem:[#allocation2 + $0x28] sm:$0xff] }
 0x297   : > { %v4603_v1 = vpop.f32.mrf.mxu2  ;;  %v5891_v17 = vshrl.u32 %v8477_v16, 16 }
 0x298   : > { %v10150_v39 = vadd.f32 %v4603_v1, %v4134_v59  ;;  %v4442_v1 = vor.u32 %v4441_v56, %v4438_v41  ;;  %v5889_v34 = vsel %vm5863_vm9, %v5879_v36, %v5888_v8  ;;  %v4445_v56 = vshrl.u32 %v8419_v45, 16 }
 0x299   : > { %v3554_v30 = vpop.f32.mrf.mxu3  ;;  %8057 = vmatmul.msk.bf16.gmra.mxu0 %vm2520_vm12, %v5426_v10  ;;  %v4136_v10 = vadd.f32 %v9922_v58, %v3675_v49  ;;  %v5428_v58 = vsel %vm4940_vm1, %v5425_v4, %v5427_v47  ;;  %v5894_v49 = vshll.u32 %v8477_v16, 16  ;;  %v3217_v16 = vadd.f32 %v9979_v43, %v9412_v13 }
 0x29a   : > { %v4443_v0 = vsel %vm4345_vm2, %v4433_v9, %v4442_v1 }
 0x29b   : > { %v10167_v25 = vpop.f32.mrf.mxu1 }
 0x29e   : > { %7600 = vmatmul.msk.bf16.gmra.mxu3 %vm2520_vm12, %v3445_v35  ;;  %v4448_v35 = vshll.u32 %v8419_v45, 16  ;;  %v10180_v36 = vpop.f32.mrf.mxu0 }
 0x29f   : > { %v4605_v59 = vpop.f32.mrf.mxu2 }
 0x2a0   : > { %v10159_v2 = vadd.f32 %v4605_v59, %v4135_v19  ;;  %v3214_v19 = vadd.f32 %v9942_v27, %v9319_v52  ;;  %v4450_v22 = vrot.slane %v4448_v35, 2  ;;  %v5893_v27 = vrot.slane %v5891_v17, 2  ;;  %v8478_v17 = vld [vmem:[#allocation2 + $0x30] sm:$0xff] }
 0x2a1   : > { %v3557_v44 = vpop.f32.mrf.mxu3 }
 0x2a2   : > { %v3677_v40 = vadd.f32 %v3557_v44, %v3215_v12  ;;  %v3676_v42 = vadd.f32 %v3554_v30, %v3214_v19  ;;  %v3446_v12 = vrot.slane %v8376_v37, 1  ;;  %v4447_v44 = vrot.slane %v4445_v56, 1  ;;  %v10192_v56 = vld [vmem:[#allocation2 + $0x80] sm:$0xff]  ;;  %v8420_v19 = vld [vmem:[#allocation2 + $0x68] sm:$0xff] }
 0x2a3   : > { %v5429_v13 = vrot.slane %v10192_v56, 2 }
 0x2a4   : > { %7827 = vmatmul.msk.bf16.gmra.mxu2 %vm2520_vm12, %v4443_v0  ;;  %v10183_v0 = vpop.f32.mrf.mxu1  ;;  %v3447_v45 = vsel %vm3422_vm8, %v3444_v11, %v3446_v12  ;;  %v4137_v52 = vadd.f32 %v9936_v57, %v3676_v42  ;;  %v4451_v37 = vor.u32 %v4450_v22, %v4447_v44  ;;  %v4138_v42 = vadd.f32 %v9946_v62, %v3677_v40 }
 0x2a5   : > { %v4457_v22 = vshll.u32 %v8420_v19, 16 }
 0x2a6   : > { %8161 = vmatmul.msk.bf16.gmra.mxu1 %vm2520_vm12, %v5889_v34  ;;  %v4452_v11 = vsel %vm4345_vm2, %v4442_v1, %v4451_v37  ;;  %v10196_v57 = vpop.f32.mrf.mxu0  ;;  %v4454_v1 = vshrl.u32 %v8420_v19, 16 }
 0x2a7   : > { %v4608_v41 = vpop.f32.mrf.mxu2 }
 0x2a8   : > { %v10177_v9 = vadd.f32 %v4608_v41, %v4136_v10  ;;  %v5896_v10 = vrot.slane %v5894_v49, 3 }
 0x2a9   : > { %v3559_v59 = vpop.f32.mrf.mxu3  ;;  %8058 = vmatmul.msk.bf16.gmra.mxu0 %vm2520_vm12, %v5428_v58  ;;  %v10199_v58 = vld [vmem:[#allocation2 + $0x68] sm:$0xff] }
 0x2aa   : > { %v5897_v41 = vor.u32 %v5896_v10, %v5893_v27  ;;  %v5900_v27 = vshrl.u32 %v8478_v17, 16  ;;  %v3448_v10 = vrot.slane %v10199_v58, 1 }
 0x2ac   : > { %v5898_v49 = vsel %vm5863_vm9, %v5888_v8, %v5897_v41  ;;  %v10203_v43 = vpop.f32.mrf.mxu1  ;;  %v5430_v8 = vsel %vm4940_vm1, %v5427_v47, %v5429_v13  ;;  %v3449_v56 = vsel %vm3422_vm8, %v3446_v12, %v3448_v10  ;;  %v5902_v19 = vrot.slane %v5900_v27, 2  ;;  %v10224_v12 = vld [vmem:[#allocation2 + $0x88] sm:$0xff]  ;;  %v8479_v27 = vld [vmem:[#allocation2 + $0x38] sm:$0xff] }
 0x2ad   : > { %v3219_v47 = vadd.f32 %v10009_v28, %v9476_v61  ;;  %v10232_v61 = vld [vmem:[#allocation2 + $0x70] sm:$0xff] }
 0x2ae   : > { %7601 = vmatmul.msk.bf16.gmra.mxu3 %vm2520_vm12, %v3447_v45  ;;  %v3216_v45 = vadd.f32 %v9968_v29, %v9385_v20  ;;  %v10215_v29 = vpop.f32.mrf.mxu0 }
 0x2af   : > { %v4610_v30 = vpop.f32.mrf.mxu2 }
 0x2b0   : > { %v10188_v4 = vadd.f32 %v4610_v30, %v4137_v52  ;;  %v3678_v62 = vadd.f32 %v3559_v59, %v3216_v45  ;;  %v5903_v30 = vshll.u32 %v8478_v17, 16  ;;  %v8448_v45 = vld [vmem:[%s10781_s3 + $0xa0] sm:$0xff] }
 0x2b1   : > { %v3562_v34 = vpop.f32.mrf.mxu3  ;;  %5063 = vmatpush.bf16.msra.mxu3 %v8448_v45 }
 0x2b2   : > { %v3679_v35 = vadd.f32 %v3562_v34, %v3217_v16  ;;  %v4456_v16 = vrot.slane %v4454_v1, 1  ;;  %v4459_v34 = vrot.slane %v4457_v22, 2  ;;  %v5905_v20 = vrot.slane %v5903_v30, 3  ;;  %v8421_v22 = vld [vmem:[#allocation2 + $0x70] sm:$0xff] }
 0x2b4   : > { %7828 = vmatmul.msk.bf16.gmra.mxu2 %vm2520_vm12, %v4452_v11  ;;  %v4139_v11 = vadd.f32 %v9956_v54, %v3678_v62  ;;  %v10222_v17 = vpop.f32.mrf.mxu1  ;;  %v4140_v62 = vadd.f32 %v9966_v3, %v3679_v35  ;;  %v5909_v3 = vshrl.u32 %v8479_v27, 16 }
 0x2b6   : > { %8162 = vmatmul.msk.bf16.gmra.mxu1 %vm2520_vm12, %v5898_v49 }
 0x2b7   : > { %v4613_v44 = vpop.f32.mrf.mxu2 }
 0x2b8   : > { %v10208_v52 = vadd.f32 %v4613_v44, %v4138_v42  ;;  %v4460_v42 = vor.u32 %v4459_v34, %v4456_v16  ;;  %v5906_v44 = vor.u32 %v5905_v20, %v5902_v19  ;;  %v4466_v16 = vshll.u32 %v8421_v22, 16 }
 0x2b9   : > { %v3564_v40 = vpop.f32.mrf.mxu3  ;;  %8059 = vmatmul.msk.bf16.gmra.mxu0 %vm2520_vm12, %v5430_v8  ;;  %v5431_v8 = vrot.slane %v10224_v12, 2  ;;  %v3218_v34 = vadd.f32 %v9991_v24, %v9446_v5  ;;  %v8514_v5 = vld [vmem:[%s10781_s3 + $0x100] sm:$0xff] }
 0x2ba   : > { %v4461_v1 = vsel %vm4345_vm2, %v4451_v37, %v4460_v42  ;;  %v5907_v28 = vsel %vm5863_vm9, %v5897_v41, %v5906_v44  ;;  %v4463_v37 = vshrl.u32 %v8421_v22, 16  ;;  %v3450_v41 = vrot.slane %v10232_v61, 1  ;;  %6581 = vmatpush.bf16.msra.mxu2 %v8514_v5 }
 0x2bb   : > { %v3680_v35 = vadd.f32 %v3564_v40, %v3218_v34  ;;  %v5432_v20 = vsel %vm4940_vm1, %v5429_v13, %v5431_v8  ;;  %v4468_v12 = vrot.slane %v4466_v16, 2  ;;  %v8422_v16 = vld [vmem:[#allocation2 + $0x78] sm:$0xff] }
 0x2bc   : > { %v3451_v24 = vsel %vm3422_vm8, %v3448_v10, %v3450_v41 }
 0x2bd   : > { %v4141_v40 = vadd.f32 %v9976_v55, %v3680_v35 }
 0x2be   : > { %7602 = vmatmul.msk.bf16.gmra.mxu3 %vm2520_vm12, %v3449_v56 }
 0x2bf   : > { %v4615_v59 = vpop.f32.mrf.mxu2 }
 0x2c0   : > { %v10218_v58 = vadd.f32 %v4615_v59, %v4139_v11  ;;  %v10241_v11 = vpop.f32.mrf.mxu0  ;;  %v5912_v59 = vshll.u32 %v8479_v27, 16 }
 0x2c1   : > { %v3567_v49 = vpop.f32.mrf.mxu3 }
 0x2c2   : > { %v3681_v54 = vadd.f32 %v3567_v49, %v3219_v47  ;;  %v10245_v47 = vpop.f32.mrf.mxu1  ;;  %v4465_v49 = vrot.slane %v4463_v37, 1  ;;  %v5914_v22 = vrot.slane %v5912_v59, 3 }
 0x2c4   : > { %7829 = vmatmul.msk.bf16.gmra.mxu2 %vm2520_vm12, %v4461_v1  ;;  %v5911_v1 = vrot.slane %v5909_v3, 2  ;;  %v4469_v45 = vor.u32 %v4468_v12, %v4465_v49  ;;  %v8480_v3 = vld [vmem:[#allocation2 + $0x40] sm:$0xff]  ;;  %v4142_v35 = vadd.f32 %v9988_v38, %v3681_v54  ;;  %v4472_v49 = vshrl.u32 %v8422_v16, 16 }
 0x2c5   : > { %v4475_v12 = vshll.u32 %v8422_v16, 16 }
 0x2c6   : > { %8163 = vmatmul.msk.bf16.gmra.mxu1 %vm2520_vm12, %v5907_v28  ;;  %v5915_v28 = vor.u32 %v5914_v22, %v5911_v1  ;;  %v4470_v55 = vsel %vm4345_vm2, %v4460_v42, %v4469_v45  ;;  %v3220_v42 = vadd.f32 %v10023_v6, %v9517_v51  ;;  %v4474_v22 = vrot.slane %v4472_v49, 1  ;;  %v8481_v49 = vld [vmem:[#allocation2 + $0x48] sm:$0xff] }
 0x2c7   : > { %v4618_v30 = vpop.f32.mrf.mxu2 }
 0x2c8   : > { %v10239_v56 = vadd.f32 %v4618_v30, %v4140_v62  ;;  %v3221_v62 = vadd.f32 %v10034_v50, %v9546_v15  ;;  %v10258_v30 = vld [vmem:[#allocation2 + $0x90] sm:$0xff]  ;;  %v10260_v37 = vpop.f32.mrf.mxu0  ;;  %v5916_v15 = vsel %vm5863_vm9, %v5906_v44, %v5915_v28  ;;  %v5921_v44 = vshll.u32 %v8480_v3, 16 }
 0x2c9   : > { %v3569_v19 = vpop.f32.mrf.mxu3  ;;  %8060 = vmatmul.msk.bf16.gmra.mxu0 %vm2520_vm12, %v5432_v20  ;;  %v10267_v20 = vld [vmem:[#allocation2 + $0x78] sm:$0xff]  ;;  %v5433_v50 = vrot.slane %v10258_v30, 2 }
 0x2ca   : > { %v10264_v34 = vpop.f32.mrf.mxu1  ;;  %v3452_v38 = vrot.slane %v10267_v20, 1  ;;  %v5923_v30 = vrot.slane %v5921_v44, 3 }
 0x2cb   : > { %v5434_v54 = vsel %vm4940_vm1, %v5431_v8, %v5433_v50 }
 0x2ce   : > { %7603 = vmatmul.msk.bf16.gmra.mxu3 %vm2520_vm12, %v3451_v24  ;;  %v5918_v24 = vshrl.u32 %v8480_v3, 16  ;;  %v3223_v3 = vadd.f32 %v10058_v21, %v9606_v32 }
 0x2cf   : > { %v4620_v13 = vpop.f32.mrf.mxu2 }
 0x2d0   : > { %v10254_v27 = vadd.f32 %v4620_v13, %v4141_v40  ;;  %v3682_v40 = vadd.f32 %v3569_v19, %v3220_v42  ;;  %v4477_v13 = vrot.slane %v4475_v12, 2  ;;  %v5920_v6 = vrot.slane %v5918_v24, 2  ;;  %v10295_v42 = vld [vmem:[#allocation2 + $0x80] sm:$0xff] }
 0x2d1   : > { %v3572_v61 = vpop.f32.mrf.mxu3 }
 0x2d2   : > { %v3683_v10 = vadd.f32 %v3572_v61, %v3221_v62  ;;  %v10279_v62 = vpop.f32.mrf.mxu0  ;;  %v3453_v61 = vsel %vm3422_vm8, %v3450_v41, %v3452_v38  ;;  %v4143_v51 = vadd.f32 %v10002_v33, %v3682_v40  ;;  %v4478_v16 = vor.u32 %v4477_v13, %v4474_v22 }
 0x2d3   : > { %v5924_v20 = vor.u32 %v5923_v30, %v5920_v6  ;;  %v5930_v30 = vshll.u32 %v8481_v49, 16 }
 0x2d4   : > { %7830 = vmatmul.msk.bf16.gmra.mxu2 %vm2520_vm12, %v4470_v55  ;;  %v10283_v55 = vpop.f32.mrf.mxu1  ;;  %v4479_v33 = vsel %vm4345_vm2, %v4469_v45, %v4478_v16  ;;  %v4144_v12 = vadd.f32 %v10016_v14, %v3683_v10  ;;  %v3222_v45 = vadd.f32 %v10045_v18, %v9579_v53  ;;  %v3224_v14 = vadd.f32 %v10069_v63, %v9639_v60  ;;  %v5299_v18 = vld [vmem:[#allocation2 + $0xa0] sm:$0x3]  ;;  %v10866_v60 = vld [vmem:[#allocation24_spill] sm:$0xff] }
 0x2d5   : > { %v5925_v24 = vsel %vm5863_vm9, %v5915_v28, %v5924_v20  ;;  %v5927_v28 = vshrl.u32 %v8481_v49, 16  ;;  %v10869_v49 = vld [vmem:[#allocation35_spill] sm:$0xff] }
 0x2d6   : > { %8164 = vmatmul.msk.bf16.gmra.mxu1 %vm2520_vm12, %v5916_v15  ;;  %v10290_v15 = vld [vmem:[#allocation2 + $0x98] sm:$0xff] }
 0x2d7   : > { %v4623_v59 = vpop.f32.mrf.mxu2  ;;  %v5435_v40 = vrot.slane %v10290_v15, 2 }
 0x2d8   : > { %v10274_v5 = vadd.f32 %v4623_v59, %v4142_v35  ;;  %v8423_v59 = vld [vmem:[#allocation2 + $0x80] sm:$0xff] }
 0x2d9   : > { %v3574_v1 = vpop.f32.mrf.mxu3  ;;  %8061 = vmatmul.msk.bf16.gmra.mxu0 %vm2520_vm12, %v5434_v54  ;;  %v4481_v54 = vshrl.u32 %v8423_v59, 16  ;;  %v4484_v44 = vshll.u32 %v8423_v59, 16  ;;  %v5436_v6 = vsel %vm4940_vm1, %v5433_v50, %v5435_v40  ;;  %v5382_v59 = vunpack.c.l.b16 %v5299_v18  ;;  %v10868_v50 = vld [vmem:[#allocation4_spill] sm:$0xff]  ;;  %v8482_v18 = vld [vmem:[#allocation2 + $0x50] sm:$0xff] }
 0x2da   : > { %v10299_v32 = vpop.f32.mrf.mxu0  ;;  %v3684_v13 = vadd.f32 %v3574_v1, %v3222_v45 }
 0x2db   : > { %v4486_v53 = vrot.slane %v4484_v44, 2  ;;  %v5401_v45 = vpack.c.b16 %v5382_v59, %v5382_v59  ;;  %v10874_v59 = vld [vmem:[#allocation38_spill] sm:$0xff] }
 0x2dc   : > { %v10308_v10 = vpop.f32.mrf.mxu1  ;;  %v4145_v63 = vadd.f32 %v10866_v60, %v3684_v13  ;;  %v8424_v13 = vld [vmem:[#allocation2 + $0x88] sm:$0xff] }
 0x2dd   : > { %v4493_v60 = vshll.u32 %v8424_v13, 16 }
 0x2de   : > { %7604 = vmatmul.msk.bf16.gmra.mxu3 %vm2520_vm12, %v3453_v61 }
 0x2df   : > { %v4625_v19 = vpop.f32.mrf.mxu2 }
 0x2e0   : > { %v10286_v8 = vadd.f32 %v4625_v19, %v4143_v51  ;;  %v3454_v51 = vrot.slane %v10295_v42, 1 }
 0x2e1   : > { %v3577_v35 = vpop.f32.mrf.mxu3 }
 0x2e2   : > { %v3685_v41 = vadd.f32 %v3577_v35, %v3223_v3  ;;  %v4483_v3 = vrot.slane %v4481_v54, 1  ;;  %v5929_v35 = vrot.slane %v5927_v28, 2  ;;  %v3455_v15 = vsel %vm3422_vm8, %v3452_v38, %v3454_v51 }
 0x2e4   : > { %7831 = vmatmul.msk.bf16.gmra.mxu2 %vm2520_vm12, %v4479_v33  ;;  %v5932_v33 = vrot.slane %v5930_v30, 3  ;;  %v8381_v30 = vld [vmem:[#allocation2 + $0x88] sm:$0xff] }
 0x2e6   : > { %8165 = vmatmul.msk.bf16.gmra.mxu1 %vm2520_vm12, %v5925_v24  ;;  %v3225_v24 = vadd.f32 %v10869_v49, %v10868_v50  ;;  %v5933_v44 = vor.u32 %v5932_v33, %v5929_v35  ;;  %v4490_v35 = vshrl.u32 %v8424_v13, 16  ;;  %v10873_v33 = vld [vmem:[#allocation5_spill] sm:$0xff]  ;;  %v3456_v50 = vrot.slane %v8381_v30, 1 }
 0x2e7   : > { %v4628_v21 = vpop.f32.mrf.mxu2 }
 0x2e8   : > { %v10304_v22 = vadd.f32 %v4628_v21, %v4144_v12  ;;  %v4487_v12 = vor.u32 %v4486_v53, %v4483_v3  ;;  %v10320_v21 = vpop.f32.mrf.mxu0  ;;  %v5934_v3 = vsel %vm5863_vm9, %v5924_v20, %v5933_v44  ;;  %v5437_v53 = vrot.slane %v5401_v45, 2 }
 0x2e9   : > { %v3579_v61 = vpop.f32.mrf.mxu3  ;;  %8062 = vmatmul.msk.bf16.gmra.mxu0 %vm2520_vm12, %v5436_v6  ;;  %10870 = vst [vmem:[#allocation4_spill] sm:$0xff] %v10320_v21  ;;  %v4492_v45 = vrot.slane %v4490_v35, 1  ;;  %v3457_v13 = vsel %vm3422_vm8, %v3454_v51, %v3456_v50  ;;  %v10878_v35 = vld [vmem:[#allocation7_spill] sm:$0xff]  ;;  %v10879_v51 = vld [vmem:[#allocation30_spill] sm:$0xff] }
 0x2ea   : > { %10865 = vst [vmem:[#allocation41_spill] sm:$0xff] %v10304_v22  ;;  %v3686_v19 = vadd.f32 %v3579_v61, %v3224_v14  ;;  %v10322_v14 = vpop.f32.mrf.mxu1  ;;  %v4488_v28 = vsel %vm4345_vm2, %v4478_v16, %v4487_v12  ;;  %v10871_v61 = vld [vmem:[#allocation26_spill] sm:$0xff]  ;;  %v3226_v16 = vadd.f32 %v10874_v59, %v10873_v33  ;;  %v5438_v49 = vsel %vm4940_vm1, %v5435_v40, %v5437_v53  ;;  %v3319_v53 = vld [vmem:[#allocation2 + $0x90] sm:$0x1]  ;;  %v10890_v22 = vld [vmem:[#allocation36_spill] sm:$0xff] }
 0x2eb   : > { %v4146_v6 = vadd.f32 %v10871_v61, %v3685_v41  ;;  %v5936_v41 = vshrl.u32 %v8482_v18, 16 }
 0x2ee   : > { %7605 = vmatmul.msk.bf16.gmra.mxu3 %vm2520_vm12, %v3455_v15 }
 0x2ef   : > { %v4630_v1 = vpop.f32.mrf.mxu2 }
 0x2f0   : > { %v10316_v42 = vadd.f32 %v4630_v1, %v4145_v63 }
 0x2f1   : > { %v3582_v54 = vpop.f32.mrf.mxu3 }
 0x2f2   : > { %10867 = vst [vmem:[#allocation24_spill] sm:$0xff] %v10316_v42  ;;  %v3687_v38 = vadd.f32 %v3582_v54, %v3225_v24  ;;  %v5939_v24 = vshll.u32 %v8482_v18, 16  ;;  %v10334_v54 = vpop.f32.mrf.mxu0  ;;  %v10337_v61 = vpop.f32.mrf.mxu1 }
 0x2f3   : > { %10875 = vst [vmem:[#allocation26_spill] sm:$0xff] %v10334_v54  ;;  %v10883_v54 = vld [vmem:[#allocation32_spill] sm:$0xff] }
 0x2f4   : > { %7832 = vmatmul.msk.bf16.gmra.mxu2 %vm2520_vm12, %v4488_v28  ;;  %v4495_v28 = vrot.slane %v4493_v60, 2  ;;  %v5941_v33 = vrot.slane %v5939_v24, 3 }
 0x2f6   : > { %8166 = vmatmul.msk.bf16.gmra.mxu1 %vm2520_vm12, %v5934_v3  ;;  %v4496_v30 = vor.u32 %v4495_v28, %v4492_v45 }
 0x2f7   : > { %v4633_v15 = vpop.f32.mrf.mxu2 }
 0x2f8   : > { %v10329_v63 = vadd.f32 %v4633_v15, %v4146_v6  ;;  %v10876_v6 = vld [vmem:[#allocation28_spill] sm:$0xff]  ;;  %v5938_v15 = vrot.slane %v5936_v41, 2 }
 0x2f9   : > { %v3584_v1 = vpop.f32.mrf.mxu3  ;;  %8063 = vmatmul.msk.bf16.gmra.mxu0 %vm2520_vm12, %v5438_v49  ;;  %v4147_v3 = vadd.f32 %v10876_v6, %v3686_v19  ;;  %v4497_v49 = vsel %vm4345_vm2, %v4487_v12, %v4496_v30  ;;  %v4148_v19 = vadd.f32 %v10879_v51, %v3687_v38  ;;  %v10882_v12 = vld [vmem:[#allocation9_spill] sm:$0xff]  ;;  %v4242_v51 = vld [vmem:[#allocation2 + $0x98] sm:$0x3] }
 0x2fa   : > { %10872 = vst [vmem:[#allocation35_spill] sm:$0xff] %v10329_v63  ;;  %v3688_v20 = vadd.f32 %v3584_v1, %v3226_v16  ;;  %v3402_v16 = vunpack.c.l.b16 %v3319_v53  ;;  %v5942_v1 = vor.u32 %v5941_v33, %v5938_v15  ;;  %v8425_v63 = vld [vmem:[#allocation2 + $0x90] sm:$0xff]  ;;  %v10349_v45 = vpop.f32.mrf.mxu1 }
 0x2fb   : > { %v4499_v6 = vshrl.u32 %v8425_v63, 16  ;;  %v10881_v33 = vld [vmem:[#allocation6_spill] sm:$0xff] }
 0x2fc   : > { %v3421_v41 = vpack.c.b16 %v3402_v16, %v3402_v16  ;;  %v5943_v24 = vsel %vm5863_vm9, %v5933_v44, %v5942_v1  ;;  %v4149_v42 = vadd.f32 %v10883_v54, %v3688_v20  ;;  %v8430_v54 = vld [vmem:[#allocation2 + $0x8] sm:$0xf0] }
 0x2fd   : > { %v10886_v20 = vld [vmem:[#allocation33_spill] sm:$0xff] }
 0x2fe   : > { %7606 = vmatmul.msk.bf16.gmra.mxu3 %vm2520_vm12, %v3457_v13  ;;  %v8483_v13 = vld [vmem:[#allocation2 + $0x58] sm:$0xff] }
 0x2ff   : > { %v4635_v40 = vpop.f32.mrf.mxu2  ;;  %v5948_v38 = vshll.u32 %v8483_v13, 16 }
 0x300   : > { %v10342_v18 = vadd.f32 %v4635_v40, %v4147_v3  ;;  %v4502_v3 = vshll.u32 %v8425_v63, 16  ;;  %v3228_v40 = vadd.f32 %v10882_v12, %v10881_v33 }
 0x301   : > { %v3587_v59 = vpop.f32.mrf.mxu3  ;;  %v5950_v21 = vrot.slane %v5948_v38, 3  ;;  %v7846_v38 = vld [vmem:[#allocation2 + $0x8] sm:$0xc] }
 0x302   : > { %10877 = vst [vmem:[#allocation5_spill] sm:$0xff] %v10342_v18  ;;  %v3689_v60 = vadd.f32 %v3587_v59, %v10878_v35  ;;  %v3458_v59 = vrot.slane %v3421_v41, 1  ;;  %v5945_v35 = vshrl.u32 %v8483_v13, 16  ;;  %v4504_v44 = vrot.slane %v4502_v3, 2  ;;  %v10361_v41 = vpop.f32.mrf.mxu1 }
 0x304   : > { %7833 = vmatmul.msk.bf16.gmra.mxu2 %vm2520_vm12, %v4497_v49  ;;  %v4501_v49 = vrot.slane %v4499_v6, 1  ;;  %v3459_v18 = vsel %vm3422_vm8, %v3456_v50, %v3458_v59  ;;  %v10885_v6 = vld [vmem:[#allocation10_spill] sm:$0xff] }
 0x306   : > { %8167 = vmatmul.msk.bf16.gmra.mxu1 %vm2520_vm12, %v5943_v24  ;;  %v5947_v24 = vrot.slane %v5945_v35, 2  ;;  %v8484_v35 = vld [vmem:[#allocation2 + $0x60] sm:$0xff] }
 0x307   : > { %v4638_v28 = vpop.f32.mrf.mxu2 }
 0x308   : > { %v10352_v15 = vadd.f32 %v4638_v28, %v4148_v19  ;;  %v4505_v19 = vor.u32 %v4504_v44, %v4501_v49  ;;  %v4325_v28 = vunpack.c.l.b16 %v4242_v51  ;;  %v5951_v12 = vor.u32 %v5950_v21, %v5947_v24  ;;  %v10889_v24 = vld [vmem:[#allocation12_spill] sm:$0xff] }
 0x309   : > { %v3589_v53 = vpop.f32.mrf.mxu3  ;;  %v7847_v51 = vor.u32 %v8430_v54, %v7846_v38 }
 0x30a   : > { %10880 = vst [vmem:[#allocation38_spill] sm:$0xff] %v10352_v15  ;;  %v3690_v16 = vadd.f32 %v3589_v53, %v3228_v40  ;;  %v4506_v40 = vsel %vm4345_vm2, %v4496_v30, %v4505_v19  ;;  %v4344_v50 = vpack.c.b16 %v4325_v28, %v4325_v28  ;;  %v4150_v53 = vadd.f32 %v10886_v20, %v3689_v60  ;;  %v10888_v30 = vld [vmem:[#allocation8_spill] sm:$0xff] }
 0x30b   : > { %v5952_v59 = vsel %vm5863_vm9, %v5942_v1, %v5951_v12  ;;  %v5957_v60 = vshll.u32 %v8484_v35, 16  ;;  %v4941_v15 = vrot.slane %v7847_v51, 2 }
 0x30c   : > { %v4508_v49 = vshrl.u32 %v4344_v50, 16  ;;  %v4511_v21 = vshll.u32 %v4344_v50, 16 }
 0x30e   : > { %7607 = vmatmul.msk.bf16.gmra.mxu3 %vm2520_vm12, %v3459_v18  ;;  %v8431_v18 = vld [vmem:[#allocation2 + $0x10] sm:$0xff]  ;;  %v4510_v20 = vrot.slane %v4508_v49, 1 }
 0x30f   : > { %v4640_v63 = vpop.f32.mrf.mxu2 }
 0x310   : > { %v10359_v33 = vadd.f32 %v4640_v63, %v4149_v42  ;;  %v3230_v63 = vadd.f32 %v10889_v24, %v10888_v30  ;;  %v10892_v24 = vld [vmem:[#allocation13_spill] sm:$0xff] }
 0x311   : > { %v3592_v13 = vpop.f32.mrf.mxu3 }
 0x312   : > { %10884 = vst [vmem:[#allocation28_spill] sm:$0xff] %v10359_v33  ;;  %v3691_v3 = vadd.f32 %v3592_v13, %v10885_v6  ;;  %v4942_v13 = vrot.slane %v8431_v18, 2  ;;  %v5954_v6 = vshrl.u32 %v8484_v35, 16  ;;  %v4513_v33 = vrot.slane %v4511_v21, 2 }
 0x314   : > { %7834 = vmatmul.msk.bf16.gmra.mxu2 %vm2520_vm12, %v4506_v40  ;;  %v10373_v40 = vpop.f32.mrf.mxu1  ;;  %v4943_v50 = vsel %vm4940_vm1, %v4941_v15, %v4942_v13  ;;  %v4514_v38 = vor.u32 %v4513_v33, %v4510_v20  ;;  %v8496_v20 = vld [vmem:[#allocation2 + $0x10] sm:$0xf0] }
 0x316   : > { %8168 = vmatmul.msk.bf16.gmra.mxu1 %vm2520_vm12, %v5952_v59  ;;  %v4151_v59 = vadd.f32 %v10890_v22, %v3690_v16  ;;  %v4515_v49 = vsel %vm4345_vm2, %v4505_v19, %v4514_v38  ;;  %v10893_v22 = vld [vmem:[#allocation39_spill] sm:$0xff] }
 0x317   : > { %v4643_v42 = vpop.f32.mrf.mxu2  ;;  %v4152_v15 = vadd.f32 %v10893_v22, %v3691_v3  ;;  %v8432_v16 = vld [vmem:[#allocation2 + $0x18] sm:$0xff] }
 0x318   : > { %v10369_v44 = vadd.f32 %v4643_v42, %v4150_v53  ;;  %v5956_v53 = vrot.slane %v5954_v6, 2  ;;  %v5959_v42 = vrot.slane %v5957_v60, 3  ;;  %v4944_v60 = vrot.slane %v8432_v16, 2 }
 0x319   : > { %v3594_v28 = vpop.f32.mrf.mxu3 }
 0x31a   : > { %10887 = vst [vmem:[#allocation7_spill] sm:$0xff] %v10369_v44  ;;  %v3692_v1 = vadd.f32 %v3594_v28, %v3230_v63  ;;  %v5960_v35 = vor.u32 %v5959_v42, %v5956_v53  ;;  %v8485_v63 = vld [vmem:[#allocation2 + $0x68] sm:$0xff]  ;;  %v8188_v53 = vld [vmem:[#allocation2 + $0x10] sm:$0x8]  ;;  %v4945_v3 = vsel %vm4940_vm1, %v4942_v13, %v4944_v60 }
 0x31b   : > { %v5966_v19 = vshll.u32 %v8485_v63, 16  ;;  %v8189_v42 = vor.u32 %v8496_v20, %v8188_v53  ;;  %v10898_v53 = vld [vmem:[#allocation15_spill] sm:$0xff] }
 0x31c   : > { %v10383_v21 = vpop.f32.mrf.mxu1  ;;  %v5961_v51 = vsel %vm5863_vm9, %v5951_v12, %v5960_v35 }
 0x31d   : > { %v5968_v12 = vrot.slane %v5966_v19, 3 }
 0x31e   : > { %7932 = vmatmul.msk.bf16.vlgmr.msra.gmra.mxu3 %vm2520_vm12, %v4943_v50  ;;  %v8497_v50 = vld [vmem:[#allocation2 + $0x18] sm:$0xff] }
 0x31f   : > { %v4645_v54 = vpop.f32.mrf.mxu2 }
 0x320   : > { %v10378_v30 = vadd.f32 %v4645_v54, %v4151_v59  ;;  %v5963_v59 = vshrl.u32 %v8485_v63, 16  ;;  %v4153_v54 = vadd.f32 %v10132_v23, %v3692_v1  ;;  %v10896_v63 = vld [vmem:[#allocation16_spill] sm:$0xff] }
 0x321   : > { %v3597_v18 = vpop.f32.mrf.mxu3  ;;  %v8433_v1 = vld [vmem:[#allocation2 + $0x20] sm:$0xff] }
 0x322   : > { %10891 = vst [vmem:[#allocation30_spill] sm:$0xff] %v10378_v30  ;;  %v3693_v44 = vadd.f32 %v3597_v18, %v10892_v24  ;;  %v5965_v38 = vrot.slane %v5963_v59, 2  ;;  %v8486_v59 = vld [vmem:[#allocation2 + $0x70] sm:$0xff] }
 0x324   : > { %7835 = vmatmul.msk.bf16.gmra.mxu2 %vm2520_vm12, %v4515_v49  ;;  %v10392_v18 = vpop.f32.mrf.mxu1  ;;  %v6460_v49 = vrot.slane %v8497_v50, 3  ;;  %v4154_v13 = vadd.f32 %v10152_v31, %v3693_v44  ;;  %v10897_v50 = vld [vmem:[#allocation11_spill] sm:$0xff] }
 0x325   : > { %v8498_v31 = vld [vmem:[#allocation2 + $0x20] sm:$0xff] }
 0x326   : > { %8169 = vmatmul.msk.bf16.gmra.mxu1 %vm2520_vm12, %v5961_v51  ;;  %v5969_v51 = vor.u32 %v5968_v12, %v5965_v38 }
 0x327   : > { %v4648_v28 = vpop.f32.mrf.mxu2 }
 0x328   : > { %v10388_v33 = vadd.f32 %v4648_v28, %v4152_v15  ;;  %v6459_v15 = vrot.slane %v8189_v42, 3  ;;  %v5970_v20 = vsel %vm5863_vm9, %v5960_v35, %v5969_v51  ;;  %v3232_v42 = vadd.f32 %v10898_v53, %v10897_v50 }
 0x329   : > { %v3599_v6 = vpop.f32.mrf.mxu3  ;;  %v6462_v50 = vrot.slane %v8498_v31, 3  ;;  %v10902_v31 = vld [vmem:[#allocation14_spill] sm:$0xff] }
 0x32a   : > { %10894 = vst [vmem:[#allocation6_spill] sm:$0xff] %v10388_v33  ;;  %v6461_v23 = vsel %vm6458_vm7, %v6459_v15, %v6460_v49  ;;  %v3694_v38 = vadd.f32 %v3599_v6, %v3232_v42  ;;  %v5972_v15 = vshrl.u32 %v8486_v59, 16 }
 0x32c   : > { %v4155_v44 = vadd.f32 %v10167_v25, %v3694_v38 }
 0x32e   : > { %7933 = vmatmul.msk.bf16.gmra.mxu3 %vm2520_vm12, %v4945_v3  ;;  %v10407_v3 = vpop.f32.mrf.mxu1 }
 0x32f   : > { %v4650_v24 = vpop.f32.mrf.mxu2 }
 0x330   : > { %v10395_v22 = vadd.f32 %v4650_v24, %v4153_v54  ;;  %v4946_v24 = vrot.slane %v8433_v1, 2  ;;  %v10901_v1 = vld [vmem:[#allocation19_spill] sm:$0xff] }
 0x331   : > { %v3602_v16 = vpop.f32.mrf.mxu3 }
 0x332   : > { %10895 = vst [vmem:[#allocation9_spill] sm:$0xff] %v10395_v22  ;;  %v3695_v28 = vadd.f32 %v3602_v16, %v10896_v63  ;;  %v5975_v16 = vshll.u32 %v8486_v59, 16  ;;  %v4947_v35 = vsel %vm4940_vm1, %v4944_v60, %v4946_v24  ;;  %v5974_v63 = vrot.slane %v5972_v15, 2  ;;  %v8434_v60 = vld [vmem:[#allocation2 + $0x28] sm:$0xff]  ;;  %v8487_v15 = vld [vmem:[#allocation2 + $0x78] sm:$0xff] }
 0x333   : > { %v6463_v59 = vsel %vm6458_vm7, %v6460_v49, %v6462_v50  ;;  %v5981_v49 = vshrl.u32 %v8487_v15, 16 }
 0x334   : > { %8274 = vmatmul.msk.bf16.vlgmr.msra.gmra.mxu2 %vm2520_vm12, %v6461_v23  ;;  %v5977_v23 = vrot.slane %v5975_v16, 3  ;;  %v4156_v25 = vadd.f32 %v10183_v0, %v3695_v28 }
 0x335   : > { %v5983_v28 = vrot.slane %v5981_v49, 2 }
 0x336   : > { %8170 = vmatmul.msk.bf16.gmra.mxu1 %vm2520_vm12, %v5970_v20  ;;  %v5978_v53 = vor.u32 %v5977_v23, %v5974_v63  ;;  %v10414_v6 = vpop.f32.mrf.mxu1 }
 0x337   : > { %v4653_v19 = vpop.f32.mrf.mxu2 }
 0x338   : > { %v10405_v54 = vadd.f32 %v4653_v19, %v4154_v13  ;;  %v5979_v38 = vsel %vm5863_vm9, %v5969_v51, %v5978_v53 }
 0x339   : > { %v3604_v12 = vpop.f32.mrf.mxu3 }
 0x33a   : > { %10899 = vst [vmem:[#allocation32_spill] sm:$0xff] %v10405_v54 }
 0x33e   : > { %7934 = vmatmul.msk.bf16.gmra.mxu3 %vm2520_vm12, %v4947_v35 }
 0x33f   : > { %v4655_v20 = vpop.f32.mrf.mxu2 }
 0x340   : > { %v10412_v13 = vadd.f32 %v4655_v20, %v4155_v44  ;;  %v10903_v44 = vld [vmem:[#allocation17_spill] sm:$0xff] }
 0x341   : > { %v3607_v19 = vpop.f32.mrf.mxu3  ;;  %v3234_v35 = vadd.f32 %v10903_v44, %v10902_v31 }
 0x342   : > { %10900 = vst [vmem:[#allocation10_spill] sm:$0xff] %v10412_v13  ;;  %v3697_v42 = vadd.f32 %v3607_v19, %v10901_v1  ;;  %v4948_v19 = vrot.slane %v8434_v60, 2  ;;  %v5984_v1 = vshll.u32 %v8487_v15, 16  ;;  %v10426_v13 = vpop.f32.mrf.mxu1  ;;  %v10906_v60 = vld [vmem:[#allocation22_spill] sm:$0xff] }
 0x343   : > { %v3696_v23 = vadd.f32 %v3604_v12, %v3234_v35  ;;  %v8435_v35 = vld [vmem:[#allocation2 + $0x30] sm:$0xff] }
 0x344   : > { %8275 = vmatmul.msk.bf16.gmra.mxu2 %vm2520_vm12, %v6463_v59  ;;  %v8499_v59 = vld [vmem:[#allocation2 + $0x28] sm:$0xff]  ;;  %v4949_v51 = vsel %vm4940_vm1, %v4946_v24, %v4948_v19  ;;  %v5986_v54 = vrot.slane %v5984_v1, 3 }
 0x345   : > { %v4157_v0 = vadd.f32 %v10203_v43, %v3696_v23  ;;  %v6464_v31 = vrot.slane %v8499_v59, 3  ;;  %v4158_v43 = vadd.f32 %v10222_v17, %v3697_v42  ;;  %v8488_v23 = vld [vmem:[#allocation2 + $0x80] sm:$0xff]  ;;  %v10907_v59 = vld [vmem:[#allocation18_spill] sm:$0xff]  ;;  %v4950_v17 = vrot.slane %v8435_v35, 2 }
 0x346   : > { %8171 = vmatmul.msk.bf16.gmra.mxu1 %vm2520_vm12, %v5979_v38  ;;  %v5990_v42 = vshrl.u32 %v8488_v23, 16 }
 0x347   : > { %v4658_v16 = vpop.f32.mrf.mxu2  ;;  %v6465_v15 = vsel %vm6458_vm7, %v6462_v50, %v6464_v31  ;;  %v10910_v50 = vld [vmem:[#allocation23_spill] sm:$0xff]  ;;  %v4951_v22 = vsel %vm4940_vm1, %v4948_v19, %v4950_v17 }
 0x348   : > { %v10424_v63 = vadd.f32 %v4658_v16, %v4156_v25  ;;  %v5987_v16 = vor.u32 %v5986_v54, %v5983_v28  ;;  %v10909_v28 = vld [vmem:[#allocation20_spill] sm:$0xff]  ;;  %v8436_v19 = vld [vmem:[#allocation2 + $0x38] sm:$0xff] }
 0x349   : > { %v3609_v20 = vpop.f32.mrf.mxu3 }
 0x34a   : > { %10904 = vst [vmem:[#allocation33_spill] sm:$0xff] %v10424_v63  ;;  %v5988_v24 = vsel %vm5863_vm9, %v5978_v53, %v5987_v16  ;;  %v10438_v49 = vpop.f32.mrf.mxu1 }
 0x34e   : > { %7935 = vmatmul.msk.bf16.gmra.mxu3 %vm2520_vm12, %v4949_v51 }
 0x34f   : > { %v4660_v38 = vpop.f32.mrf.mxu2 }
 0x350   : > { %v10431_v25 = vadd.f32 %v4660_v38, %v4157_v0  ;;  %v10908_v0 = vld [vmem:[#allocation21_spill] sm:$0xff]  ;;  %v3238_v38 = vadd.f32 %v10910_v50, %v10909_v28 }
 0x351   : > { %v3612_v12 = vpop.f32.mrf.mxu3  ;;  %v3236_v54 = vadd.f32 %v10908_v0, %v10907_v59  ;;  %v10911_v0 = vld [vmem:[#allocation25_spill] sm:$0xff] }
 0x352   : > { %10905 = vst [vmem:[#allocation8_spill] sm:$0xff] %v10431_v25  ;;  %v3699_v44 = vadd.f32 %v3612_v12, %v10906_v60  ;;  %v8500_v25 = vld [vmem:[#allocation2 + $0x30] sm:$0xff]  ;;  %v10452_v59 = vpop.f32.mrf.mxu1  ;;  %v8489_v50 = vld [vmem:[#allocation2 + $0x88] sm:$0xff] }
 0x353   : > { %v3698_v12 = vadd.f32 %v3609_v20, %v3236_v54 }
 0x354   : > { %8276 = vmatmul.msk.bf16.gmra.mxu2 %vm2520_vm12, %v6465_v15  ;;  %v5993_v15 = vshll.u32 %v8488_v23, 16 }
 0x355   : > { %v4159_v63 = vadd.f32 %v10245_v47, %v3698_v12  ;;  %v4160_v47 = vadd.f32 %v10264_v34, %v3699_v44 }
 0x356   : > { %8172 = vmatmul.msk.bf16.gmra.mxu1 %vm2520_vm12, %v5988_v24  ;;  %v5992_v24 = vrot.slane %v5990_v42, 2  ;;  %v5995_v33 = vrot.slane %v5993_v15, 3  ;;  %v8501_v42 = vld [vmem:[#allocation2 + $0x38] sm:$0xff] }
 0x357   : > { %v4663_v1 = vpop.f32.mrf.mxu2 }
 0x358   : > { %v10443_v51 = vadd.f32 %v4663_v1, %v4158_v43  ;;  %v6466_v43 = vrot.slane %v8500_v25, 3  ;;  %v5996_v35 = vor.u32 %v5995_v33, %v5992_v24  ;;  %v4952_v25 = vrot.slane %v8436_v19, 2  ;;  %v10913_v19 = vld [vmem:[#allocation29_spill] sm:$0xff] }
 0x359   : > { %v3614_v60 = vpop.f32.mrf.mxu3  ;;  %v5999_v33 = vshrl.u32 %v8489_v50, 16 }
 0x35a   : > { %v3700_v53 = vadd.f32 %v3614_v60, %v3238_v38  ;;  %v6467_v54 = vsel %vm6458_vm7, %v6464_v31, %v6466_v43  ;;  %v5997_v28 = vsel %vm5863_vm9, %v5987_v16, %v5996_v35  ;;  %v6002_v38 = vshll.u32 %v8489_v50, 16  ;;  %v10462_v12 = vpop.f32.mrf.mxu1  ;;  %v10912_v31 = vld [vmem:[#allocation27_spill] sm:$0xff] }
 0x35b   : > { %v4953_v44 = vsel %vm4940_vm1, %v4950_v17, %v4952_v25  ;;  %v6001_v16 = vrot.slane %v5999_v33, 2  ;;  %v8437_v17 = vld [vmem:[#allocation2 + $0x40] sm:$0xff] }
 0x35c   : > { %v4161_v34 = vadd.f32 %v10283_v55, %v3700_v53  ;;  %v6004_v15 = vrot.slane %v6002_v38, 3 }
 0x35e   : > { %7936 = vmatmul.msk.bf16.gmra.mxu3 %vm2520_vm12, %v4951_v22 }
 0x35f   : > { %v4665_v30 = vpop.f32.mrf.mxu2 }
 0x360   : > { %v10450_v1 = vadd.f32 %v4665_v30, %v4159_v63 }
 0x361   : > { %v3617_v20 = vpop.f32.mrf.mxu3 }
 0x362   : > { %v3701_v23 = vadd.f32 %v3617_v20, %v10911_v0  ;;  %v6468_v20 = vrot.slane %v8501_v42, 3  ;;  %v4954_v42 = vrot.slane %v8437_v17, 2 }
 0x364   : > { %8277 = vmatmul.msk.bf16.gmra.mxu2 %vm2520_vm12, %v6467_v54  ;;  %v6469_v50 = vsel %vm6458_vm7, %v6466_v43, %v6468_v20  ;;  %v4162_v55 = vadd.f32 %v10308_v10, %v3701_v23  ;;  %v10914_v43 = vld [vmem:[#allocation31_spill] sm:$0xff]  ;;  %v4955_v10 = vsel %vm4940_vm1, %v4952_v25, %v4954_v42  ;;  %v8438_v25 = vld [vmem:[#allocation2 + $0x48] sm:$0xff] }
 0x366   : > { %8173 = vmatmul.msk.bf16.gmra.mxu1 %vm2520_vm12, %v5997_v28 }
 0x367   : > { %v4668_v22 = vpop.f32.mrf.mxu2 }
 0x368   : > { %v10460_v30 = vadd.f32 %v4668_v22, %v4160_v47  ;;  %v6005_v47 = vor.u32 %v6004_v15, %v6001_v16  ;;  %v10473_v22 = vpop.f32.mrf.mxu1  ;;  %v8502_v15 = vld [vmem:[#allocation2 + $0x40] sm:$0xff] }
 0x369   : > { %v3619_v63 = vpop.f32.mrf.mxu3 }
 0x36a   : > { %v3702_v60 = vadd.f32 %v3619_v63, %v10912_v31  ;;  %v6006_v53 = vsel %vm5863_vm9, %v5996_v35, %v6005_v47  ;;  %v8490_v63 = vld [vmem:[#allocation2 + $0x90] sm:$0xff] }
 0x36e   : > { %7937 = vmatmul.msk.bf16.gmra.mxu3 %vm2520_vm12, %v4953_v44  ;;  %v6011_v44 = vshll.u32 %v8490_v63, 16 }
 0x36f   : > { %v4670_v24 = vpop.f32.mrf.mxu2 }
 0x370   : > { %v10468_v0 = vadd.f32 %v4670_v24, %v4161_v34  ;;  %v6008_v34 = vshrl.u32 %v8490_v63, 16  ;;  %v4163_v24 = vadd.f32 %v10322_v14, %v3702_v60  ;;  %v10483_v35 = vpop.f32.mrf.mxu1  ;;  %v10916_v63 = vld [vmem:[#allocation34_spill] sm:$0xff] }
 0x371   : > { %v3622_v54 = vpop.f32.mrf.mxu3 }
 0x372   : > { %v3703_v28 = vadd.f32 %v3622_v54, %v10913_v19  ;;  %v6010_v23 = vrot.slane %v6008_v34, 2  ;;  %v6013_v54 = vrot.slane %v6011_v44, 3  ;;  %v8491_v34 = vld [vmem:[#allocation2 + $0x98] sm:$0xff] }
 0x374   : > { %8278 = vmatmul.msk.bf16.gmra.mxu2 %vm2520_vm12, %v6469_v50  ;;  %v6470_v50 = vrot.slane %v8502_v15, 3  ;;  %v4164_v14 = vadd.f32 %v10337_v61, %v3703_v28 }
 0x376   : > { %8174 = vmatmul.msk.bf16.gmra.mxu1 %vm2520_vm12, %v6006_v53  ;;  %v6014_v53 = vor.u32 %v6013_v54, %v6010_v23  ;;  %v6017_v23 = vshrl.u32 %v8491_v34, 16  ;;  %v6020_v54 = vshll.u32 %v8491_v34, 16 }
 0x377   : > { %v4673_v33 = vpop.f32.mrf.mxu2 }
 0x378   : > { %v10478_v38 = vadd.f32 %v4673_v33, %v4162_v55  ;;  %v6015_v60 = vsel %vm5863_vm9, %v6005_v47, %v6014_v53  ;;  %v10496_v15 = vpop.f32.mrf.mxu1  ;;  %v6019_v47 = vrot.slane %v6017_v23, 2 }
 0x379   : > { %v3624_v31 = vpop.f32.mrf.mxu3 }
 0x37a   : > { %v3704_v16 = vadd.f32 %v3624_v31, %v10914_v43  ;;  %v6471_v31 = vsel %vm6458_vm7, %v6468_v20, %v6470_v50  ;;  %v10918_v20 = vld [vmem:[#allocation37_spill] sm:$0xff] }
 0x37c   : > { %v4165_v61 = vadd.f32 %v10349_v45, %v3704_v16  ;;  %v8439_v16 = vld [vmem:[#allocation2 + $0x50] sm:$0xff] }
 0x37e   : > { %7938 = vmatmul.msk.bf16.gmra.mxu3 %vm2520_vm12, %v4955_v10  ;;  %v4956_v10 = vrot.slane %v8438_v25, 2 }
 0x37f   : > { %v4675_v19 = vpop.f32.mrf.mxu2 }
 0x380   : > { %v10486_v55 = vadd.f32 %v4675_v19, %v4163_v24  ;;  %v4957_v28 = vsel %vm4940_vm1, %v4954_v42, %v4956_v10  ;;  %v10504_v34 = vpop.f32.mrf.mxu1 }
 0x381   : > { %v3627_v17 = vpop.f32.mrf.mxu3 }
 0x382   : > { %10915 = vst [vmem:[#allocation12_spill] sm:$0xff] %v10486_v55  ;;  %v3705_v33 = vadd.f32 %v3627_v17, %v10916_v63  ;;  %v8503_v17 = vld [vmem:[#allocation2 + $0x48] sm:$0xff]  ;;  %v6022_v63 = vrot.slane %v6020_v54, 3 }
 0x384   : > { %8279 = vmatmul.msk.bf16.gmra.mxu2 %vm2520_vm12, %v6471_v31  ;;  %v6023_v25 = vor.u32 %v6022_v63, %v6019_v47  ;;  %v4166_v42 = vadd.f32 %v10361_v41, %v3705_v33 }
 0x386   : > { %8175 = vmatmul.msk.bf16.gmra.mxu1 %vm2520_vm12, %v6015_v60  ;;  %v5760_v60 = vld [vmem:[#allocation2 + $0xa0] sm:$0x7]  ;;  %v6024_v23 = vsel %vm5863_vm9, %v6014_v53, %v6023_v25 }
 0x387   : > { %v4678_v44 = vpop.f32.mrf.mxu2  ;;  %v5843_v55 = vunpack.c.l.b16 %v5760_v60 }
 0x388   : > { %v10494_v43 = vadd.f32 %v4678_v44, %v4164_v14  ;;  %v6472_v14 = vrot.slane %v8503_v17, 3 }
 0x389   : > { %v3629_v24 = vpop.f32.mrf.mxu3  ;;  %v5862_v54 = vpack.c.b16 %v5843_v55, %v5843_v55 }
 0x38a   : > { %10917 = vst [vmem:[#allocation36_spill] sm:$0xff] %v10494_v43  ;;  %v3706_v19 = vadd.f32 %v3629_v24, %v10918_v20  ;;  %v6473_v45 = vsel %vm6458_vm7, %v6470_v50, %v6472_v14  ;;  %v8504_v50 = vld [vmem:[#allocation2 + $0x50] sm:$0xff] }
 0x38b   : > { %v6026_v47 = vshrl.u32 %v5862_v54, 16  ;;  %v6029_v63 = vshll.u32 %v5862_v54, 16  ;;  %v6474_v60 = vrot.slane %v8504_v50, 3  ;;  %v8440_v54 = vld [vmem:[#allocation2 + $0x58] sm:$0xff] }
 0x38c   : > { %v4167_v41 = vadd.f32 %v10373_v40, %v3706_v19 }
 0x38d   : > { %v6028_v53 = vrot.slane %v6026_v47, 2  ;;  %v6031_v55 = vrot.slane %v6029_v63, 3  ;;  %v4960_v47 = vrot.slane %v8440_v54, 2  ;;  %v8505_v63 = vld [vmem:[#allocation2 + $0x58] sm:$0xff] }
 0x38e   : > { %7939 = vmatmul.msk.bf16.gmra.mxu3 %vm2520_vm12, %v4957_v28  ;;  %v4958_v28 = vrot.slane %v8439_v16, 2 }
 0x38f   : > { %v4680_v31 = vpop.f32.mrf.mxu2  ;;  %v6032_v16 = vor.u32 %v6031_v55, %v6028_v53 }
 0x390   : > { %v10502_v44 = vadd.f32 %v4680_v31, %v4165_v61  ;;  %v4959_v33 = vsel %vm4940_vm1, %v4956_v10, %v4958_v28 }
 0x391   : > { %v3632_v43 = vpop.f32.mrf.mxu3  ;;  %v6033_v40 = vsel %vm5863_vm9, %v6023_v25, %v6032_v16  ;;  %v6476_v25 = vrot.slane %v8505_v63, 3 }
 0x392   : > { %v3707_v24 = vadd.f32 %v3632_v43, %v10123_v48  ;;  %v10515_v43 = vpop.f32.mrf.mxu1 }
 0x394   : > { %8280 = vmatmul.msk.bf16.gmra.mxu2 %vm2520_vm12, %v6473_v45 }
 0x396   : > { %8176 = vmatmul.msk.bf16.gmra.mxu1 %vm2520_vm12, %v6024_v23  ;;  %v6475_v23 = vsel %vm6458_vm7, %v6472_v14, %v6474_v60 }
 0x397   : > { %v4683_v20 = vpop.f32.mrf.mxu2 }
 0x398   : > { %v10512_v17 = vadd.f32 %v4683_v20, %v4166_v42 }
 0x399   : > { %v3634_v61 = vpop.f32.mrf.mxu3 }
 0x39a   : > { %v3708_v48 = vadd.f32 %v3634_v61, %v10134_v7  ;;  %v4168_v7 = vadd.f32 %v10383_v21, %v3707_v24  ;;  %v10526_v10 = vpop.f32.mrf.mxu1 }
 0x39c   : > { %v4169_v14 = vadd.f32 %v10392_v18, %v3708_v48  ;;  %v8441_v18 = vld [vmem:[#allocation2 + $0x60] sm:$0xff] }
 0x39d   : > { %v4962_v54 = vrot.slane %v8441_v18, 2  ;;  %v8442_v18 = vld [vmem:[#allocation2 + $0x68] sm:$0xff] }
 0x39e   : > { %7940 = vmatmul.msk.bf16.gmra.mxu3 %vm2520_vm12, %v4959_v33  ;;  %v10919_v33 = vld [vmem:[#allocation40_spill] sm:$0xff] }
 0x39f   : > { %v4685_v31 = vpop.f32.mrf.mxu2 }
 0x3a0   : > { %v10520_v45 = vadd.f32 %v4685_v31, %v4167_v41  ;;  %v4961_v41 = vsel %vm4940_vm1, %v4958_v28, %v4960_v47  ;;  %v6477_v31 = vsel %vm6458_vm7, %v6474_v60, %v6476_v25  ;;  %v8506_v60 = vld [vmem:[#allocation2 + $0x60] sm:$0xff] }
 0x3a1   : > { %v5065_v42 = vpop.f32.mrf.mxu3  ;;  %v6478_v63 = vrot.slane %v8506_v60, 3 }
 0x3a2   : > { %v5191_v50 = vadd.f32 %v5065_v42, %v10150_v39  ;;  %v10545_v42 = vld [vmem:[%s10782_s4] ss:$0 sm:$0xff] }
 0x3a4   : > { %8281 = vmatmul.msk.bf16.gmra.mxu2 %vm2520_vm12, %v6475_v23  ;;  %v5652_v53 = vadd.f32 %v10919_v33, %v5191_v50  ;;  %v1374_v50 = vld [vmem:[%s8727_s14] sm:$0xff]  }
 0x3a6   : > { %8177 = vmatmul.msk.bf16.gmra.mxu1 %vm2520_vm12, %v6033_v40  ;;  %v6247_v39 = vadd.f32 %v10407_v3, %v5652_v53  ;;  %v4963_v3 = vsel %vm4940_vm1, %v4960_v47, %v4962_v54  ;;  %v6964_v53 = vunpack.c.l.bf16 %v1374_v50  ;;  %v6479_v47 = vsel %vm6458_vm7, %v6476_v25, %v6478_v63 }
 0x3a7   : > { %v4688_v19 = vpop.f32.mrf.mxu2 }
 0x3a8   : > { %v10529_v20 = vadd.f32 %v4688_v19, %v4168_v7 }
 0x3a9   : > { %v5067_v61 = vpop.f32.mrf.mxu3 }
 0x3aa   : > { %v5192_v16 = vadd.f32 %v5067_v61, %v10159_v2 }
 0x3ac   : > { %v5653_v23 = vadd.f32 %v10145_v26, %v5192_v16 }
 0x3ae   : > { %7941 = vmatmul.msk.bf16.gmra.mxu3 %vm2520_vm12, %v4961_v41  ;;  %v6248_v19 = vadd.f32 %v10414_v6, %v5653_v23 }
 0x3af   : > { %v4690_v21 = vpop.f32.mrf.mxu2 }
 0x3b0   : > { %v10535_v24 = vadd.f32 %v4690_v21, %v4169_v14 }
 0x3b1   : > { %v5070_v55 = vpop.f32.mrf.mxu3 }
 0x3b2   : > { %v5193_v2 = vadd.f32 %v5070_v55, %v10177_v9  ;;  %v6965_v9 = vunpack.c.h.bf16 %v1374_v50 }
 0x3b4   : > { %8282 = vmatmul.msk.bf16.gmra.mxu2 %vm2520_vm12, %v6477_v31  ;;  %v5654_v26 = vadd.f32 %v10163_v46, %v5193_v2 }
 0x3b7   : > { %v6583_v28 = vpop.f32.mrf.mxu2 }
 0x3b8   : > { %v6709_v48 = vadd.f32 %v6583_v28, %v6247_v39  ;;  %v6249_v39 = vadd.f32 %v10426_v13, %v5654_v26  ;;  %v8507_v13 = vld [vmem:[#allocation2 + $0x68] sm:$0xff] }
 0x3b9   : > { %v5072_v7 = vpop.f32.mrf.mxu3  ;;  %v6480_v50 = vrot.slane %v8507_v13, 3 }
 0x3ba   : > { %v6820_v40 = vadd.f32 %v10545_v42, %v6709_v48  ;;  %v5194_v31 = vadd.f32 %v5072_v7, %v10188_v4  ;;  %v4964_v7 = vrot.slane %v8442_v18, 2 }
 0x3bc   : > { %v6892_v14 = vmul.f32 0.1, %v6820_v40  ;;  %vm6856_vm0 = vcmp.gt.f32.partialorder %v6820_v40, 0.0  ;;  %v5655_v60 = vadd.f32 %v10180_v36, %v5194_v31  ;;  %v8443_v31 = vld [vmem:[#allocation2 + $0x70] sm:$0xff] }
 0x3be   : > { %7942 = vmatmul.msk.bf16.gmra.mxu3 %vm2520_vm12, %v4963_v3  ;;  %v6928_v55 = vsel %vm6856_vm0, %v6820_v40, %v6892_v14  ;;  %v4965_v3 = vsel %vm4940_vm1, %v4962_v54, %v4964_v7  ;;  %v1376_v14 = vld [vmem:[%s8727_s14 + $0x8] sm:$0xff]  }
 0x3bf   : > { %v6585_v61 = vpop.f32.mrf.mxu2  ;;  %v7000_v46 = vadd.f32 %v6964_v53, %v6928_v55 }
 0x3c0   : > { %v6710_v41 = vadd.f32 %v6585_v61, %v6248_v19  ;;  %v6250_v19 = vadd.f32 %v10438_v49, %v5655_v60 }
 0x3c1   : > { %v5075_v33 = vpop.f32.mrf.mxu3 }
 0x3c2   : > { %v6821_v21 = vadd.f32 %v10545_v42, %v6710_v41  ;;  %v5195_v2 = vadd.f32 %v5075_v33, %v10208_v52  ;;  %v6481_v52 = vsel %vm6458_vm7, %v6478_v63, %v6480_v50 }
 0x3c4   : > { %vm6857_vm8 = vcmp.gt.f32.partialorder %v6821_v21, 0.0  ;;  %v6893_v6 = vmul.f32 0.1, %v6821_v21  ;;  %8283 = vmatmul.msk.bf16.gmra.mxu2 %vm2520_vm12, %v6479_v47  ;;  %v5656_v36 = vadd.f32 %v10196_v57, %v5195_v2  ;;  %v6967_v47 = vunpack.c.h.bf16 %v1376_v14 }
 0x3c6   : > { %v6929_v16 = vsel %vm6857_vm8, %v6821_v21, %v6893_v6  ;;  %v6251_v6 = vadd.f32 %v10452_v59, %v5656_v36  ;;  %v10595_v36 = vpop.f32.mrf.mxu1 }
 0x3c7   : > { %v7001_v28 = vadd.f32 %v6965_v9, %v6929_v16  ;;  %v6588_v48 = vpop.f32.mrf.mxu2  ;;  %v6966_v9 = vunpack.c.l.bf16 %v1376_v14  ;;  %v10591_v14 = vpop.f32.mrf.mxu0 }
 0x3c8   : > { %v6711_v25 = vadd.f32 %v6588_v48, %v6249_v39  ;;  %v4966_v48 = vrot.slane %v8443_v31, 2  ;;  %v8509_v31 = vld [vmem:[#allocation2 + $0x78] sm:$0xff] }
 0x3c9   : > { %v8521_v23 = vpack.c.bf16 %v7001_v28, %v7000_v46  ;;  %v5077_v4 = vpop.f32.mrf.mxu3 }
 0x3ca   : > { %v6822_v40 = vadd.f32 %v10545_v42, %v6711_v25  ;;  %v5196_v33 = vadd.f32 %v5077_v4, %v10218_v58  ;;  %v8508_v25 = vld [vmem:[#allocation2 + $0x70] sm:$0xff]  ;;  %v4967_v60 = vsel %vm4940_vm1, %v4964_v7, %v4966_v48 }
 0x3cb   : > { %8522 = vst [vmem:[%s10565_s12] sm:$0xff] %v8521_v23   ;;  %v6482_v13 = vrot.slane %v8508_v25, 3 }
 0x3cc   : > { %v6894_v41 = vmul.f32 0.1, %v6822_v40  ;;  %vm6858_vm13 = vcmp.gt.f32.partialorder %v6822_v40, 0.0  ;;  %v5657_v63 = vadd.f32 %v10215_v29, %v5196_v33 }
 0x3cd   : > { %v6483_v7 = vsel %vm6458_vm7, %v6480_v50, %v6482_v13 }
 0x3ce   : > { %7943 = vmatmul.msk.bf16.gmra.mxu3 %vm2520_vm12, %v4965_v3  ;;  %v6930_v54 = vsel %vm6858_vm13, %v6822_v40, %v6894_v41  ;;  %v6252_v59 = vadd.f32 %v10462_v12, %v5657_v63  ;;  %v1378_v40 = vld [vmem:[%s8727_s14 + $0x10] sm:$0xff]   ;;  %v10608_v63 = vpop.f32.mrf.mxu1 }
 0x3cf   : > { %v6590_v61 = vpop.f32.mrf.mxu2  ;;  %v7002_v57 = vadd.f32 %v6966_v9, %v6930_v54  ;;  %v6969_v41 = vunpack.c.h.bf16 %v1378_v40  ;;  %v8444_v9 = vld [vmem:[#allocation2 + $0x78] sm:$0xff] }
 0x3d0   : > { %v6712_v26 = vadd.f32 %v6590_v61, %v6250_v19 }
 0x3d1   : > { %v5080_v53 = vpop.f32.mrf.mxu3 }
 0x3d2   : > { %v6823_v21 = vadd.f32 %v10545_v42, %v6712_v26  ;;  %v5197_v58 = vadd.f32 %v5080_v53, %v10239_v56  ;;  %v6968_v56 = vunpack.c.l.bf16 %v1378_v40 }
 0x3d4   : > { %vm6859_vm14 = vcmp.gt.f32.partialorder %v6823_v21, 0.0  ;;  %v6895_v49 = vmul.f32 0.1, %v6823_v21  ;;  %8284 = vmatmul.msk.bf16.gmra.mxu2 %vm2520_vm12, %v6481_v52  ;;  %v5658_v29 = vadd.f32 %v10241_v11, %v5197_v58 }
 0x3d6   : > { %v6931_v55 = vsel %vm6859_vm14, %v6823_v21, %v6895_v49  ;;  %v6253_v53 = vadd.f32 %v10473_v22, %v5658_v29  ;;  %v8445_v29 = vld [vmem:[#allocation2 + $0x80] sm:$0xff] }
 0x3d7   : > { %v7003_v16 = vadd.f32 %v6967_v47, %v6931_v55  ;;  %v6593_v39 = vpop.f32.mrf.mxu2 }
 0x3d8   : > { %v6713_v18 = vadd.f32 %v6593_v39, %v6251_v6  ;;  %v4968_v6 = vrot.slane %v8444_v9, 2 }
 0x3d9   : > { %v8526_v46 = vpack.c.bf16 %v7003_v16, %v7002_v57  ;;  %v5082_v28 = vpop.f32.mrf.mxu3  ;;  %v10602_v16 = vpop.f32.mrf.mxu0 }
 0x3da   : > { %v6824_v23 = vadd.f32 %v10545_v42, %v6713_v18  ;;  %v5198_v21 = vadd.f32 %v5082_v28, %v10254_v27  ;;  %v4969_v22 = vsel %vm4940_vm1, %v4966_v48, %v4968_v6 }
 0x3db   : > { %8608 = vst [vmem:[%s10565_s12 + $0x8] sm:$0xff] %v8526_v46   ;;  %v6484_v46 = vrot.slane %v8509_v31, 3 }
 0x3dc   : > { %v6896_v2 = vmul.f32 0.1, %v6824_v23  ;;  %vm6860_vm15 = vcmp.gt.f32.partialorder %v6824_v23, 0.0  ;;  %v5659_v33 = vadd.f32 %v10260_v37, %v5198_v21  ;;  %v1380_v37 = vld [vmem:[%s8727_s14 + $0x18] sm:$0xff]   ;;  %v4970_v21 = vrot.slane %v8445_v29, 2 }
 0x3dd   : > { %v6485_v48 = vsel %vm6458_vm7, %v6482_v13, %v6484_v46 }
 0x3de   : > { %7944 = vmatmul.msk.bf16.gmra.mxu3 %vm2520_vm12, %v4967_v60  ;;  %v6932_v12 = vsel %vm6860_vm15, %v6824_v23, %v6896_v2  ;;  %v6254_v39 = vadd.f32 %v10483_v35, %v5659_v33  ;;  %v4971_v9 = vsel %vm4940_vm1, %v4968_v6, %v4970_v21 }
 0x3df   : > { %v6595_v4 = vpop.f32.mrf.mxu2  ;;  %v7004_v47 = vadd.f32 %v6968_v56, %v6932_v12 }
 0x3e0   : > { %v6714_v3 = vadd.f32 %v6595_v4, %v6252_v59  ;;  %v6971_v59 = vunpack.c.h.bf16 %v1380_v37 }
 0x3e1   : > { %v5085_v61 = vpop.f32.mrf.mxu3 }
 0x3e2   : > { %v6825_v19 = vadd.f32 %v10545_v42, %v6714_v3  ;;  %v5199_v27 = vadd.f32 %v5085_v61, %v10274_v5  ;;  %v6970_v5 = vunpack.c.l.bf16 %v1380_v37 }
 0x3e4   : > { %vm6861_vm3 = vcmp.gt.f32.partialorder %v6825_v19, 0.0  ;;  %v6897_v26 = vmul.f32 0.1, %v6825_v19  ;;  %8285 = vmatmul.msk.bf16.gmra.mxu2 %vm2520_vm12, %v6483_v7  ;;  %v5660_v23 = vadd.f32 %v10279_v62, %v5199_v27  ;;  %v10617_v62 = vpop.f32.mrf.mxu0  ;;  %v10619_v7 = vpop.f32.mrf.mxu1 }
 0x3e6   : > { %v6933_v11 = vsel %vm6861_vm3, %v6825_v19, %v6897_v26  ;;  %v6255_v3 = vadd.f32 %v10496_v15, %v5660_v23  ;;  %v10920_v15 = vld [vmem:[#allocation41_spill] sm:$0xff] }
 0x3e7   : > { %v7005_v52 = vadd.f32 %v6969_v41, %v6933_v11  ;;  %v6598_v54 = vpop.f32.mrf.mxu2 }
 0x3e8   : > { %v6715_v49 = vadd.f32 %v6598_v54, %v6253_v53 }
 0x3e9   : > { %v8531_v50 = vpack.c.bf16 %v7005_v52, %v7004_v47  ;;  %v5087_v55 = vpop.f32.mrf.mxu3 }
 0x3ea   : > { %v6826_v57 = vadd.f32 %v10545_v42, %v6715_v49  ;;  %v5200_v40 = vadd.f32 %v5087_v55, %v10286_v8  ;;  %v8510_v8 = vld [vmem:[#allocation2 + $0x80] sm:$0xff] }
 0x3eb   : > { %8609 = vst [vmem:[%s10565_s12 + $0x10] sm:$0xff] %v8531_v50   ;;  %v6486_v54 = vrot.slane %v8510_v8, 3  ;;  %v1382_v49 = vld [vmem:[%s8727_s14 + $0x20] sm:$0xff]  }
 0x3ec   : > { %v6898_v28 = vmul.f32 0.1, %v6826_v57  ;;  %vm6862_vm4 = vcmp.gt.f32.partialorder %v6826_v57, 0.0  ;;  %v5661_v12 = vadd.f32 %v10299_v32, %v5200_v40  ;;  %v10629_v32 = vpop.f32.mrf.mxu0  ;;  %v10921_v55 = vld [vmem:[#allocation4_spill] sm:$0xff] }
 0x3ed   : > { %v6487_v6 = vsel %vm6458_vm7, %v6484_v46, %v6486_v54 }
 0x3ee   : > { %7945 = vmatmul.msk.bf16.gmra.mxu3 %vm2520_vm12, %v4969_v22  ;;  %v6934_v35 = vsel %vm6862_vm4, %v6826_v57, %v6898_v28  ;;  %v6256_v47 = vadd.f32 %v10504_v34, %v5661_v12  ;;  %v6972_v22 = vunpack.c.l.bf16 %v1382_v49  ;;  %v10634_v34 = vpop.f32.mrf.mxu1  ;;  %v10922_v28 = vld [vmem:[#allocation24_spill] sm:$0xff] }
 0x3ef   : > { %v6600_v18 = vpop.f32.mrf.mxu2  ;;  %v7006_v19 = vadd.f32 %v6970_v5, %v6934_v35 }
 0x3f0   : > { %v6716_v25 = vadd.f32 %v6600_v18, %v6254_v39  ;;  %v6973_v39 = vunpack.c.h.bf16 %v1382_v49 }
 0x3f1   : > { %v5090_v60 = vpop.f32.mrf.mxu3 }
 0x3f2   : > { %v6827_v58 = vadd.f32 %v10545_v42, %v6716_v25  ;;  %v5201_v53 = vadd.f32 %v5090_v60, %v10920_v15  ;;  %v8446_v60 = vld [vmem:[#allocation2 + $0x88] sm:$0xff] }
 0x3f4   : > { %vm6863_vm5 = vcmp.gt.f32.partialorder %v6827_v58, 0.0  ;;  %v6899_v4 = vmul.f32 0.1, %v6827_v58  ;;  %8286 = vmatmul.msk.bf16.gmra.mxu2 %vm2520_vm12, %v6485_v48  ;;  %v5662_v31 = vadd.f32 %v10921_v55, %v5201_v53  ;;  %v10640_v29 = vpop.f32.mrf.mxu0 }
 0x3f6   : > { %v6935_v2 = vsel %vm6863_vm5, %v6827_v58, %v6899_v4  ;;  %v6257_v58 = vadd.f32 %v10515_v43, %v5662_v31  ;;  %v10923_v4 = vld [vmem:[#allocation26_spill] sm:$0xff]  ;;  %v10924_v43 = vld [vmem:[#allocation35_spill] sm:$0xff]  ;;  %v10925_v31 = vld [vmem:[#allocation5_spill] sm:$0xff] }
 0x3f7   : > { %v7007_v61 = vadd.f32 %v6971_v59, %v6935_v2  ;;  %v6603_v56 = vpop.f32.mrf.mxu2 }
 0x3f8   : > { %v6717_v41 = vadd.f32 %v6603_v56, %v6255_v3  ;;  %v4972_v3 = vrot.slane %v8446_v60, 2  ;;  %v10644_v56 = vpop.f32.mrf.mxu1  ;;  %v8512_v60 = vld [vmem:[#allocation2 + $0x90] sm:$0xff] }
 0x3f9   : > { %v8536_v13 = vpack.c.bf16 %v7007_v61, %v7006_v19  ;;  %v5092_v26 = vpop.f32.mrf.mxu3  ;;  %v8511_v19 = vld [vmem:[#allocation2 + $0x88] sm:$0xff] }
 0x3fa   : > { %v6828_v11 = vadd.f32 %v10545_v42, %v6717_v41  ;;  %v5202_v25 = vadd.f32 %v5092_v26, %v10922_v28  ;;  %v6488_v8 = vrot.slane %v8511_v19, 3 }
 0x3fb   : > { %8610 = vst [vmem:[%s10565_s12 + $0x18] sm:$0xff] %v8536_v13   ;;  %v4973_v13 = vsel %vm4940_vm1, %v4970_v21, %v4972_v3 }
 0x3fc   : > { %v6900_v50 = vmul.f32 0.1, %v6828_v11  ;;  %vm6864_vm6 = vcmp.gt.f32.partialorder %v6828_v11, 0.0  ;;  %v5663_v40 = vadd.f32 %v10923_v4, %v5202_v25  ;;  %v10655_v55 = vpop.f32.mrf.mxu0 }
 0x3fe   : > { %7946 = vmatmul.msk.bf16.gmra.mxu3 %vm2520_vm12, %v4971_v9  ;;  %v6936_v18 = vsel %vm6864_vm6, %v6828_v11, %v6900_v50  ;;  %v6258_v12 = vadd.f32 %v10526_v10, %v5663_v40  ;;  %v1384_v11 = vld [vmem:[%s8727_s14 + $0x28] sm:$0xff]   ;;  %v6490_v40 = vrot.slane %v8512_v60, 3  ;;  %v1388_v60 = vld [vmem:[%s8727_s14 + $0x38] sm:$0xff]  }
 0x3ff   : > { %v6605_v52 = vpop.f32.mrf.mxu2  ;;  %v7008_v5 = vadd.f32 %v6972_v22, %v6936_v18  ;;  %v6974_v49 = vunpack.c.l.bf16 %v1384_v11  ;;  %v6975_v50 = vunpack.c.h.bf16 %v1384_v11  ;;  %v8447_v22 = vld [vmem:[#allocation2 + $0x90] sm:$0xff] }
 0x400   : > { %v6718_v33 = vadd.f32 %v6605_v52, %v6256_v47  ;;  %v6491_v11 = vsel %vm6458_vm7, %v6488_v8, %v6490_v40 }
 0x401   : > { %v5095_v27 = vpop.f32.mrf.mxu3 }
 0x402   : > { %v6829_v57 = vadd.f32 %v10545_v42, %v6718_v33  ;;  %v5203_v41 = vadd.f32 %v5095_v27, %v10924_v43  ;;  %v6489_v33 = vsel %vm6458_vm7, %v6486_v54, %v6488_v8 }
 0x404   : > { %vm6865_vm10 = vcmp.gt.f32.partialorder %v6829_v57, 0.0  ;;  %v6901_v37 = vmul.f32 0.1, %v6829_v57  ;;  %8287 = vmatmul.msk.bf16.gmra.mxu2 %vm2520_vm12, %v6487_v6  ;;  %v5664_v9 = vadd.f32 %v10591_v14, %v5203_v41 }
 0x406   : > { %v6937_v23 = vsel %vm6865_vm10, %v6829_v57, %v6901_v37  ;;  %v6259_v14 = vadd.f32 %v10595_v36, %v5664_v9  ;;  %v10659_v37 = vpop.f32.mrf.mxu1  ;;  %v10927_v9 = vld [vmem:[#allocation28_spill] sm:$0xff] }
 0x407   : > { %v7009_v59 = vadd.f32 %v6973_v39, %v6937_v23  ;;  %v6608_v48 = vpop.f32.mrf.mxu2 }
 0x408   : > { %v6719_v35 = vadd.f32 %v6608_v48, %v6257_v58  ;;  %v4974_v58 = vrot.slane %v8447_v22, 2  ;;  %v8513_v22 = vld [vmem:[#allocation2 + $0x98] sm:$0xff] }
 0x409   : > { %v8541_v46 = vpack.c.bf16 %v7009_v59, %v7008_v5  ;;  %v5097_v2 = vpop.f32.mrf.mxu3  ;;  %v10926_v59 = vld [vmem:[#allocation38_spill] sm:$0xff] }
 0x40a   : > { %v6830_v61 = vadd.f32 %v10545_v42, %v6719_v35  ;;  %v5204_v57 = vadd.f32 %v5097_v2, %v10925_v31  ;;  %v4975_v36 = vsel %vm4940_vm1, %v4972_v3, %v4974_v58  ;;  %v4837_v2 = vld [vmem:[#allocation2 + $0x98] sm:$0x3] }
 0x40b   : > { %8611 = vst [vmem:[%s10565_s12 + $0x20] sm:$0xff] %v8541_v46   ;;  %v10667_v46 = vpop.f32.mrf.mxu0 }
 0x40c   : > { %v6902_v15 = vmul.f32 0.1, %v6830_v61  ;;  %vm6866_vm11 = vcmp.gt.f32.partialorder %v6830_v61, 0.0  ;;  %v5665_v25 = vadd.f32 %v10602_v16, %v5204_v57  ;;  %v1386_v16 = vld [vmem:[%s8727_s14 + $0x30] sm:$0xff]  }
 0x40e   : > { %7947 = vmatmul.msk.bf16.gmra.mxu3 %vm2520_vm12, %v4973_v13  ;;  %v6938_v21 = vsel %vm6866_vm11, %v6830_v61, %v6902_v15  ;;  %v6260_v35 = vadd.f32 %v10608_v63, %v5665_v25  ;;  %v10671_v43 = vpop.f32.mrf.mxu1  ;;  %v6976_v63 = vunpack.c.l.bf16 %v1386_v16 }
 0x40f   : > { %v6610_v26 = vpop.f32.mrf.mxu2  ;;  %v7010_v39 = vadd.f32 %v6974_v49, %v6938_v21 }
 0x410   : > { %v6720_v53 = vadd.f32 %v6610_v26, %v6258_v12  ;;  %v4920_v12 = vunpack.c.l.b16 %v4837_v2  ;;  %v6977_v26 = vunpack.c.h.bf16 %v1386_v16  ;;  %v6979_v2 = vunpack.c.h.bf16 %v1388_v60 }
 0x411   : > { %v5100_v52 = vpop.f32.mrf.mxu3 }
 0x412   : > { %v6831_v47 = vadd.f32 %v10545_v42, %v6720_v53  ;;  %v5205_v48 = vadd.f32 %v5100_v52, %v10926_v59 }
 0x413   : > { %v10679_v31 = vpop.f32.mrf.mxu0 }
 0x414   : > { %vm6867_vm2 = vcmp.gt.f32.partialorder %v6831_v47, 0.0  ;;  %v6903_v10 = vmul.f32 0.1, %v6831_v47  ;;  %8288 = vmatmul.msk.bf16.gmra.mxu2 %vm2520_vm12, %v6489_v33  ;;  %v5666_v41 = vadd.f32 %v10617_v62, %v5205_v48  ;;  %v4939_v62 = vpack.c.b16 %v4920_v12, %v4920_v12 }
 0x416   : > { %v6939_v27 = vsel %vm6867_vm2, %v6831_v47, %v6903_v10  ;;  %v6261_v49 = vadd.f32 %v10619_v7, %v5666_v41  ;;  %v10928_v7 = vld [vmem:[#allocation7_spill] sm:$0xff]  ;;  %v10929_v41 = vld [vmem:[#allocation30_spill] sm:$0xff] }
 0x417   : > { %v7011_v6 = vadd.f32 %v6975_v50, %v6939_v27  ;;  %v6613_v18 = vpop.f32.mrf.mxu2 }
 0x418   : > { %v6721_v54 = vadd.f32 %v6613_v18, %v6259_v14  ;;  %v4976_v14 = vrot.slane %v4939_v62, 2  ;;  %v10930_v62 = vld [vmem:[#allocation6_spill] sm:$0xff] }
 0x419   : > { %v8546_v28 = vpack.c.bf16 %v7011_v6, %v7010_v39  ;;  %v5102_v23 = vpop.f32.mrf.mxu3  ;;  %v10683_v39 = vpop.f32.mrf.mxu1 }
 0x41a   : > { %v6832_v5 = vadd.f32 %v10545_v42, %v6721_v54  ;;  %v5206_v47 = vadd.f32 %v5102_v23, %v10927_v9  ;;  %v4977_v54 = vsel %vm4940_vm1, %v4974_v58, %v4976_v14  ;;  %v6492_v23 = vrot.slane %v8513_v22, 3 }
 0x41b   : > { %8612 = vst [vmem:[%s10565_s12 + $0x28] sm:$0xff] %v8546_v28  }
 0x41c   : > { %v6904_v19 = vmul.f32 0.1, %v6832_v5  ;;  %vm6868_vm9 = vcmp.gt.f32.partialorder %v6832_v5, 0.0  ;;  %v5667_v57 = vadd.f32 %v10629_v32, %v5206_v47  ;;  %v6493_v58 = vsel %vm6458_vm7, %v6490_v40, %v6492_v23 }
 0x41e   : > { %7948 = vmatmul.msk.bf16.gmra.mxu3 %vm2520_vm12, %v4975_v36  ;;  %v6940_v15 = vsel %vm6868_vm9, %v6832_v5, %v6904_v19  ;;  %v6262_v28 = vadd.f32 %v10634_v34, %v5667_v57  ;;  %v6355_v19 = vld [vmem:[#allocation2 + $0xa0] sm:$0x7] }
 0x41f   : > { %v6615_v4 = vpop.f32.mrf.mxu2  ;;  %v7012_v50 = vadd.f32 %v6976_v63, %v6940_v15 }
 0x420   : > { %v6722_v61 = vadd.f32 %v6615_v4, %v6260_v35  ;;  %v10693_v35 = vpop.f32.mrf.mxu0  ;;  %v6978_v4 = vunpack.c.l.bf16 %v1388_v60 }
 0x421   : > { %v5105_v3 = vpop.f32.mrf.mxu3 }
 0x422   : > { %v6833_v13 = vadd.f32 %v10545_v42, %v6722_v61  ;;  %v5207_v18 = vadd.f32 %v5105_v3, %v10928_v7  ;;  %v10697_v61 = vpop.f32.mrf.mxu1 }
 0x424   : > { %vm6869_vm0 = vcmp.gt.f32.partialorder %v6833_v13, 0.0  ;;  %v6905_v53 = vmul.f32 0.1, %v6833_v13  ;;  %8289 = vmatmul.msk.bf16.gmra.mxu2 %vm2520_vm12, %v6491_v11  ;;  %v5668_v59 = vadd.f32 %v10640_v29, %v5207_v18  ;;  %v6438_v11 = vunpack.c.l.b16 %v6355_v19 }
 0x426   : > { %v6941_v52 = vsel %vm6869_vm0, %v6833_v13, %v6905_v53  ;;  %v6263_v3 = vadd.f32 %v10644_v56, %v5668_v59  ;;  %v6457_v47 = vpack.c.b16 %v6438_v11, %v6438_v11 }
 0x427   : > { %v7013_v33 = vadd.f32 %v6977_v26, %v6941_v52  ;;  %v6618_v21 = vpop.f32.mrf.mxu2 }
 0x428   : > { %v6723_v10 = vadd.f32 %v6618_v21, %v6261_v49  ;;  %v5578_v49 = vpop.f32.mrf.mxu0  ;;  %v6494_v21 = vrot.slane %v6457_v47, 3  ;;  %v10933_v47 = vld [vmem:[#allocation10_spill] sm:$0xff] }
 0x429   : > { %v8551_v8 = vpack.c.bf16 %v7013_v33, %v7012_v50  ;;  %v5107_v27 = vpop.f32.mrf.mxu3 }
 0x42a   : > { %v6834_v6 = vadd.f32 %v10545_v42, %v6723_v10  ;;  %v5208_v29 = vadd.f32 %v5107_v27, %v10929_v41  ;;  %v6173_v10 = vpop.f32.mrf.mxu1  ;;  %v6495_v18 = vsel %vm6458_vm7, %v6492_v23, %v6494_v21 }
 0x42b   : > { %8613 = vst [vmem:[%s10565_s12 + $0x30] sm:$0xff] %v8551_v8   ;;  %v1390_v8 = vld [vmem:[%s8727_s14 + $0x40] sm:$0xff]  }
 0x42c   : > { %v6906_v32 = vmul.f32 0.1, %v6834_v6  ;;  %vm6870_vm8 = vcmp.gt.f32.partialorder %v6834_v6, 0.0  ;;  %v5669_v53 = vadd.f32 %v10655_v55, %v5208_v29  ;;  %v6981_v7 = vunpack.c.h.bf16 %v1390_v8 }
 0x42e   : > { %7949 = vmatmul.msk.bf16.gmra.mxu3 %vm2520_vm12, %v4977_v54  ;;  %v6942_v34 = vsel %vm6870_vm8, %v6834_v6, %v6906_v32  ;;  %v6264_v33 = vadd.f32 %v10659_v37, %v5669_v53  ;;  %v6980_v6 = vunpack.c.l.bf16 %v1390_v8 }
 0x42f   : > { %v6620_v25 = vpop.f32.mrf.mxu2  ;;  %v7014_v12 = vadd.f32 %v6978_v4, %v6942_v34 }
 0x430   : > { %v6724_v5 = vadd.f32 %v6620_v25, %v6262_v28  ;;  %v10931_v28 = vld [vmem:[#allocation9_spill] sm:$0xff] }
 0x431   : > { %v5110_v36 = vpop.f32.mrf.mxu3 }
 0x432   : > { %v6835_v48 = vadd.f32 %v10545_v42, %v6724_v5  ;;  %v5209_v50 = vadd.f32 %v5110_v36, %v10930_v62 }
 0x434   : > { %vm6871_vm1 = vcmp.gt.f32.partialorder %v6835_v48, 0.0  ;;  %v6907_v16 = vmul.f32 0.1, %v6835_v48  ;;  %8290 = vmatmul.msk.bf16.gmra.mxu2 %vm2520_vm12, %v6493_v58  ;;  %v5670_v14 = vadd.f32 %v10667_v46, %v5209_v50  ;;  %v5581_v46 = vpop.f32.mrf.mxu0 }
 0x436   : > { %v6943_v13 = vsel %vm6871_vm1, %v6835_v48, %v6907_v16  ;;  %v6265_v32 = vadd.f32 %v10671_v43, %v5670_v14  ;;  %v10932_v16 = vld [vmem:[#allocation32_spill] sm:$0xff] }
 0x437   : > { %v7015_v63 = vadd.f32 %v6979_v2, %v6943_v13  ;;  %v6623_v26 = vpop.f32.mrf.mxu2  ;;  %v6176_v2 = vpop.f32.mrf.mxu1  ;;  %v1392_v13 = vld [vmem:[%s8727_s14 + $0x48] sm:$0xff]  }
 0x438   : > { %v6725_v40 = vadd.f32 %v6623_v26, %v6263_v3 }
 0x439   : > { %v8556_v15 = vpack.c.bf16 %v7015_v63, %v7014_v12  ;;  %v5112_v9 = vpop.f32.mrf.mxu3 }
 0x43a   : > { %v6836_v52 = vadd.f32 %v10545_v42, %v6725_v40  ;;  %v5210_v25 = vadd.f32 %v5112_v9, %v10931_v28  ;;  %v6983_v40 = vunpack.c.h.bf16 %v1392_v13 }
 0x43b   : > { %8614 = vst [vmem:[%s10565_s12 + $0x38] sm:$0xff] %v8556_v15  }
 0x43c   : > { %v6908_v57 = vmul.f32 0.1, %v6836_v52  ;;  %vm6872_vm13 = vcmp.gt.f32.partialorder %v6836_v52, 0.0  ;;  %v5671_v23 = vadd.f32 %v10679_v31, %v5210_v25  ;;  %v5583_v12 = vpop.f32.mrf.mxu0  ;;  %v6982_v31 = vunpack.c.l.bf16 %v1392_v13 }
 0x43e   : > { %v6944_v54 = vsel %vm6872_vm13, %v6836_v52, %v6908_v57  ;;  %v6266_v41 = vadd.f32 %v10683_v39, %v5671_v23 }
 0x43f   : > { %v6625_v56 = vpop.f32.mrf.mxu2  ;;  %v7016_v5 = vadd.f32 %v6980_v6, %v6944_v54  ;;  %v6178_v15 = vpop.f32.mrf.mxu1  ;;  %v1394_v54 = vld [vmem:[%s8727_s14 + $0x50] sm:$0xff]  }
 0x440   : > { %v6726_v27 = vadd.f32 %v6625_v56, %v6264_v33 }
 0x441   : > { %v5115_v22 = vpop.f32.mrf.mxu3 }
 0x442   : > { %v6837_v55 = vadd.f32 %v10545_v42, %v6726_v27  ;;  %v5211_v19 = vadd.f32 %v5115_v22, %v10932_v16  ;;  %v10934_v22 = vld [vmem:[#allocation33_spill] sm:$0xff] }
 0x444   : > { %vm6873_vm14 = vcmp.gt.f32.partialorder %v6837_v55, 0.0  ;;  %v6909_v37 = vmul.f32 0.1, %v6837_v55  ;;  %8291 = vmatmul.msk.bf16.gmra.mxu2 %vm2520_vm12, %v6495_v18  ;;  %v5672_v63 = vadd.f32 %v10693_v35, %v5211_v19  ;;  %v5586_v27 = vpop.f32.mrf.mxu0 }
 0x446   : > { %v6945_v60 = vsel %vm6873_vm14, %v6837_v55, %v6909_v37  ;;  %v6267_v62 = vadd.f32 %v10697_v61, %v5672_v63 }
 0x447   : > { %v7017_v59 = vadd.f32 %v6981_v7, %v6945_v60  ;;  %v6628_v48 = vpop.f32.mrf.mxu2  ;;  %v6181_v55 = vpop.f32.mrf.mxu1 }
 0x448   : > { %v6727_v36 = vadd.f32 %v6628_v48, %v6265_v32  ;;  %v6984_v32 = vunpack.c.l.bf16 %v1394_v54 }
 0x449   : > { %v8561_v4 = vpack.c.bf16 %v7017_v59, %v7016_v5  ;;  %v5117_v58 = vpop.f32.mrf.mxu3 }
 0x44a   : > { %v6838_v34 = vadd.f32 %v10545_v42, %v6727_v36  ;;  %v5212_v39 = vadd.f32 %v5117_v58, %v10933_v47  ;;  %v10935_v36 = vld [vmem:[#allocation8_spill] sm:$0xff] }
 0x44b   : > { %8615 = vst [vmem:[%s10565_s12 + $0x40] sm:$0xff] %v8561_v4  }
 0x44c   : > { %v6910_v43 = vmul.f32 0.1, %v6838_v34  ;;  %vm6874_vm12 = vcmp.gt.f32.partialorder %v6838_v34, 0.0  ;;  %v5673_v8 = vadd.f32 %v5578_v49, %v5212_v39  ;;  %v6985_v49 = vunpack.c.h.bf16 %v1394_v54  ;;  %v5588_v48 = vpop.f32.mrf.mxu0 }
 0x44e   : > { %v6946_v53 = vsel %vm6874_vm12, %v6838_v34, %v6910_v43  ;;  %v6268_v7 = vadd.f32 %v6173_v10, %v5673_v8 }
 0x44f   : > { %v6630_v29 = vpop.f32.mrf.mxu2  ;;  %v7018_v50 = vadd.f32 %v6982_v31, %v6946_v53  ;;  %v6183_v19 = vpop.f32.mrf.mxu1  ;;  %v1396_v31 = vld [vmem:[%s8727_s14 + $0x58] sm:$0xff]  }
 0x450   : > { %v6728_v3 = vadd.f32 %v6630_v29, %v6266_v41 }
 0x451   : > { %v5120_v11 = vpop.f32.mrf.mxu3 }
 0x452   : > { %v6839_v26 = vadd.f32 %v10545_v42, %v6728_v3  ;;  %v5213_v6 = vadd.f32 %v5120_v11, %v10934_v22 }
 0x454   : > { %vm6875_vm7 = vcmp.gt.f32.partialorder %v6839_v26, 0.0  ;;  %v6911_v9 = vmul.f32 0.1, %v6839_v26  ;;  %v5674_v61 = vadd.f32 %v5581_v46, %v5213_v6 }
 0x456   : > { %v6947_v52 = vsel %vm6875_vm7, %v6839_v26, %v6911_v9  ;;  %v6269_v10 = vadd.f32 %v6176_v2, %v5674_v61  ;;  %v5591_v26 = vpop.f32.mrf.mxu0 }
 0x457   : > { %v7019_v33 = vadd.f32 %v6983_v40, %v6947_v52  ;;  %v6633_v56 = vpop.f32.mrf.mxu2  ;;  %v6186_v2 = vpop.f32.mrf.mxu1  ;;  %v6986_v52 = vunpack.c.l.bf16 %v1396_v31 }
 0x458   : > { %v6729_v35 = vadd.f32 %v6633_v56, %v6267_v62 }
 0x459   : > { %v8566_v21 = vpack.c.bf16 %v7019_v33, %v7018_v50  ;;  %v5122_v57 = vpop.f32.mrf.mxu3 }
 0x45a   : > { %v6840_v14 = vadd.f32 %v10545_v42, %v6729_v35  ;;  %v5214_v4 = vadd.f32 %v5122_v57, %v10935_v36 }
 0x45b   : > { %8616 = vst [vmem:[%s10565_s12 + $0x48] sm:$0xff] %v8566_v21  }
 0x45c   : > { %v6912_v37 = vmul.f32 0.1, %v6840_v14  ;;  %vm6876_vm15 = vcmp.gt.f32.partialorder %v6840_v14, 0.0  ;;  %v5675_v29 = vadd.f32 %v5583_v12, %v5214_v4  ;;  %v6987_v12 = vunpack.c.h.bf16 %v1396_v31 }
 0x45e   : > { %v6948_v5 = vsel %vm6876_vm15, %v6840_v14, %v6912_v37  ;;  %v6270_v63 = vadd.f32 %v6178_v15, %v5675_v29  ;;  %v5593_v57 = vpop.f32.mrf.mxu0 }
 0x45f   : > { %v6635_v18 = vpop.f32.mrf.mxu2  ;;  %v7020_v58 = vadd.f32 %v6984_v32, %v6948_v5  ;;  %v6188_v6 = vpop.f32.mrf.mxu1 }
 0x460   : > { %v6730_v28 = vadd.f32 %v6635_v18, %v6268_v7 }
 0x461   : > { %v5125_v60 = vpop.f32.mrf.mxu3 }
 0x462   : > { %v6841_v25 = vadd.f32 %v10545_v42, %v6730_v28  ;;  %v5215_v3 = vadd.f32 %v5125_v60, %v10443_v51 }
 0x464   : > { %vm6877_vm3 = vcmp.gt.f32.partialorder %v6841_v25, 0.0  ;;  %v6913_v59 = vmul.f32 0.1, %v6841_v25  ;;  %v5676_v9 = vadd.f32 %v5586_v27, %v5215_v3 }
 0x466   : > { %v6949_v23 = vsel %vm6877_vm3, %v6841_v25, %v6913_v59  ;;  %v6271_v33 = vadd.f32 %v6181_v55, %v5676_v9  ;;  %v5596_v32 = vpop.f32.mrf.mxu0 }
 0x467   : > { %v7021_v34 = vadd.f32 %v6985_v49, %v6949_v23  ;;  %v6638_v16 = vpop.f32.mrf.mxu2  ;;  %v6191_v36 = vpop.f32.mrf.mxu1 }
 0x468   : > { %v6731_v46 = vadd.f32 %v6638_v16, %v6269_v10 }
 0x469   : > { %v8571_v41 = vpack.c.bf16 %v7021_v34, %v7020_v58  ;;  %v5127_v13 = vpop.f32.mrf.mxu3 }
 0x46a   : > { %v6842_v43 = vadd.f32 %v10545_v42, %v6731_v46  ;;  %v5216_v51 = vadd.f32 %v5127_v13, %v10450_v1  ;;  %v1398_v1 = vld [vmem:[%s8727_s14 + $0x60] sm:$0xff]  }
 0x46b   : > { %8617 = vst [vmem:[%s10565_s12 + $0x50] sm:$0xff] %v8571_v41   ;;  %v6988_v49 = vunpack.c.l.bf16 %v1398_v1  ;;  %v6989_v5 = vunpack.c.h.bf16 %v1398_v1 }
 0x46c   : > { %v6914_v40 = vmul.f32 0.1, %v6842_v43  ;;  %vm6878_vm4 = vcmp.gt.f32.partialorder %v6842_v43, 0.0  ;;  %v5677_v14 = vadd.f32 %v5588_v48, %v5216_v51 }
 0x46e   : > { %v6950_v62 = vsel %vm6878_vm4, %v6842_v43, %v6914_v40  ;;  %v6272_v54 = vadd.f32 %v6183_v19, %v5677_v14  ;;  %v5598_v13 = vpop.f32.mrf.mxu0 }
 0x46f   : > { %v6640_v11 = vpop.f32.mrf.mxu2  ;;  %v7022_v56 = vadd.f32 %v6986_v52, %v6950_v62 }
 0x470   : > { %v6732_v53 = vadd.f32 %v6640_v11, %v6270_v63 }
 0x471   : > { %v5130_v39 = vpop.f32.mrf.mxu3 }
 0x472   : > { %v6843_v47 = vadd.f32 %v10545_v42, %v6732_v53  ;;  %v5217_v18 = vadd.f32 %v5130_v39, %v10460_v30 }
 0x474   : > { %vm6879_vm5 = vcmp.gt.f32.partialorder %v6843_v47, 0.0  ;;  %v6915_v50 = vmul.f32 0.1, %v6843_v47  ;;  %v5678_v55 = vadd.f32 %v5591_v26, %v5217_v18  ;;  %v6193_v26 = vpop.f32.mrf.mxu1 }
 0x476   : > { %v6951_v15 = vsel %vm6879_vm5, %v6843_v47, %v6915_v50  ;;  %v6273_v23 = vadd.f32 %v6186_v2, %v5678_v55  ;;  %v5601_v51 = vpop.f32.mrf.mxu0 }
 0x477   : > { %v7023_v35 = vadd.f32 %v6987_v12, %v6951_v15  ;;  %v6643_v21 = vpop.f32.mrf.mxu2  ;;  %v10936_v12 = vld [vmem:[#allocation12_spill] sm:$0xff] }
 0x478   : > { %v6733_v8 = vadd.f32 %v6643_v21, %v6271_v33 }
 0x479   : > { %v8576_v27 = vpack.c.bf16 %v7023_v35, %v7022_v56  ;;  %v5132_v22 = vpop.f32.mrf.mxu3 }
 0x47a   : > { %v6844_v7 = vadd.f32 %v10545_v42, %v6733_v8  ;;  %v5218_v30 = vadd.f32 %v5132_v22, %v10468_v0  ;;  %v1400_v0 = vld [vmem:[%s8727_s14 + $0x68] sm:$0xff]  }
 0x47b   : > { %8618 = vst [vmem:[%s10565_s12 + $0x58] sm:$0xff] %v8576_v27   ;;  %v6990_v9 = vunpack.c.l.bf16 %v1400_v0  ;;  %v6991_v47 = vunpack.c.h.bf16 %v1400_v0  ;;  %v10937_v22 = vld [vmem:[#allocation36_spill] sm:$0xff] }
 0x47c   : > { %v6916_v28 = vmul.f32 0.1, %v6844_v7  ;;  %vm6880_vm6 = vcmp.gt.f32.partialorder %v6844_v7, 0.0  ;;  %v5679_v46 = vadd.f32 %v5593_v57, %v5218_v30  ;;  %v6196_v8 = vpop.f32.mrf.mxu1 }
 0x47e   : > { %v6952_v59 = vsel %vm6880_vm6, %v6844_v7, %v6916_v28  ;;  %v6274_v3 = vadd.f32 %v6188_v6, %v5679_v46  ;;  %v5603_v28 = vpop.f32.mrf.mxu0 }
 0x47f   : > { %v6645_v37 = vpop.f32.mrf.mxu2  ;;  %v7024_v10 = vadd.f32 %v6988_v49, %v6952_v59 }
 0x480   : > { %v6734_v61 = vadd.f32 %v6645_v37, %v6272_v54  ;;  %v1402_v54 = vld [vmem:[%s8727_s14 + $0x70] sm:$0xff]  }
 0x481   : > { %v5135_v60 = vpop.f32.mrf.mxu3 }
 0x482   : > { %v6845_v25 = vadd.f32 %v10545_v42, %v6734_v61  ;;  %v5219_v43 = vadd.f32 %v5135_v60, %v10478_v38  ;;  %v6993_v60 = vunpack.c.h.bf16 %v1402_v54 }
 0x484   : > { %vm6881_vm10 = vcmp.gt.f32.partialorder %v6845_v25, 0.0  ;;  %v6917_v48 = vmul.f32 0.1, %v6845_v25  ;;  %v5680_v40 = vadd.f32 %v5596_v32, %v5219_v43  ;;  %v6198_v32 = vpop.f32.mrf.mxu1 }
 0x486   : > { %v6953_v4 = vsel %vm6881_vm10, %v6845_v25, %v6917_v48  ;;  %v6275_v50 = vadd.f32 %v6191_v36, %v5680_v40  ;;  %v6992_v25 = vunpack.c.l.bf16 %v1402_v54 }
 0x487   : > { %v7025_v58 = vadd.f32 %v6989_v5, %v6953_v4  ;;  %v6648_v34 = vpop.f32.mrf.mxu2 }
 0x488   : > { %v6735_v16 = vadd.f32 %v6648_v34, %v6273_v23 }
 0x489   : > { %v8581_v19 = vpack.c.bf16 %v7025_v58, %v7024_v10  ;;  %v5137_v41 = vpop.f32.mrf.mxu3 }
 0x48a   : > { %v6846_v29 = vadd.f32 %v10545_v42, %v6735_v16  ;;  %v5220_v62 = vadd.f32 %v5137_v41, %v10936_v12 }
 0x48b   : > { %8619 = vst [vmem:[%s10565_s12 + $0x60] sm:$0xff] %v8581_v19   ;;  %v10757_v19 = vld [vmem:[%s10782_s4] ss:$0 sm:$0xff] }
 0x48c   : > { %v6918_v11 = vmul.f32 0.1, %v6846_v29  ;;  %vm6882_vm11 = vcmp.gt.f32.partialorder %v6846_v29, 0.0  ;;  %v5681_v57 = vadd.f32 %v5598_v13, %v5220_v62  ;;  %v6201_v41 = vpop.f32.mrf.mxu1 }
 0x48e   : > { %v6954_v39 = vsel %vm6882_vm11, %v6846_v29, %v6918_v11  ;;  %v6276_v7 = vadd.f32 %v6193_v26, %v5681_v57 }
 0x48f   : > { %v6650_v63 = vpop.f32.mrf.mxu2  ;;  %v7026_v15 = vadd.f32 %v6990_v9, %v6954_v39 }
 0x490   : > { %v6736_v31 = vadd.f32 %v6650_v63, %v6274_v3  ;;  %v1404_v3 = vld [vmem:[%s8727_s14 + $0x78] sm:$0xff]  }
 0x491   : > { %v5140_v2 = vpop.f32.mrf.mxu3  ;;  %v6995_v40 = vunpack.c.h.bf16 %v1404_v3 }
 0x492   : > { %v6847_v53 = vadd.f32 %v10545_v42, %v6736_v31  ;;  %v5221_v6 = vadd.f32 %v5140_v2, %v10937_v22  ;;  %v6994_v31 = vunpack.c.l.bf16 %v1404_v3 }
 0x494   : > { %vm6883_vm2 = vcmp.gt.f32.partialorder %v6847_v53, 0.0  ;;  %v6919_v52 = vmul.f32 0.1, %v6847_v53  ;;  %v5682_v61 = vadd.f32 %v5601_v51, %v5221_v6 }
 0x496   : > { %v6955_v38 = vsel %vm6883_vm2, %v6847_v53, %v6919_v52  ;;  %v6277_v30 = vadd.f32 %v6196_v8, %v5682_v61 }
 0x497   : > { %v7027_v33 = vadd.f32 %v6991_v47, %v6955_v38  ;;  %v6653_v56 = vpop.f32.mrf.mxu2 }
 0x498   : > { %v6737_v35 = vadd.f32 %v6653_v56, %v6275_v50  ;;  %v6203_v50 = vpop.f32.mrf.mxu1 }
 0x499   : > { %v8586_v21 = vpack.c.bf16 %v7027_v33, %v7026_v15  ;;  %v5142_v27 = vpop.f32.mrf.mxu3 }
 0x49a   : > { %v6848_v14 = vadd.f32 %v10545_v42, %v6737_v35  ;;  %v5222_v48 = vadd.f32 %v5142_v27, %v10502_v44 }
 0x49b   : > { %8620 = vst [vmem:[%s10565_s12 + $0x68] sm:$0xff] %v8586_v21  }
 0x49c   : > { %v6920_v37 = vmul.f32 0.1, %v6848_v14  ;;  %vm6884_vm9 = vcmp.gt.f32.partialorder %v6848_v14, 0.0  ;;  %v5683_v16 = vadd.f32 %v5603_v28, %v5222_v48 }
 0x49e   : > { %v6956_v49 = vsel %vm6884_vm9, %v6848_v14, %v6920_v37  ;;  %v6278_v29 = vadd.f32 %v6198_v32, %v5683_v16 }
 0x49f   : > { %v6655_v18 = vpop.f32.mrf.mxu2  ;;  %v7028_v4 = vadd.f32 %v6992_v25, %v6956_v49 }
 0x4a0   : > { %v6738_v1 = vadd.f32 %v6655_v18, %v6276_v7  ;;  %v6206_v7 = vpop.f32.mrf.mxu1 }
 0x4a1   : > { %v5145_v59 = vpop.f32.mrf.mxu3 }
 0x4a2   : > { %v6849_v55 = vadd.f32 %v10545_v42, %v6738_v1  ;;  %v5606_v42 = vpop.f32.mrf.mxu0  ;;  %v5223_v44 = vadd.f32 %v5145_v59, %v10512_v17 }
 0x4a4   : > { %vm6885_vm0 = vcmp.gt.f32.partialorder %v6849_v55, 0.0  ;;  %v6921_v5 = vmul.f32 0.1, %v6849_v55  ;;  %v5684_v0 = vadd.f32 %v5606_v42, %v5223_v44 }
 0x4a6   : > { %v6957_v36 = vsel %vm6885_vm0, %v6849_v55, %v6921_v5  ;;  %v6279_v39 = vadd.f32 %v6201_v41, %v5684_v0 }
 0x4a7   : > { %v7029_v23 = vadd.f32 %v6993_v60, %v6957_v36  ;;  %v6658_v10 = vpop.f32.mrf.mxu2 }
 0x4a8   : > { %v6739_v58 = vadd.f32 %v6658_v10, %v6277_v30  ;;  %v6208_v30 = vpop.f32.mrf.mxu1  ;;  %v1408_v10 = vld [vmem:[%s8727_s14 + $0x88] sm:$0xff]  }
 0x4a9   : > { %v8591_v34 = vpack.c.bf16 %v7029_v23, %v7028_v4  ;;  %v5147_v13 = vpop.f32.mrf.mxu3  ;;  %v6998_v16 = vunpack.c.l.bf16 %v1408_v10  ;;  %v6999_v42 = vunpack.c.h.bf16 %v1408_v10 }
 0x4aa   : > { %v6850_v46 = vadd.f32 %v10757_v19, %v6739_v58  ;;  %v5608_v9 = vpop.f32.mrf.mxu0  ;;  %v5224_v47 = vadd.f32 %v5147_v13, %v10520_v45  ;;  %v1406_v45 = vld [vmem:[%s8727_s14 + $0x80] sm:$0xff]  }
 0x4ab   : > { %8621 = vst [vmem:[%s10565_s12 + $0x70] sm:$0xff] %v8591_v34   ;;  %v6996_v18 = vunpack.c.l.bf16 %v1406_v45  ;;  %v6997_v37 = vunpack.c.h.bf16 %v1406_v45 }
 0x4ac   : > { %v6922_v63 = vmul.f32 0.1, %v6850_v46  ;;  %vm6886_vm8 = vcmp.gt.f32.partialorder %v6850_v46, 0.0  ;;  %v5685_v33 = vadd.f32 %v5608_v9, %v5224_v47 }
 0x4ae   : > { %v6958_v53 = vsel %vm6886_vm8, %v6850_v46, %v6922_v63  ;;  %v6280_v21 = vadd.f32 %v6203_v50, %v5685_v33 }
 0x4af   : > { %v6660_v43 = vpop.f32.mrf.mxu2  ;;  %v7030_v52 = vadd.f32 %v6994_v31, %v6958_v53 }
 0x4b0   : > { %v6740_v26 = vadd.f32 %v6660_v43, %v6278_v29 }
 0x4b1   : > { %v5150_v15 = vpop.f32.mrf.mxu3 }
 0x4b2   : > { %v6851_v11 = vadd.f32 %v10757_v19, %v6740_v26  ;;  %v5225_v35 = vadd.f32 %v5150_v15, %v10529_v20  ;;  %v5611_v8 = vpop.f32.mrf.mxu0 }
 0x4b4   : > { %vm6887_vm1 = vcmp.gt.f32.partialorder %v6851_v11, 0.0  ;;  %v6923_v2 = vmul.f32 0.1, %v6851_v11  ;;  %v5686_v22 = vadd.f32 %v5611_v8, %v5225_v35 }
 0x4b6   : > { %v6959_v17 = vsel %vm6887_vm1, %v6851_v11, %v6923_v2  ;;  %v6281_v55 = vadd.f32 %v6206_v7, %v5686_v22 }
 0x4b7   : > { %v7031_v12 = vadd.f32 %v6995_v40, %v6959_v17  ;;  %v6663_v62 = vpop.f32.mrf.mxu2 }
 0x4b8   : > { %v6741_v38 = vadd.f32 %v6663_v62, %v6279_v39 }
 0x4b9   : > { %v8596_v51 = vpack.c.bf16 %v7031_v12, %v7030_v52  ;;  %v5152_v54 = vpop.f32.mrf.mxu3 }
 0x4ba   : > { %v6852_v56 = vadd.f32 %v10757_v19, %v6741_v38  ;;  %v5226_v20 = vadd.f32 %v5152_v54, %v10535_v24  ;;  %v5613_v5 = vpop.f32.mrf.mxu0 }
 0x4bb   : > { %8622 = vst [vmem:[%s10565_s12 + $0x78] sm:$0xff] %v8596_v51  }
 0x4bc   : > { %v6924_v27 = vmul.f32 0.1, %v6852_v56  ;;  %vm6888_vm13 = vcmp.gt.f32.partialorder %v6852_v56, 0.0  ;;  %v5687_v48 = vadd.f32 %v5613_v5, %v5226_v20 }
 0x4be   : > { %v6960_v1 = vsel %vm6888_vm13, %v6852_v56, %v6924_v27  ;;  %v6282_v4 = vadd.f32 %v6208_v30, %v5687_v48 }
 0x4bf   : > { %v6665_v57 = vpop.f32.mrf.mxu2  ;;  %v7032_v25 = vadd.f32 %v6996_v18, %v6960_v1 }
 0x4c0   : > { %v6742_v14 = vadd.f32 %v6665_v57, %v6280_v21 }
 0x4c2   : > { %v6853_v6 = vadd.f32 %v10757_v19, %v6742_v14 }
 0x4c4   : > { %vm6889_vm14 = vcmp.gt.f32.partialorder %v6853_v6, 0.0  ;;  %v6925_v28 = vmul.f32 0.1, %v6853_v6 }
 0x4c6   : > { %v6961_v61 = vsel %vm6889_vm14, %v6853_v6, %v6925_v28 }
 0x4c7   : > { %v7033_v60 = vadd.f32 %v6997_v37, %v6961_v61  ;;  %v6668_v32 = vpop.f32.mrf.mxu2 }
 0x4c8   : > { %v6743_v49 = vadd.f32 %v6668_v32, %v6281_v55 }
 0x4c9   : > { %v8601_v59 = vpack.c.bf16 %v7033_v60, %v7032_v25 }
 0x4ca   : > { %v6854_v36 = vadd.f32 %v10757_v19, %v6743_v49 }
 0x4cb   : > { %8623 = vst [vmem:[%s10565_s12 + $0x80] sm:$0xff] %v8601_v59  }
 0x4cc   : > { %v6926_v58 = vmul.f32 0.1, %v6854_v36  ;;  %vm6890_vm12 = vcmp.gt.f32.partialorder %v6854_v36, 0.0 }
 0x4ce   : > { %v6962_v46 = vsel %vm6890_vm12, %v6854_v36, %v6926_v58 }
 0x4cf   : > { %v6670_v23 = vpop.f32.mrf.mxu2  ;;  %v7034_v29 = vadd.f32 %v6998_v16, %v6962_v46 }
 0x4d0   : > { %v6744_v34 = vadd.f32 %v6670_v23, %v6282_v4 }
 0x4d2   : > { %v6855_v24 = vadd.f32 %v10757_v19, %v6744_v34 }
 0x4d4   : > { %vm6891_vm7 = vcmp.gt.f32.partialorder %v6855_v24, 0.0  ;;  %v6927_v41 = vmul.f32 0.1, %v6855_v24 }
 0x4d6   : > { %v6963_v44 = vsel %vm6891_vm7, %v6855_v24, %v6927_v41 }
 0x4d7   : > { %v7035_v13 = vadd.f32 %v6999_v42, %v6963_v44 }
 0x4d9   : > { %v8606_v43 = vpack.c.bf16 %v7035_v13, %v7034_v29 }
 0x4db   : > { %8624 = vst [vmem:[%s10565_s12 + $0x88] sm:$0xff] %v8606_v43  }
 0x4dc PF: > { %s15_s18 = sadd.s32 1, %s8654_s18  }
 0x4dd   : > { %p12_p4 = scmp.ge.s32.totalorder %s15_s18, 4  }
 0x4df   :  { %14 = sbr.rel (!%p12_p4) target bundleno = 1 (0x1), region = 78 }

</bundles_post_ra>
